<compile_context>
chip_gen: v7x
topology: tpu7x:2x2x1
jax: 0.10.0
libtpu: 0.0.40
codegen_flags: <defaults>
</compile_context>

<pallas_src>
import functools

import jax
import jax.numpy as jnp
from jax import lax
from jax.experimental import pallas as pl
from jax.experimental.pallas import tpu as pltpu

# torch defaults
_SELU_ALPHA = 1.6732632423543772848170429916717
_SELU_SCALE = 1.0507009873554804934193349852946
_LEAKY_SLOPE = 0.01      # nn.LeakyReLU default negative_slope
_BN_EPS = 1e-5           # nn.BatchNorm2d default eps

_LANES = 128


def _apply_act(x, act):
    """Elementwise activation matching torch.nn semantics (f32 math)."""
    if act is None:
        return x
    a = act.lower()
    if a == "relu":
        return jnp.maximum(x, 0.0)
    if a == "relu6":
        return jnp.clip(x, 0.0, 6.0)
    if a == "silu":
        return x * jax.nn.sigmoid(x)          # exp/recip on the EUP slot
    if a == "selu":
        return _SELU_SCALE * jnp.where(x > 0, x, _SELU_ALPHA * (jnp.exp(x) - 1.0))
    if a == "leakrelu":
        return jnp.where(x >= 0, x, _LEAKY_SLOPE * x)
    if a == "tanh":
        return jnp.tanh(x)
    raise ValueError(f"unknown activation: {act}")


def _round_up(v, m):
    return ((v + m - 1) // m) * m


def _sublane(dtype):
    return {4: 8, 2: 16, 1: 32}[jnp.dtype(dtype).itemsize]


def _conv_bn_act_kernel(x_ref, w_ref, s_ref, b_ref, o_ref, lhs_ref, acc_ref,
                        *, kh, kw, th, w_out, cin_p, act):
    """One grid step = (batch n, output-row tile i).

    x_ref   : (Hp, Wp, Cin_p)          padded bf16 NHWC image (resident per batch)
    w_ref   : (Kh, Kw*Cin_p, Cout_p)   bf16 weights, im2col-folded over (Kw, Cin)
    s_ref   : (1, Cout_p)              folded BN scale  = gamma / sqrt(var + eps)
    b_ref   : (1, Cout_p)              folded BN shift  = (bias - mean)*scale + beta
    o_ref   : (th*W, Cout_p)           output rows [i*th, (i+1)*th), flat over (h, w)
    lhs_ref : (th*W, Kw*Cin_p) bf16    im2col LHS scratch (lane-aligned columns)
    acc_ref : (th*W, Cout_p)   f32     accumulator scratch
    """
    h0 = pl.program_id(1) * th
    acc_ref[...] = jnp.zeros_like(acc_ref)

    # One MXU dot per kernel row; the Kw taps are folded into the contraction
    # via an im2col LHS built in VMEM scratch.  Column blocks of the scratch
    # are 128-lane aligned because Cin_p % 128 == 0.
    for dh in range(kh):
        for dw in range(kw):
            patch = x_ref[pl.ds(h0 + dh, th), pl.ds(dw, w_out), :]   # (th, W, Cin_p)
            # NOTE: the (th, W) -> th*W merge is a free reshape when W is a
            # multiple of the bf16 sublane count (16); otherwise it pays a
            # relayout copy but stays correct.
            lhs_ref[:, dw * cin_p:(dw + 1) * cin_p] = patch.reshape(th * w_out, cin_p)
        acc_ref[...] += jnp.dot(lhs_ref[...], w_ref[dh],
                                preferred_element_type=jnp.float32)

    # Fused BatchNorm (inference) + activation epilogue in f32, then one
    # lane-dense store of the output tile.
    y = acc_ref[...] * s_ref[...] + b_ref[...]
    o_ref[...] = _apply_act(y, act).astype(o_ref.dtype)


def conv_bn_act(x, weight, conv_bias, gamma, beta, running_mean, running_var,
                *, act_type=None, eps=_BN_EPS, compute_dtype=jnp.bfloat16):
    """Fused Conv2d(stride=1, padding='same') + BatchNorm2d(eval) + Activation.

    x      : (N, Cin, H, W)       NCHW, as in the PyTorch module
    weight : (Cout, Cin, Kh, Kw)  torch Conv2d layout
    conv_bias, gamma, beta, running_mean, running_var : (Cout,)
    """
    N, Cin, H, W = x.shape
    Cout, Cin_w, Kh, Kw = weight.shape
    assert Cin_w == Cin

    Cin_p = _round_up(Cin, _LANES)
    Cout_p = _round_up(Cout, _LANES)

    # ---- fold BN (inference) into a per-channel f32 scale / shift ----------
    scale = (gamma / jnp.sqrt(running_var + eps)).astype(jnp.float32)
    shift = ((conv_bias - running_mean) * scale + beta).astype(jnp.float32)
    scale2 = jnp.pad(scale.reshape(1, Cout), ((0, 0), (0, Cout_p - Cout)))
    shift2 = jnp.pad(shift.reshape(1, Cout), ((0, 0), (0, Cout_p - Cout)))

    # ---- layout plumbing: NCHW -> NHWC, halo + channel pad, bf16 cast ------
    ph0 = (Kh - 1) // 2
    ph1 = (Kh - 1) - ph0
    pw0 = (Kw - 1) // 2
    pw1 = (Kw - 1) - pw0
    x_nhwc = jnp.transpose(x, (0, 2, 3, 1))
    x_pad = jnp.pad(x_nhwc, ((0, 0), (ph0, ph1), (pw0, pw1), (0, Cin_p - Cin)))
    x_pad = x_pad.astype(compute_dtype)
    Hp, Wp = H + Kh - 1, W + Kw - 1

    # OIHW -> (Kh, Kw*Cin_p, Cout_p): LHS column dw*Cin_p + c pairs with
    # weight[o, c, dh, dw].
    w_hwio = jnp.transpose(weight, (2, 3, 1, 0))
    w_hwio = jnp.pad(w_hwio, ((0, 0), (0, 0), (0, Cin_p - Cin), (0, Cout_p - Cout)))
    w_mat = w_hwio.reshape(Kh, Kw * Cin_p, Cout_p).astype(compute_dtype)

    out_dtype = x.dtype
    out_item = jnp.dtype(out_dtype).itemsize
    cdt_item = jnp.dtype(compute_dtype).itemsize

    # ---- VMEM budgeting: generation-aware tile pick + vmem limit -----------
    try:
        vmem_cap = int(pltpu.get_tpu_info().vmem_capacity_bytes)
    except Exception:
        vmem_cap = 64 * 1024 * 1024          # v7x physical per TC (conservative)

    resident = (2 * Hp * Wp * Cin_p * cdt_item          # input image, double-buffered
                + 2 * Kh * Kw * Cin_p * Cout_p * cdt_item   # weights, double-buffered
                + 4 * 2 * Cout_p * 4)                       # scale/shift
    budget = max(int(vmem_cap * 0.7) - resident - (2 << 20), 1 << 20)

    subl = max(_sublane(out_dtype), _sublane(compute_dtype))
    per_row = W * (Cout_p * (2 * out_item + 4) + Kw * Cin_p * cdt_item)
    cands = [d for d in range(1, H + 1)
             if H % d == 0 and (d == H or (d * W) % subl == 0)]
    fitting = [d for d in cands if d * per_row <= budget]
    th = max(fitting) if fitting else min(cands)

    vmem_limit = int(min(vmem_cap,
                         max(resident + th * per_row + (8 << 20), 32 << 20)))

    grid = (N, H // th)
    kernel = functools.partial(_conv_bn_act_kernel, kh=Kh, kw=Kw, th=th,
                               w_out=W, cin_p=Cin_p, act=act_type)

    flops = 2 * N * H * W * Cout * Cin * Kh * Kw
    transc = (N * H * W * Cout
              if (act_type or "").lower() in ("silu", "selu", "tanh") else 0)
    bytes_accessed = (x_pad.size * cdt_item + w_mat.size * cdt_item
                      + N * H * W * Cout_p * out_item)

    out_flat = pl.pallas_call(
        kernel,
        out_shape=jax.ShapeDtypeStruct((N, H * W, Cout_p), out_dtype),
        grid_spec=pltpu.PrefetchScalarGridSpec(
            num_scalar_prefetch=0,
            grid=grid,
            in_specs=[
                # full padded image per batch, resident across the h-tile axis
                pl.BlockSpec((None, Hp, Wp, Cin_p), lambda n, h: (n, 0, 0, 0)),
                # conv weights + folded BN params: loaded once, resident
                pl.BlockSpec((Kh, Kw * Cin_p, Cout_p), lambda n, h: (0, 0, 0)),
                pl.BlockSpec((1, Cout_p), lambda n, h: (0, 0)),
                pl.BlockSpec((1, Cout_p), lambda n, h: (0, 0)),
            ],
            out_specs=pl.BlockSpec((None, th * W, Cout_p), lambda n, h: (n, h, 0)),
            scratch_shapes=[
                pltpu.VMEM((th * W, Kw * Cin_p), compute_dtype),   # im2col LHS
                pltpu.VMEM((th * W, Cout_p), jnp.float32),         # accumulator
            ],
        ),
        compiler_params=pltpu.CompilerParams(
            # h is "arbitrary": sharding it across v7x's two TensorCores would
            # duplicate the resident image DMA/VMEM; batch stays "parallel".
            dimension_semantics=("parallel", "arbitrary"),
            vmem_limit_bytes=vmem_limit,
        ),
        cost_estimate=pl.CostEstimate(flops=flops, transcendentals=transc,
                                      bytes_accessed=bytes_accessed),
    )(x_pad, w_mat, scale2, shift2)

    # (N, H*W, Cout_p) -> slice off channel pad -> NCHW
    out = out_flat.reshape(N, H, W, Cout_p)[..., :Cout]
    return jnp.transpose(out, (0, 3, 1, 2))


def _conv_bn_act_ref(x, weight, conv_bias, gamma, beta, mean, var, act_type,
                     eps=_BN_EPS):
    """Pure-JAX reference (XLA conv + eval-mode BN + activation)."""
    Kh, Kw = weight.shape[2], weight.shape[3]
    ph0 = (Kh - 1) // 2
    pw0 = (Kw - 1) // 2
    y = lax.conv_general_dilated(
        x.astype(jnp.float32), weight.astype(jnp.float32),
        window_strides=(1, 1),
        padding=((ph0, Kh - 1 - ph0), (pw0, Kw - 1 - pw0)),
        dimension_numbers=("NCHW", "OIHW", "NCHW"))
    y = y + conv_bias[None, :, None, None]
    y = (y - mean[None, :, None, None]) / jnp.sqrt(var[None, :, None, None] + eps)
    y = y * gamma[None, :, None, None] + beta[None, :, None, None]
    return _apply_act(y, act_type).astype(x.dtype)


if __name__ == "__main__":
    key = jax.random.PRNGKey(0)
    k1, k2, k3, k4, k5, k6, k7 = jax.random.split(key, 7)

    N, Cin, H, W = 2, 4, 16, 16
    Cout, K = 8, 3

    # Integer-valued conv inputs keep the bf16-operand / f32-accumulate MXU
    # result exact, so the kernel/reference comparison is tight.
    x = jnp.round(jax.random.normal(k1, (N, Cin, H, W)) * 3.0).astype(jnp.float32)
    weight = jnp.round(jax.random.normal(k2, (Cout, Cin, K, K)) * 2.0).astype(jnp.float32)
    conv_bias = 0.5 * jax.random.normal(k3, (Cout,), jnp.float32)
    gamma = 1.0 + 0.1 * jax.random.normal(k4, (Cout,), jnp.float32)
    beta = 0.5 * jax.random.normal(k5, (Cout,), jnp.float32)
    running_mean = 0.5 * jax.random.normal(k6, (Cout,), jnp.float32)
    running_var = jax.random.uniform(k7, (Cout,), jnp.float32, 0.5, 1.5)

    ok = True
    for act in ["relu", "relu6", "silu", "selu", "leakrelu", "tanh", None]:
        y = conv_bn_act(x, weight, conv_bias, gamma, beta,
                        running_mean, running_var, act_type=act)
        y = jax.block_until_ready(y)
        y_ref = _conv_bn_act_ref(x, weight, conv_bias, gamma, beta,
                                 running_mean, running_var, act)
        if y.shape != y_ref.shape or y.dtype != x.dtype:
            ok = False
        if not jnp.allclose(y, y_ref, atol=1e-3, rtol=1e-3):
            ok = False

    print("KERNEL_OK" if ok else "KERNEL_MISMATCH")
</pallas_src>

<mosaic_0001>
module attributes {stable_mosaic.version = 11 : i64} {
  func.func @_conv_bn_act_kernel(%arg0: i32, %arg1: i32, %arg2: memref<1x18x18x128xbf16, #tpu.memory_space<vmem>>, %arg3: memref<3x384x128xbf16, #tpu.memory_space<vmem>>, %arg4: memref<1x128xf32, #tpu.memory_space<vmem>>, %arg5: memref<1x128xf32, #tpu.memory_space<vmem>>, %arg6: memref<1x256x128xf32, #tpu.memory_space<vmem>>, %arg7: memref<256x384xbf16, #tpu.memory_space<vmem>>, %arg8: memref<256x128xf32, #tpu.memory_space<vmem>>) attributes {dimension_semantics = [#tpu.dimension_semantics<parallel>, #tpu.dimension_semantics<arbitrary>], iteration_bounds = array<i64: 2, 1>, scalar_prefetch = 0 : i64, scratch_operands = 2 : i64, tpu.core_type = #tpu.core_type<tc>, window_params = [{transform_indices = @transform_0, window_bounds = array<i64: 1, 18, 18, 128>}, {pipeline_mode = #tpu.pipeline_mode<synchronous>, transform_indices = @transform_1, window_bounds = array<i64: 3, 384, 128>}, {pipeline_mode = #tpu.pipeline_mode<synchronous>, transform_indices = @transform_2, window_bounds = array<i64: 1, 128>}, {pipeline_mode = #tpu.pipeline_mode<synchronous>, transform_indices = @transform_3, window_bounds = array<i64: 1, 128>}, {transform_indices = @transform_4, window_bounds = array<i64: 1, 256, 128>}]} {
    %c16_i32 = arith.constant 16 : i32
    %0 = arith.muli %arg1, %c16_i32 : i32
    %cst = arith.constant 0.000000e+00 : f32
    %1 = vector.broadcast %cst : f32 to vector<256x128xf32>
    %c0 = arith.constant 0 : index
    %c0_0 = arith.constant 0 : index
    %2 = vector.load %arg8[%c0, %c0_0] : memref<256x128xf32, #tpu.memory_space<vmem>>, vector<256x128xf32>
    tpu.vector_store %arg8[%c0, %c0_0], %1 {strides = array<i32>} : memref<256x128xf32, #tpu.memory_space<vmem>>, vector<256x128xf32>,
    %c0_i32 = arith.constant 0 : i32
    %3 = arith.addi %0, %c0_i32 : i32
    %c0_1 = arith.constant 0 : index
    %4 = arith.index_cast %3 : i32 to index
    %c0_2 = arith.constant 0 : index
    %c0_3 = arith.constant 0 : index
    %5 = vector.load %arg2[%c0_1, %4, %c0_2, %c0_3] : memref<1x18x18x128xbf16, #tpu.memory_space<vmem>>, vector<1x16x16x128xbf16>
    %6 = vector.shape_cast %5 : vector<1x16x16x128xbf16> to vector<16x16x128xbf16>
    %7 = vector.shape_cast %6 : vector<16x16x128xbf16> to vector<256x128xbf16>
    %c0_4 = arith.constant 0 : index
    %c0_5 = arith.constant 0 : index
    %8 = vector.load %arg7[%c0_4, %c0_5] : memref<256x384xbf16, #tpu.memory_space<vmem>>, vector<256x128xbf16>
    tpu.vector_store %arg7[%c0_4, %c0_5], %7 {strides = array<i32>} : memref<256x384xbf16, #tpu.memory_space<vmem>>, vector<256x128xbf16>,
    %c0_i32_6 = arith.constant 0 : i32
    %9 = arith.addi %0, %c0_i32_6 : i32
    %c0_7 = arith.constant 0 : index
    %10 = arith.index_cast %9 : i32 to index
    %c1 = arith.constant 1 : index
    %c0_8 = arith.constant 0 : index
    %11 = vector.load %arg2[%c0_7, %10, %c1, %c0_8] : memref<1x18x18x128xbf16, #tpu.memory_space<vmem>>, vector<1x16x16x128xbf16>
    %12 = vector.shape_cast %11 : vector<1x16x16x128xbf16> to vector<16x16x128xbf16>
    %13 = vector.shape_cast %12 : vector<16x16x128xbf16> to vector<256x128xbf16>
    %c0_9 = arith.constant 0 : index
    %c128 = arith.constant 128 : index
    %14 = vector.load %arg7[%c0_9, %c128] : memref<256x384xbf16, #tpu.memory_space<vmem>>, vector<256x128xbf16>
    tpu.vector_store %arg7[%c0_9, %c128], %13 {strides = array<i32>} : memref<256x384xbf16, #tpu.memory_space<vmem>>, vector<256x128xbf16>,
    %c0_i32_10 = arith.constant 0 : i32
    %15 = arith.addi %0, %c0_i32_10 : i32
    %c0_11 = arith.constant 0 : index
    %16 = arith.index_cast %15 : i32 to index
    %c2 = arith.constant 2 : index
    %c0_12 = arith.constant 0 : index
    %17 = vector.load %arg2[%c0_11, %16, %c2, %c0_12] : memref<1x18x18x128xbf16, #tpu.memory_space<vmem>>, vector<1x16x16x128xbf16>
    %18 = vector.shape_cast %17 : vector<1x16x16x128xbf16> to vector<16x16x128xbf16>
    %19 = vector.shape_cast %18 : vector<16x16x128xbf16> to vector<256x128xbf16>
    %c0_13 = arith.constant 0 : index
    %c256 = arith.constant 256 : index
    %20 = vector.load %arg7[%c0_13, %c256] : memref<256x384xbf16, #tpu.memory_space<vmem>>, vector<256x128xbf16>
    tpu.vector_store %arg7[%c0_13, %c256], %19 {strides = array<i32>} : memref<256x384xbf16, #tpu.memory_space<vmem>>, vector<256x128xbf16>,
    %c0_14 = arith.constant 0 : index
    %c0_15 = arith.constant 0 : index
    %21 = vector.load %arg8[%c0_14, %c0_15] : memref<256x128xf32, #tpu.memory_space<vmem>>, vector<256x128xf32>
    %c0_16 = arith.constant 0 : index
    %c0_17 = arith.constant 0 : index
    %22 = vector.load %arg7[%c0_16, %c0_17] : memref<256x384xbf16, #tpu.memory_space<vmem>>, vector<256x384xbf16>
    %c0_18 = arith.constant 0 : index
    %c0_19 = arith.constant 0 : index
    %c0_20 = arith.constant 0 : index
    %23 = vector.load %arg3[%c0_18, %c0_19, %c0_20] : memref<3x384x128xbf16, #tpu.memory_space<vmem>>, vector<1x384x128xbf16>
    %24 = vector.shape_cast %23 : vector<1x384x128xbf16> to vector<384x128xbf16>
    %cst_21 = arith.constant dense<0.000000e+00> : vector<256x128xf32>
    %25 = tpu.matmul %22, %24, %cst_21 {dimension_numbers = #tpu.dot_dimension_numbers<[1], [0], [0], [1], [0, 0, 1, 1], [], []>} : vector<256x384xbf16>, vector<384x128xbf16>, vector<256x128xf32> -> vector<256x128xf32>
    %26 = arith.addf %21, %25 : vector<256x128xf32>
    %c0_22 = arith.constant 0 : index
    %c0_23 = arith.constant 0 : index
    %27 = vector.load %arg8[%c0_22, %c0_23] : memref<256x128xf32, #tpu.memory_space<vmem>>, vector<256x128xf32>
    tpu.vector_store %arg8[%c0_22, %c0_23], %26 {strides = array<i32>} : memref<256x128xf32, #tpu.memory_space<vmem>>, vector<256x128xf32>,
    %c1_i32 = arith.constant 1 : i32
    %28 = arith.addi %0, %c1_i32 : i32
    %c0_24 = arith.constant 0 : index
    %29 = arith.index_cast %28 : i32 to index
    %c0_25 = arith.constant 0 : index
    %c0_26 = arith.constant 0 : index
    %30 = vector.load %arg2[%c0_24, %29, %c0_25, %c0_26] : memref<1x18x18x128xbf16, #tpu.memory_space<vmem>>, vector<1x16x16x128xbf16>
    %31 = vector.shape_cast %30 : vector<1x16x16x128xbf16> to vector<16x16x128xbf16>
    %32 = vector.shape_cast %31 : vector<16x16x128xbf16> to vector<256x128xbf16>
    %c0_27 = arith.constant 0 : index
    %c0_28 = arith.constant 0 : index
    %33 = vector.load %arg7[%c0_27, %c0_28] : memref<256x384xbf16, #tpu.memory_space<vmem>>, vector<256x128xbf16>
    tpu.vector_store %arg7[%c0_27, %c0_28], %32 {strides = array<i32>} : memref<256x384xbf16, #tpu.memory_space<vmem>>, vector<256x128xbf16>,
    %c1_i32_29 = arith.constant 1 : i32
    %34 = arith.addi %0, %c1_i32_29 : i32
    %c0_30 = arith.constant 0 : index
    %35 = arith.index_cast %34 : i32 to index
    %c1_31 = arith.constant 1 : index
    %c0_32 = arith.constant 0 : index
    %36 = vector.load %arg2[%c0_30, %35, %c1_31, %c0_32] : memref<1x18x18x128xbf16, #tpu.memory_space<vmem>>, vector<1x16x16x128xbf16>
    %37 = vector.shape_cast %36 : vector<1x16x16x128xbf16> to vector<16x16x128xbf16>
    %38 = vector.shape_cast %37 : vector<16x16x128xbf16> to vector<256x128xbf16>
    %c0_33 = arith.constant 0 : index
    %c128_34 = arith.constant 128 : index
    %39 = vector.load %arg7[%c0_33, %c128_34] : memref<256x384xbf16, #tpu.memory_space<vmem>>, vector<256x128xbf16>
    tpu.vector_store %arg7[%c0_33, %c128_34], %38 {strides = array<i32>} : memref<256x384xbf16, #tpu.memory_space<vmem>>, vector<256x128xbf16>,
    %c1_i32_35 = arith.constant 1 : i32
    %40 = arith.addi %0, %c1_i32_35 : i32
    %c0_36 = arith.constant 0 : index
    %41 = arith.index_cast %40 : i32 to index
    %c2_37 = arith.constant 2 : index
    %c0_38 = arith.constant 0 : index
    %42 = vector.load %arg2[%c0_36, %41, %c2_37, %c0_38] : memref<1x18x18x128xbf16, #tpu.memory_space<vmem>>, vector<1x16x16x128xbf16>
    %43 = vector.shape_cast %42 : vector<1x16x16x128xbf16> to vector<16x16x128xbf16>
    %44 = vector.shape_cast %43 : vector<16x16x128xbf16> to vector<256x128xbf16>
    %c0_39 = arith.constant 0 : index
    %c256_40 = arith.constant 256 : index
    %45 = vector.load %arg7[%c0_39, %c256_40] : memref<256x384xbf16, #tpu.memory_space<vmem>>, vector<256x128xbf16>
    tpu.vector_store %arg7[%c0_39, %c256_40], %44 {strides = array<i32>} : memref<256x384xbf16, #tpu.memory_space<vmem>>, vector<256x128xbf16>,
    %c0_41 = arith.constant 0 : index
    %c0_42 = arith.constant 0 : index
    %46 = vector.load %arg8[%c0_41, %c0_42] : memref<256x128xf32, #tpu.memory_space<vmem>>, vector<256x128xf32>
    %c0_43 = arith.constant 0 : index
    %c0_44 = arith.constant 0 : index
    %47 = vector.load %arg7[%c0_43, %c0_44] : memref<256x384xbf16, #tpu.memory_space<vmem>>, vector<256x384xbf16>
    %c1_45 = arith.constant 1 : index
    %c0_46 = arith.constant 0 : index
    %c0_47 = arith.constant 0 : index
    %48 = vector.load %arg3[%c1_45, %c0_46, %c0_47] : memref<3x384x128xbf16, #tpu.memory_space<vmem>>, vector<1x384x128xbf16>
    %49 = vector.shape_cast %48 : vector<1x384x128xbf16> to vector<384x128xbf16>
    %cst_48 = arith.constant dense<0.000000e+00> : vector<256x128xf32>
    %50 = tpu.matmul %47, %49, %cst_48 {dimension_numbers = #tpu.dot_dimension_numbers<[1], [0], [0], [1], [0, 0, 1, 1], [], []>} : vector<256x384xbf16>, vector<384x128xbf16>, vector<256x128xf32> -> vector<256x128xf32>
    %51 = arith.addf %46, %50 : vector<256x128xf32>
    %c0_49 = arith.constant 0 : index
    %c0_50 = arith.constant 0 : index
    %52 = vector.load %arg8[%c0_49, %c0_50] : memref<256x128xf32, #tpu.memory_space<vmem>>, vector<256x128xf32>
    tpu.vector_store %arg8[%c0_49, %c0_50], %51 {strides = array<i32>} : memref<256x128xf32, #tpu.memory_space<vmem>>, vector<256x128xf32>,
    %c2_i32 = arith.constant 2 : i32
    %53 = arith.addi %0, %c2_i32 : i32
    %c0_51 = arith.constant 0 : index
    %54 = arith.index_cast %53 : i32 to index
    %c0_52 = arith.constant 0 : index
    %c0_53 = arith.constant 0 : index
    %55 = vector.load %arg2[%c0_51, %54, %c0_52, %c0_53] : memref<1x18x18x128xbf16, #tpu.memory_space<vmem>>, vector<1x16x16x128xbf16>
    %56 = vector.shape_cast %55 : vector<1x16x16x128xbf16> to vector<16x16x128xbf16>
    %57 = vector.shape_cast %56 : vector<16x16x128xbf16> to vector<256x128xbf16>
    %c0_54 = arith.constant 0 : index
    %c0_55 = arith.constant 0 : index
    %58 = vector.load %arg7[%c0_54, %c0_55] : memref<256x384xbf16, #tpu.memory_space<vmem>>, vector<256x128xbf16>
    tpu.vector_store %arg7[%c0_54, %c0_55], %57 {strides = array<i32>} : memref<256x384xbf16, #tpu.memory_space<vmem>>, vector<256x128xbf16>,
    %c2_i32_56 = arith.constant 2 : i32
    %59 = arith.addi %0, %c2_i32_56 : i32
    %c0_57 = arith.constant 0 : index
    %60 = arith.index_cast %59 : i32 to index
    %c1_58 = arith.constant 1 : index
    %c0_59 = arith.constant 0 : index
    %61 = vector.load %arg2[%c0_57, %60, %c1_58, %c0_59] : memref<1x18x18x128xbf16, #tpu.memory_space<vmem>>, vector<1x16x16x128xbf16>
    %62 = vector.shape_cast %61 : vector<1x16x16x128xbf16> to vector<16x16x128xbf16>
    %63 = vector.shape_cast %62 : vector<16x16x128xbf16> to vector<256x128xbf16>
    %c0_60 = arith.constant 0 : index
    %c128_61 = arith.constant 128 : index
    %64 = vector.load %arg7[%c0_60, %c128_61] : memref<256x384xbf16, #tpu.memory_space<vmem>>, vector<256x128xbf16>
    tpu.vector_store %arg7[%c0_60, %c128_61], %63 {strides = array<i32>} : memref<256x384xbf16, #tpu.memory_space<vmem>>, vector<256x128xbf16>,
    %c2_i32_62 = arith.constant 2 : i32
    %65 = arith.addi %0, %c2_i32_62 : i32
    %c0_63 = arith.constant 0 : index
    %66 = arith.index_cast %65 : i32 to index
    %c2_64 = arith.constant 2 : index
    %c0_65 = arith.constant 0 : index
    %67 = vector.load %arg2[%c0_63, %66, %c2_64, %c0_65] : memref<1x18x18x128xbf16, #tpu.memory_space<vmem>>, vector<1x16x16x128xbf16>
    %68 = vector.shape_cast %67 : vector<1x16x16x128xbf16> to vector<16x16x128xbf16>
    %69 = vector.shape_cast %68 : vector<16x16x128xbf16> to vector<256x128xbf16>
    %c0_66 = arith.constant 0 : index
    %c256_67 = arith.constant 256 : index
    %70 = vector.load %arg7[%c0_66, %c256_67] : memref<256x384xbf16, #tpu.memory_space<vmem>>, vector<256x128xbf16>
    tpu.vector_store %arg7[%c0_66, %c256_67], %69 {strides = array<i32>} : memref<256x384xbf16, #tpu.memory_space<vmem>>, vector<256x128xbf16>,
    %c0_68 = arith.constant 0 : index
    %c0_69 = arith.constant 0 : index
    %71 = vector.load %arg8[%c0_68, %c0_69] : memref<256x128xf32, #tpu.memory_space<vmem>>, vector<256x128xf32>
    %c0_70 = arith.constant 0 : index
    %c0_71 = arith.constant 0 : index
    %72 = vector.load %arg7[%c0_70, %c0_71] : memref<256x384xbf16, #tpu.memory_space<vmem>>, vector<256x384xbf16>
    %c2_72 = arith.constant 2 : index
    %c0_73 = arith.constant 0 : index
    %c0_74 = arith.constant 0 : index
    %73 = vector.load %arg3[%c2_72, %c0_73, %c0_74] : memref<3x384x128xbf16, #tpu.memory_space<vmem>>, vector<1x384x128xbf16>
    %74 = vector.shape_cast %73 : vector<1x384x128xbf16> to vector<384x128xbf16>
    %cst_75 = arith.constant dense<0.000000e+00> : vector<256x128xf32>
    %75 = tpu.matmul %72, %74, %cst_75 {dimension_numbers = #tpu.dot_dimension_numbers<[1], [0], [0], [1], [0, 0, 1, 1], [], []>} : vector<256x384xbf16>, vector<384x128xbf16>, vector<256x128xf32> -> vector<256x128xf32>
    %76 = arith.addf %71, %75 : vector<256x128xf32>
    %c0_76 = arith.constant 0 : index
    %c0_77 = arith.constant 0 : index
    %77 = vector.load %arg8[%c0_76, %c0_77] : memref<256x128xf32, #tpu.memory_space<vmem>>, vector<256x128xf32>
    tpu.vector_store %arg8[%c0_76, %c0_77], %76 {strides = array<i32>} : memref<256x128xf32, #tpu.memory_space<vmem>>, vector<256x128xf32>,
    %c0_78 = arith.constant 0 : index
    %c0_79 = arith.constant 0 : index
    %78 = vector.load %arg8[%c0_78, %c0_79] : memref<256x128xf32, #tpu.memory_space<vmem>>, vector<256x128xf32>
    %c0_80 = arith.constant 0 : index
    %c0_81 = arith.constant 0 : index
    %79 = vector.load %arg4[%c0_80, %c0_81] : memref<1x128xf32, #tpu.memory_space<vmem>>, vector<1x128xf32>
    %80 = vector.broadcast %79 : vector<1x128xf32> to vector<256x128xf32>
    %81 = arith.mulf %78, %80 : vector<256x128xf32>
    %c0_82 = arith.constant 0 : index
    %c0_83 = arith.constant 0 : index
    %82 = vector.load %arg5[%c0_82, %c0_83] : memref<1x128xf32, #tpu.memory_space<vmem>>, vector<1x128xf32>
    %83 = vector.broadcast %82 : vector<1x128xf32> to vector<256x128xf32>
    %84 = arith.addf %81, %83 : vector<256x128xf32>
    %cst_84 = arith.constant 0.000000e+00 : f32
    %85 = vector.broadcast %cst_84 : f32 to vector<256x128xf32>
    %86 = arith.maximumf %84, %85 : vector<256x128xf32>
    %c0_85 = arith.constant 0 : index
    %c0_86 = arith.constant 0 : index
    %c0_87 = arith.constant 0 : index
    %87 = vector.load %arg6[%c0_85, %c0_86, %c0_87] : memref<1x256x128xf32, #tpu.memory_space<vmem>>, vector<1x256x128xf32>
    %88 = vector.shape_cast %87 : vector<1x256x128xf32> to vector<256x128xf32>
    %89 = vector.shape_cast %86 : vector<256x128xf32> to vector<1x256x128xf32>
    tpu.vector_store %arg6[%c0_85, %c0_86, %c0_87], %89 {strides = array<i32>} : memref<1x256x128xf32, #tpu.memory_space<vmem>>, vector<1x256x128xf32>,
    return
  }
  func.func @transform_0(%arg0: i32, %arg1: i32) -> (i32, i32, i32, i32) {
    %c0_i32 = arith.constant 0 : i32
    %c0_i32_0 = arith.constant 0 : i32
    %c0_i32_1 = arith.constant 0 : i32
    %c0_i32_2 = arith.constant 0 : i32
    return %arg0, %c0_i32, %c0_i32_0, %c0_i32_1 : i32, i32, i32, i32
  }
  func.func @transform_1(%arg0: i32, %arg1: i32) -> (i32, i32, i32) {
    %c0_i32 = arith.constant 0 : i32
    %c0_i32_0 = arith.constant 0 : i32
    %c0_i32_1 = arith.constant 0 : i32
    %c0_i32_2 = arith.constant 0 : i32
    return %c0_i32, %c0_i32_0, %c0_i32_1 : i32, i32, i32
  }
  func.func @transform_2(%arg0: i32, %arg1: i32) -> (i32, i32) {
    %c0_i32 = arith.constant 0 : i32
    %c0_i32_0 = arith.constant 0 : i32
    %c0_i32_1 = arith.constant 0 : i32
    return %c0_i32, %c0_i32_0 : i32, i32
  }
  func.func @transform_3(%arg0: i32, %arg1: i32) -> (i32, i32) {
    %c0_i32 = arith.constant 0 : i32
    %c0_i32_0 = arith.constant 0 : i32
    %c0_i32_1 = arith.constant 0 : i32
    return %c0_i32, %c0_i32_0 : i32, i32
  }
  func.func @transform_4(%arg0: i32, %arg1: i32) -> (i32, i32, i32) {
    %c0_i32 = arith.constant 0 : i32
    %c0_i32_0 = arith.constant 0 : i32
    return %arg0, %arg1, %c0_i32 : i32, i32, i32
  }
}

</mosaic_0001>

<bundles_post_ra>
// kernel: tpu_custom_call.1
= control target key start
LH: loop header
LB: loop body
LE: loop exit
PB: predicated region body
PF: predicated region fallthrough
CT: control target
= control target key end

     0   :  { %9 = vsyncpa [#allocation5], 0  ;;  %s8524_s0 = inlined_call_operand.vmem [shape: bf16[2,18,18,128], index: 0, kind: input, shape index: {}]   ;;  %s8525_s1 = inlined_call_operand.vmem [shape: bf16[3,384,128], index: 1, kind: input, shape index: {}]   ;;  %s8526_s2 = inlined_call_operand.vmem [shape: f32[1,128], index: 2, kind: input, shape index: {}]   ;;  %s8527_s3 = inlined_call_operand.vmem [shape: f32[1,128], index: 3, kind: input, shape index: {}]   ;;  %s8528_s4 = inlined_call_operand.hbm [shape: f32[2,256,128], index: 4, kind: output, shape index: {}]  }
   0x1   :  { %11 = vsyncpa [#allocation5 + $0x1], 0  ;;  %s6988_s15 = smov 0   ;;  %s6990_s16 = smov 0  }
   0x2   :  { %s6992_s17 = smov 0   ;;  %s6994_s18 = smov 0  }
   0x3   :  { %s6996_s19 = smov 0   ;;  %s6998_s20 = smov 0  }
   0x4 LB: > { %s5343_s21 = sadd.s32 4294967295, %s6958_s20   ;;  %s5344_s22 = sadd.s32 4294967294, %s6958_s20   ;;  %s6958_s20 = sphi %s6998_s20, %s17_s20   ;;  %s6954_s19 = sphi %s6996_s19, %s8545_s19   ;;  %s6950_s18 = sphi %s6994_s18, %s8544_s18   ;;  %s6946_s17 = sphi %s6992_s17, %s8543_s17   ;;  %s6942_s16 = sphi %s6990_s16, %s8542_s16   ;;  %s6938_s15 = sphi %s6988_s15, %s8541_s15  }
   0x5   : > { %s29_s23 = sadd.s32 1, %s6954_s19  ;;  %s127_s24 = sadd.s32 1, %s6946_s17 }
   0x6   : > { %p31_p0 = scmp.ge.s32.totalorder %s29_s23, 2  ;;  %p137_p1 = scmp.ne.s32.totalorder %s6946_s17, %s6942_s16 }
   0x7   : > { %p138_p2 = scmp.eq.s32.totalorder %s5343_s21, 1  ;;  %p143_p3 = scmp.ne.s32.totalorder %s6942_s16, %s6938_s15 }
   0x8   : > { %s8547_s23 = smov (%p31_p0, %s29_s23), 0  ;;  %p144_p5 = scmp.eq.s32.totalorder %s5344_s22, 1 }
   0x9   : > { %p7028_p4 = por %p138_p2, %p137_p1  ;;  %s122_s26 = ssub.s32 %s6954_s19, %s8547_s23 }
   0xa   : > { %p5347_p6 = scmp.ge.s32.totalorder %s6958_s20, 1  ;;  %p125_p7 = scmp.eq.s32.totalorder %s122_s26, 0 }
   0xb   : > { %p7035_p8 = por %p144_p5, %p143_p3  ;;  %p179_p9 = scmp.lt.s32.totalorder %s6958_s20, 3 }
   0xc   : > { %s7041_s28 = scalar_select %p125_p7, %s6946_s17, %s127_s24  }
   0xd   : > { %p180_p10 = pnand %p5347_p6, %p179_p9 }
   0xf   : > { %183 = sbr.rel (%p180_p10) target bundleno = 597 (0x255), region = 36 }
  0x16   : > { %v6760_v0 = vld [vmem:[%s8525_s1 + $0x40] sm:$0xff]   ;;  %v6763_v3 = vld [vmem:[%s8525_s1 + $0x48] sm:$0xff]   ;;  %v6766_v6 = vld [vmem:[%s8525_s1 + $0x50] sm:$0xff]   ;;  %p205_p11 = scmp.lt.s32.totalorder %s6950_s18, 1  ;;  %vm1003_vm0 = vcmask 1042432   ;;  %vm1004_vm1 = vcmask 1046532  }
  0x17   : > { %v7049_v1 = vld [vmem:[%s8525_s1 + $0x80] sm:$0xff]   ;;  %5974 = vmatprep.subr.bf16.mxu0 %v6760_v0  ;;  %v7062_v4 = vld [vmem:[%s8525_s1 + $0x88] sm:$0xff]   ;;  %v7074_v7 = vld [vmem:[%s8525_s1 + $0x90] sm:$0xff]   ;;  %vm440_vm2 = vsmask.f32 3328  ;;  %s5973_s5 = sshll.u32 %s6950_s18, 12 }
  0x18   : > { %v6762_v2 = vld [vmem:[%s8525_s1] sm:$0xff]   ;;  %6526 = vmatprep.subr.bf16.mxu1 %v7049_v1  ;;  %v6765_v5 = vld [vmem:[%s8525_s1 + $0x8] sm:$0xff]   ;;  %v6768_v8 = vld [vmem:[%s8525_s1 + $0x10] sm:$0xff]   ;;  %s206_s21 = scalar_select %p205_p11, %s6950_s18, 1  ;;  %vm441_vm3 = vsmask.f32 7440 }
  0x19   : > { %5975 = vmatpush3.bf16.msra.mxu0 %v6762_v2  ;;  %6534 = vmatpush3.bf16.msra.mxu1 %v7049_v1  ;;  %v6769_v9 = vld [vmem:[%s8525_s1 + $0x58] sm:$0xff]   ;;  %v6772_v12 = vld [vmem:[%s8525_s1 + $0x60] sm:$0xff]   ;;  %v6775_v15 = vld [vmem:[%s8525_s1 + $0x68] sm:$0xff]   ;;  %s8470_s9 = scalar_lea.hbm %s8528_s4, %s5973_s5  ;;  %s6960_s11 = smov [#allocation4]  }
  0x1a   : > { %5976 = vmatprep.subr.bf16.mxu0 %v6763_v3  ;;  %6527 = vmatprep.subr.bf16.mxu1 %v7062_v4  ;;  %v7088_v10 = vld [vmem:[%s8525_s1 + $0x98] sm:$0xff]   ;;  %v7101_v13 = vld [vmem:[%s8525_s1 + $0xa0] sm:$0xff]   ;;  %v7115_v16 = vld [vmem:[%s8525_s1 + $0xa8] sm:$0xff]   ;;  %s6702_s6 = smul.u32 216, %s206_s21  ;;  %s6884_s12 = sshll.u32 %s6960_s11, 4  ;;  %s6885_s12 = int_to_ptr.vmem [resolvable:$false] %s6884_s12 }
  0x1b   : > { %v6771_v11 = vld [vmem:[%s8525_s1 + $0x18] sm:$0xff]   ;;  %v6774_v14 = vld [vmem:[%s8525_s1 + $0x20] sm:$0xff]   ;;  %v6777_v17 = vld [vmem:[%s8525_s1 + $0x28] sm:$0xff]   ;;  %s6886_s13 = scalar_lea.vmem %s6885_s12, 8192 }
  0x1c   : > { %v6778_v18 = vld [vmem:[%s8525_s1 + $0x70] sm:$0xff]   ;;  %s7133_s21 = scalar_lea.vmem %s8524_s0, %s6702_s6  ;;  %v6781_v21 = vld [vmem:[%s8525_s1 + $0x78] sm:$0xff]   ;;  %vm7160_vm4 = vmor %vm1003_vm0, %vm1004_vm1 }
  0x1d   : > { %5977 = vmatpush3.bf16.msra.mxu0 %v6765_v5  ;;  %6535 = vmatpush3.bf16.msra.mxu1 %v7062_v4  ;;  %v7128_v19 = vld [vmem:[%s8525_s1 + $0xb0] sm:$0xff]   ;;  %v7144_v22 = vld [vmem:[%s8525_s1 + $0xb8] sm:$0xff]   ;;  %v392_v23 = vld [vmem:[%s7133_s21] sm:$0xf] }
  0x1e   : > { %5978 = vmatprep.subr.bf16.mxu0 %v6766_v6  ;;  %6528 = vmatprep.subr.bf16.mxu1 %v7074_v7  ;;  %v6780_v20 = vld [vmem:[%s8525_s1 + $0x30] sm:$0xff]   ;;  %v393_v24 = vld [vmem:[%s7133_s21 + $0x4] sm:$0xf]  ;;  %v394_v25 = vld [vmem:[%s7133_s21 + $0x8] sm:$0x1]  ;;  %v444_v26 = vshrl.u32 %v392_v23, 16 }
  0x1f   : > { %v447_v27 = vshll.u32 %v392_v23, 16  ;;  %v6783_v28 = vld [vmem:[%s8525_s1 + $0x38] sm:$0xff]   ;;  %v453_v29 = vshll.u32 %v393_v24, 16  ;;  %v457_v30 = vshrl.u32 %v393_v24, 16  ;;  %v463_v31 = vshll.u32 %v394_v25, 16  ;;  %vm7167_vm5 = vmor %vm440_vm2, %vm441_vm3  ;;  %v6785_v51 = vld [vmem:[%s8525_s1 + $0x100] sm:$0xff]  }
  0x20   : > { %v931_v32 = vld [vmem:[%s7133_s21 + $0x60] sm:$0xe]  ;;  %v446_v33 = vrot.slane %v444_v26, 4  ;;  %v932_v35 = vld [vmem:[%s7133_s21 + $0x64] sm:$0xf] }
  0x21   : > { %5979 = vmatpush3.bf16.msra.mxu0 %v6768_v8  ;;  %6536 = vmatpush3.bf16.msra.mxu1 %v7074_v7  ;;  %v449_v34 = vrot.slane %v447_v27, 5  ;;  %v933_v36 = vld [vmem:[%s7133_s21 + $0x68] sm:$0x1]  ;;  %v455_v37 = vrot.slane %v453_v29, 5  ;;  %v459_v38 = vrot.slane %v457_v30, 4  ;;  %v465_v39 = vrot.slane %v463_v31, 5 }
  0x22   : > { %5980 = vmatprep.subr.bf16.mxu0 %v6769_v9  ;;  %6529 = vmatprep.subr.bf16.mxu1 %v7088_v10  ;;  %v5390_v41 = vrot.slane %v931_v32, 9  ;;  %v1064_v44 = vrot.slane %v932_v35, 5  ;;  %v1067_v45 = vrot.slane %v933_v36, 5  ;;  %v934_v46 = vld [vmem:[%s7133_s21 + $0x6c] sm:$0xe]  ;;  %v6784_v60 = vld [vmem:[%s7133_s21] sm:$0xff]  }
  0x23   : > { %v450_v43 = vor.u32 %v449_v34, %v446_v33  ;;  %v460_v47 = vor.u32 %v459_v38, %v455_v37  ;;  %v935_v48 = vld [vmem:[%s7133_s21 + $0x70] sm:$0xf]  ;;  %v936_v49 = vld [vmem:[%s7133_s21 + $0x74] sm:$0x1]  ;;  %v5391_v50 = vrot.slane %v934_v46, 9  ;;  %v6786_v5 = vld [vmem:[%s8525_s1 + $0xc0] sm:$0xff]  }
  0x24   : > { %v1065_v53 = vsel %vm7160_vm4, %v5390_v41, %v1064_v44  ;;  %v1066_v54 = vrot.slane %v1064_v44, 4  ;;  %v1071_v55 = vrot.slane %v935_v48, 5  ;;  %v1074_v57 = vrot.slane %v936_v49, 5  ;;  %v395_v6 = vld [vmem:[%s7133_s21 + $0xc] sm:$0xf]  ;;  %v6790_v46 = vld [vmem:[%s8525_s1 + $0x110] sm:$0xff]  }
  0x25   : > { %5981 = vmatpush3.bf16.msra.mxu0 %v6771_v11  ;;  %6537 = vmatpush3.bf16.msra.mxu1 %v7088_v10  ;;  %v451_v52 = vrot.slane %v450_v43, 4  ;;  %v461_v56 = vrot.slane %v460_v47, 4  ;;  %v396_v8 = vld [vmem:[%s7133_s21 + $0x10] sm:$0xf]  ;;  %v6787_v11 = vld [vmem:[%s8525_s1 + $0x108] sm:$0xff]  }
  0x26   : > { %5982 = vmatprep.subr.bf16.mxu0 %v6772_v12  ;;  %6530 = vmatprep.subr.bf16.mxu1 %v7101_v13  ;;  %v1068_v59 = vsel %vm7160_vm4, %v1066_v54, %v1067_v45  ;;  %v1072_v61 = vsel %vm7160_vm4, %v5391_v50, %v1071_v55  ;;  %v1073_v62 = vrot.slane %v1071_v55, 4  ;;  %v397_v12 = vld [vmem:[%s7133_s21 + $0x14] sm:$0x1]  ;;  %v937_v23 = vld [vmem:[%s7133_s21 + $0x78] sm:$0xe] }
  0x27   : > { %v456_v58 = vsel %vm7167_vm5, %v451_v52, %v455_v37  ;;  %v466_v63 = vsel %vm7167_vm5, %v461_v56, %v465_v39  ;;  %v5406_v0 = vcombine.low %v1065_v53, %v1068_v59  ;;  %v938_v24 = vld [vmem:[%s7133_s21 + $0x7c] sm:$0xf]  ;;  %v5392_v29 = vrot.slane %v937_v23, 9  ;;  %v940_v35 = vld [vmem:[%s7133_s21 + $0x84] sm:$0xe]  ;;  %v6791_v49 = vld [vmem:[%s8525_s1 + $0xd0] sm:$0xff]  }
  0x28   : > { %v5366_v2 = vcombine.low %v456_v58, %v466_v63  ;;  %v1075_v3 = vsel %vm7160_vm4, %v1073_v62, %v1074_v57  ;;  %v1078_v32 = vrot.slane %v938_v24, 5  ;;  %v941_v36 = vld [vmem:[%s7133_s21 + $0x88] sm:$0xf]  ;;  %v942_v41 = vld [vmem:[%s7133_s21 + $0x8c] sm:$0x1]  ;;  %v5393_v43 = vrot.slane %v940_v35, 9 }
  0x29   : > { %5983 = vmatpush3.bf16.msra.mxu0 %v6774_v14  ;;  %6538 = vmatpush3.bf16.msra.mxu1 %v7101_v13  ;;  %v5407_v9 = vcombine.low %v1072_v61, %v1075_v3  ;;  %v468_v14 = vshrl.u32 %v395_v6, 16  ;;  %v1088_v45 = vrot.slane %v942_v41, 5  ;;  %v6792_v54 = vld [vmem:[%s8525_s1 + $0x118] sm:$0xff]   ;;  %v943_v3 = vld [vmem:[%s7133_s21 + $0x90] sm:$0xe] }
  0x2a   : > { %5984 = vmatprep.subr.bf16.mxu0 %v6775_v15  ;;  %6531 = vmatprep.subr.bf16.mxu1 %v7115_v16  ;;  %v471_v15 = vshll.u32 %v395_v6, 16  ;;  %v1079_v38 = vsel %vm7160_vm4, %v5392_v29, %v1078_v32  ;;  %v1080_v39 = vrot.slane %v1078_v32, 4  ;;  %v398_v58 = vld [vmem:[%s7133_s21 + $0x18] sm:$0xf]  ;;  %v399_v59 = vld [vmem:[%s7133_s21 + $0x1c] sm:$0xf] }
  0x2b   : > { %6414 = vmatprep.mubr.bf16.mxu1 %v5406_v0  ;;  %1502 = vmatprep.mubr.bf16.mxu0 %v5366_v2  ;;  %v470_v25 = vrot.slane %v468_v14, 4  ;;  %v6793_v62 = vld [vmem:[%s8525_s1 + $0xd8] sm:$0xff]   ;;  %v492_v63 = vshrl.u32 %v398_v58, 16  ;;  %v495_v0 = vshll.u32 %v398_v58, 16  ;;  %v501_v2 = vshll.u32 %v399_v59, 16 }
  0x2c   : > { %v473_v26 = vrot.slane %v471_v15, 5  ;;  %v5394_v15 = vrot.slane %v943_v3, 9  ;;  %v946_v23 = vld [vmem:[%s7133_s21 + $0x9c] sm:$0xe]  ;;  %v947_v24 = vld [vmem:[%s7133_s21 + $0xa0] sm:$0xf] }
  0x2d   : > { %5985 = vmatpush3.bf16.msra.mxu0 %v6777_v17  ;;  %6539 = vmatpush3.bf16.msra.mxu1 %v7115_v16  ;;  %v477_v17 = vshll.u32 %v396_v8, 16  ;;  %v503_v14 = vrot.slane %v501_v2, 5  ;;  %v5395_v29 = vrot.slane %v946_v23, 9  ;;  %v6794_v35 = vld [vmem:[%s7133_s21 + $0x18] sm:$0xff]   ;;  %v951_v58 = vld [vmem:[%s7133_s21 + $0xb0] sm:$0x1] }
  0x2e   : > { %5986 = vmatprep.subr.bf16.mxu0 %v6778_v18  ;;  %6532 = vmatprep.subr.bf16.mxu1 %v7128_v19  ;;  %v6788_v18 = vld [vmem:[%s8525_s1 + $0xc8] sm:$0xff]   ;;  %v474_v34 = vor.u32 %v473_v26, %v470_v25  ;;  %v948_v25 = vld [vmem:[%s7133_s21 + $0xa4] sm:$0x1]  ;;  %v1109_v2 = vrot.slane %v951_v58, 5  ;;  %v952_v3 = vld [vmem:[%s7133_s21 + $0xb4] sm:$0xe] }
  0x2f   : > { %v479_v27 = vrot.slane %v477_v17, 5  ;;  %v1102_v32 = vrot.slane %v948_v25, 5 }
  0x30   : > { %v475_v44 = vrot.slane %v474_v34, 4 }
  0x31   : > { %5987 = vmatpush3.bf16.msra.mxu0 %v6780_v20  ;;  %6540 = vmatpush3.bf16.msra.mxu1 %v7128_v19  ;;  %v481_v20 = vshrl.u32 %v396_v8, 16  ;;  %v944_v8 = vld [vmem:[%s7133_s21 + $0x94] sm:$0xf] }
  0x32   : > { %5988 = vmatprep.subr.bf16.mxu0 %v6781_v21  ;;  %6533 = vmatprep.subr.bf16.mxu1 %v7144_v22  ;;  %v487_v21 = vshll.u32 %v397_v12, 16  ;;  %v480_v50 = vsel %vm7167_vm5, %v475_v44, %v479_v27  ;;  %v497_v12 = vrot.slane %v495_v0, 5 }
  0x33   : > { %v483_v30 = vrot.slane %v481_v20, 4  ;;  %v1092_v20 = vrot.slane %v944_v8, 5  ;;  %v954_v8 = vld [vmem:[%s7133_s21 + $0xbc] sm:$0x1] }
  0x34   : > { %v489_v31 = vrot.slane %v487_v21, 5 }
  0x35   : > { %5989 = vmatpush3.bf16.msra.mxu0 %v6783_v28  ;;  %6541 = vmatpush3.bf16.msra.mxu1 %v7144_v22  ;;  %v939_v28 = vld [vmem:[%s7133_s21 + $0x80] sm:$0x1]  ;;  %v484_v37 = vor.u32 %v483_v30, %v479_v27  ;;  %v1093_v27 = vsel %vm7160_vm4, %v5394_v15, %v1092_v20 }
  0x36   : > { %6382 = vmatprep.subr.bf16.mxu0 %v7049_v1  ;;  %6110 = vmatprep.subr.bf16.mxu1 %v6785_v51  ;;  %v1081_v33 = vrot.slane %v939_v28, 5  ;;  %v1094_v28 = vrot.slane %v1092_v20, 4  ;;  %v6799_v20 = vld [vmem:[%s7133_s21 + $0x24] sm:$0xff]  }
  0x37   : > { %v485_v47 = vrot.slane %v484_v37, 4 }
  0x38   : > { %1503 = vmatmul.mubr.bf16.vlgmr.msra.gmra.mrb[0].mxu0 %v6784_v60  ;;  %6415 = vmatmul.mubr.bf16.vlgmr.msra.gmra.mrb[0].mxu1 %v5407_v9  ;;  %v1082_v48 = vsel %vm7160_vm4, %v1080_v39, %v1081_v33  ;;  %v400_v60 = vld [vmem:[%s7133_s21 + $0x20] sm:$0x1]  ;;  %v945_v9 = vld [vmem:[%s7133_s21 + $0x98] sm:$0x1] }
  0x39   : > { %6383 = vmatpush3.bf16.msra.mxu0 %v7049_v1  ;;  %6111 = vmatpush3.bf16.msra.mxu1 %v6786_v5  ;;  %v1085_v1 = vrot.slane %v941_v36, 5  ;;  %v5408_v51 = vcombine.low %v1079_v38, %v1082_v48  ;;  %v490_v55 = vsel %vm7167_vm5, %v485_v47, %v489_v31  ;;  %v505_v5 = vshrl.u32 %v399_v59, 16  ;;  %v6795_v33 = vld [vmem:[%s8525_s1 + $0x120] sm:$0xff]   ;;  %v403_v48 = vld [vmem:[%s7133_s21 + $0x2c] sm:$0x1] }
  0x3a   : > { %6112 = vmatprep.subr.bf16.mxu1 %v6787_v11  ;;  %6384 = vmatprep.subr.bf16.mxu0 %v7062_v4  ;;  %v5367_v56 = vcombine.low %v480_v50, %v490_v55  ;;  %v511_v6 = vshll.u32 %v400_v60, 16  ;;  %v494_v11 = vrot.slane %v492_v63, 4  ;;  %v1095_v21 = vrot.slane %v945_v9, 5  ;;  %v6796_v36 = vld [vmem:[%s8525_s1 + $0xe0] sm:$0xff]   ;;  %v949_v55 = vld [vmem:[%s7133_s21 + $0xa8] sm:$0xe] }
  0x3b   : > { %v1086_v52 = vsel %vm7160_vm4, %v5393_v43, %v1085_v1  ;;  %v1087_v53 = vrot.slane %v1085_v1, 4  ;;  %6418 = vmatprep.mubr.bf16.mxu1 %v5408_v51  ;;  %v507_v17 = vrot.slane %v505_v5, 4  ;;  %v1099_v31 = vrot.slane %v947_v24, 5  ;;  %v6797_v43 = vld [vmem:[%s8525_s1 + $0x128] sm:$0xff]  }
  0x3c   : > { %1510 = vmatprep.mubr.bf16.mxu0 %v5367_v56  ;;  %v6798_v1 = vld [vmem:[%s8525_s1 + $0xe8] sm:$0xff]   ;;  %v5397_v9 = vrot.slane %v952_v3, 9 }
  0x3d   : > { %6113 = vmatpush3.bf16.msra.mxu1 %v6788_v18  ;;  %6385 = vmatpush3.bf16.msra.mxu0 %v7062_v4  ;;  %v6789_v4 = vld [vmem:[%s7133_s21 + $0xc] sm:$0xff]   ;;  %v1089_v57 = vsel %vm7160_vm4, %v1087_v53, %v1088_v45  ;;  %v513_v18 = vrot.slane %v511_v6, 5  ;;  %v508_v26 = vor.u32 %v507_v17, %v503_v14  ;;  %v1100_v39 = vsel %vm7160_vm4, %v5395_v29, %v1099_v31  ;;  %v401_v45 = vld [vmem:[%s7133_s21 + $0x24] sm:$0xf]  ;;  %v953_v6 = vld [vmem:[%s7133_s21 + $0xb8] sm:$0xf] }
  0x3e   : > { %6114 = vmatprep.subr.bf16.mxu1 %v6790_v46  ;;  %6386 = vmatprep.subr.bf16.mxu0 %v7074_v7  ;;  %v5409_v61 = vcombine.low %v1086_v52, %v1089_v57  ;;  %v1101_v41 = vrot.slane %v1099_v31, 4  ;;  %v519_v50 = vshll.u32 %v401_v45, 16  ;;  %v950_v57 = vld [vmem:[%s7133_s21 + $0xac] sm:$0xf]  ;;  %v1113_v15 = vrot.slane %v953_v6, 5  ;;  %v6801_v17 = vld [vmem:[%s8525_s1 + $0xf0] sm:$0xff]  }
  0x3f   : > { %v509_v34 = vrot.slane %v508_v26, 4  ;;  %v1106_v0 = vrot.slane %v950_v57, 5  ;;  %v404_v31 = vld [vmem:[%s7133_s21 + $0x30] sm:$0xf]  ;;  %v6806_v57 = vld [vmem:[%s8525_s1 + $0x140] sm:$0xff]  }
  0x40   : > { %1511 = vmatmul.mubr.bf16.gmra.mrb[4].mxu0 %v6789_v4  ;;  %6419 = vmatmul.mubr.bf16.gmra.mrb[4].mxu1 %v5409_v61  ;;  %v1103_v47 = vsel %vm7160_vm4, %v1101_v41, %v1102_v32  ;;  %v521_v56 = vrot.slane %v519_v50, 5  ;;  %v1114_v24 = vsel %vm7160_vm4, %v5397_v9, %v1113_v15  ;;  %v1115_v25 = vrot.slane %v1113_v15, 4  ;;  %v405_v32 = vld [vmem:[%s7133_s21 + $0x34] sm:$0xf]  ;;  %v5487_v41 = vld [vmem:[%s7133_s21 + $0x10] sm:$0xf] }
  0x41   : > { %6115 = vmatpush3.bf16.msra.mxu1 %v6791_v49  ;;  %6387 = vmatpush3.bf16.msra.mxu0 %v7074_v7  ;;  %v498_v7 = vor.u32 %v497_v12, %v494_v11  ;;  %v514_v44 = vsel %vm7167_vm5, %v509_v34, %v513_v18  ;;  %v516_v49 = vshrl.u32 %v401_v45, 16  ;;  %v5411_v51 = vcombine.low %v1100_v39, %v1103_v47  ;;  %v406_v34 = vld [vmem:[%s7133_s21 + $0x38] sm:$0x1]  ;;  %v5486_v39 = vld [vmem:[%s7133_s21 + $0xc] sm:$0xf]  ;;  %v6804_v9 = vld [vmem:[%s7133_s21 + $0x30] sm:$0xff]  }
  0x42   : > { %6116 = vmatprep.subr.bf16.mxu1 %v6792_v54  ;;  %6388 = vmatprep.subr.bf16.mxu0 %v7088_v10  ;;  %v535_v54 = vshll.u32 %v403_v48, 16  ;;  %v5488_v45 = vld [vmem:[%s7133_s21 + $0x14] sm:$0x1]  ;;  %v2062_v48 = vshll.u32 %v5487_v41, 16 }
  0x43   : > { %v499_v30 = vrot.slane %v498_v7, 4  ;;  %v518_v4 = vrot.slane %v516_v49, 4 }
  0x44   : > { %v537_v61 = vrot.slane %v535_v54, 5 }
  0x45   : > { %6117 = vmatpush3.bf16.msra.mxu1 %v6793_v62  ;;  %6389 = vmatpush3.bf16.msra.mxu0 %v7088_v10  ;;  %v1096_v10 = vsel %vm7160_vm4, %v1094_v28, %v1095_v21  ;;  %v504_v37 = vsel %vm7167_vm5, %v499_v30, %v503_v14  ;;  %v5396_v62 = vrot.slane %v949_v55, 9  ;;  %v522_v63 = vor.u32 %v521_v56, %v518_v4  ;;  %v6803_v30 = vld [vmem:[%s8525_s1 + $0xf8] sm:$0xff]  }
  0x46   : > { %6390 = vmatprep.subr.bf16.mxu0 %v7101_v13  ;;  %v5410_v38 = vcombine.low %v1093_v27, %v1096_v10  ;;  %6118 = vmatprep.subr.bf16.mxu1 %v6795_v33  ;;  %v5368_v46 = vcombine.low %v504_v37, %v514_v44  ;;  %v1108_v14 = vrot.slane %v1106_v0, 4  ;;  %v1116_v21 = vrot.slane %v954_v8, 5 }
  0x47   : > { %v523_v11 = vrot.slane %v522_v63, 4  ;;  %v1107_v12 = vsel %vm7160_vm4, %v5396_v62, %v1106_v0  ;;  %v540_v10 = vshrl.u32 %v404_v31, 16  ;;  %v553_v37 = vshrl.u32 %v405_v32, 16  ;;  %v408_v0 = vld [vmem:[%s7133_s21 + $0x40] sm:$0xf] }
  0x48   : > { %6422 = vmatprep.mubr.bf16.mxu1 %v5410_v38  ;;  %1518 = vmatprep.mubr.bf16.mxu0 %v5368_v46  ;;  %v1110_v23 = vsel %vm7160_vm4, %v1108_v14, %v1109_v2  ;;  %v1117_v29 = vsel %vm7160_vm4, %v1115_v25, %v1116_v21  ;;  %v559_v38 = vshll.u32 %v406_v34, 16  ;;  %v2064_v55 = vrot.slane %v2062_v48, 5  ;;  %v409_v2 = vld [vmem:[%s7133_s21 + $0x44] sm:$0x1] }
  0x49   : > { %6391 = vmatpush3.bf16.msra.mxu0 %v7101_v13  ;;  %6119 = vmatpush3.bf16.msra.mxu1 %v6796_v36  ;;  %v402_v13 = vld [vmem:[%s7133_s21 + $0x28] sm:$0xf]  ;;  %v5412_v27 = vcombine.low %v1107_v12, %v1110_v23  ;;  %v5413_v33 = vcombine.low %v1114_v24, %v1117_v29  ;;  %v549_v36 = vshll.u32 %v405_v32, 16  ;;  %v555_v46 = vrot.slane %v553_v37, 4  ;;  %v5489_v12 = vld [vmem:[%s7133_s21 + $0x18] sm:$0xf] }
  0x4a   : > { %6392 = vmatprep.subr.bf16.mxu0 %v7115_v16  ;;  %6120 = vmatprep.subr.bf16.mxu1 %v6797_v43  ;;  %v525_v52 = vshll.u32 %v402_v13, 16  ;;  %v529_v53 = vshrl.u32 %v402_v13, 16  ;;  %v542_v43 = vrot.slane %v540_v10, 4  ;;  %v561_v47 = vrot.slane %v559_v38, 5  ;;  %v410_v37 = vld [vmem:[%s7133_s21 + $0x48] sm:$0xf] }
  0x4b   : > { %1519 = vmatmul.mubr.bf16.gmra.mrb[8].mxu0 %v6794_v35  ;;  %6423 = vmatmul.mubr.bf16.gmra.mrb[8].mxu1 %v5411_v51  ;;  %v543_v35 = vshll.u32 %v404_v31, 16  ;;  %v2056_v13 = vshll.u32 %v5486_v39, 16  ;;  %v2066_v51 = vshrl.u32 %v5487_v41, 16  ;;  %v583_v25 = vshll.u32 %v409_v2, 16  ;;  %v5492_v48 = vld [vmem:[%s7133_s21 + $0x24] sm:$0xf] }
  0x4c   : > { %v527_v59 = vrot.slane %v525_v52, 5  ;;  %v531_v60 = vrot.slane %v529_v53, 4  ;;  %6426 = vmatprep.mubr.bf16.mxu1 %v5412_v27  ;;  %v2072_v52 = vshll.u32 %v5488_v45, 16  ;;  %v2080_v29 = vshll.u32 %v5489_v12, 16 }
  0x4d   : > { %6393 = vmatpush3.bf16.msra.mxu0 %v7115_v16  ;;  %6121 = vmatpush3.bf16.msra.mxu1 %v6798_v1  ;;  %v6800_v16 = vld [vmem:[%s8525_s1 + $0x130] sm:$0xff]   ;;  %v545_v44 = vrot.slane %v543_v35, 5  ;;  %v551_v1 = vrot.slane %v549_v36, 5  ;;  %v2058_v54 = vrot.slane %v2056_v13, 5  ;;  %v2068_v56 = vrot.slane %v2066_v51, 4 }
  0x4e   : > { %6394 = vmatprep.subr.bf16.mxu0 %v7128_v19  ;;  %v532_v5 = vor.u32 %v531_v60, %v527_v59  ;;  %6122 = vmatprep.subr.bf16.mxu1 %v6800_v16  ;;  %v528_v7 = vsel %vm7167_vm5, %v523_v11, %v527_v59  ;;  %v2074_v60 = vrot.slane %v2072_v52, 5  ;;  %v573_v16 = vshll.u32 %v408_v0, 16 }
  0x4f   : > { %v546_v49 = vor.u32 %v545_v44, %v542_v43  ;;  %v556_v53 = vor.u32 %v555_v46, %v551_v1  ;;  %v2069_v63 = vor.u32 %v2068_v56, %v2064_v55  ;;  %v577_v11 = vshrl.u32 %v408_v0, 16  ;;  %v6807_v43 = vld [vmem:[%s7133_s21 + $0x3c] sm:$0xff]   ;;  %v411_v44 = vld [vmem:[%s7133_s21 + $0x4c] sm:$0xf] }
  0x50   : > { %v533_v18 = vrot.slane %v532_v5, 4  ;;  %v575_v23 = vrot.slane %v573_v16, 5  ;;  %v585_v32 = vrot.slane %v583_v25, 5  ;;  %v2082_v35 = vrot.slane %v2080_v29, 5 }
  0x51   : > { %6395 = vmatpush3.bf16.msra.mxu0 %v7128_v19  ;;  %6123 = vmatpush3.bf16.msra.mxu1 %v6801_v17  ;;  %v6802_v19 = vld [vmem:[%s8525_s1 + $0x138] sm:$0xff]   ;;  %v547_v4 = vrot.slane %v546_v49, 4  ;;  %v557_v58 = vrot.slane %v556_v53, 4  ;;  %v2070_v15 = vrot.slane %v2069_v63, 4  ;;  %v579_v24 = vrot.slane %v577_v11, 4 }
  0x52   : > { %6396 = vmatprep.subr.bf16.mxu0 %v7144_v22  ;;  %v538_v26 = vsel %vm7167_vm5, %v533_v18, %v537_v61  ;;  %6124 = vmatprep.subr.bf16.mxu1 %v6802_v19  ;;  %v407_v61 = vld [vmem:[%s7133_s21 + $0x3c] sm:$0xf]  ;;  %v5491_v19 = vld [vmem:[%s7133_s21 + $0x20] sm:$0x1]  ;;  %v591_v13 = vshll.u32 %v410_v37, 16  ;;  %v597_v52 = vshll.u32 %v411_v44, 16 }
  0x53   : > { %v5369_v28 = vcombine.low %v528_v7, %v538_v26  ;;  %6427 = vmatmul.mubr.bf16.gmra.mrb[12].mxu1 %v5413_v33  ;;  %v552_v62 = vsel %vm7167_vm5, %v547_v4, %v551_v1  ;;  %v564_v3 = vshrl.u32 %v407_v61, 16  ;;  %v567_v5 = vshll.u32 %v407_v61, 16  ;;  %v6805_v7 = vld [vmem:[%s7133_s21 + $0xc] sm:$0xff]   ;;  %v5493_v53 = vld [vmem:[%s7133_s21 + $0x28] sm:$0xf]  ;;  %v6808_v11 = vld [vmem:[%s7133_s21 + $0x18] sm:$0xff]  }
  0x54   : > { %v562_v6 = vsel %vm7167_vm5, %v557_v58, %v561_v47  ;;  %v2075_v26 = vsel %vm7167_vm5, %v2070_v15, %v2074_v60  ;;  %v580_v31 = vor.u32 %v579_v24, %v575_v23  ;;  %v2096_v41 = vshll.u32 %v5491_v19, 16  ;;  %v412_v47 = vld [vmem:[%s7133_s21 + $0x50] sm:$0x1] }
  0x55   : > { %6397 = vmatpush3.bf16.msra.mxu0 %v7144_v22  ;;  %1526 = vmatprep.mubr.bf16.mxu0 %v5369_v28  ;;  %v2053_v22 = vshrl.u32 %v5486_v39, 16  ;;  %v5370_v14 = vcombine.low %v552_v62, %v562_v6  ;;  %v566_v17 = vrot.slane %v564_v3, 4  ;;  %v569_v18 = vrot.slane %v567_v5, 5 }
  0x56   : > { %6125 = vmatpush3.bf16.msra.mxu1 %v6803_v30  ;;  %1527 = vmatmul.mubr.bf16.gmra.mrb[12].mxu0 %v6799_v20  ;;  %v5490_v20 = vld [vmem:[%s7133_s21 + $0x1c] sm:$0xf]  ;;  %v2077_v28 = vshrl.u32 %v5489_v12, 16  ;;  %v581_v38 = vrot.slane %v580_v31, 4  ;;  %v588_v1 = vshrl.u32 %v410_v37, 16  ;;  %v593_v58 = vrot.slane %v591_v13, 5 }
  0x57   : > { %v2055_v50 = vrot.slane %v2053_v22, 4  ;;  %6430 = vmatprep.subr.bf16.mxu1 %v6806_v57  ;;  %1534 = vmatprep.mubr.bf16.mxu0 %v5370_v14  ;;  %v570_v27 = vor.u32 %v569_v18, %v566_v17  ;;  %v2086_v33 = vshll.u32 %v5490_v20, 16  ;;  %v2090_v36 = vshrl.u32 %v5490_v20, 16 }
  0x58   : > { %v2079_v10 = vrot.slane %v2077_v28, 4  ;;  %v586_v49 = vsel %vm7167_vm5, %v581_v38, %v585_v32  ;;  %v590_v51 = vrot.slane %v588_v1, 4  ;;  %v599_v60 = vrot.slane %v597_v52, 5  ;;  %v5495_v32 = vld [vmem:[%s7133_s21 + $0x30] sm:$0xf]  ;;  %v6809_v38 = vld [vmem:[%s7133_s21 + $0x48] sm:$0xff]  }
  0x59   : > { %v2059_v59 = vor.u32 %v2058_v54, %v2055_v50  ;;  %v571_v34 = vrot.slane %v570_v27, 4  ;;  %v2088_v39 = vrot.slane %v2086_v33, 5  ;;  %v2092_v46 = vrot.slane %v2090_v36, 4  ;;  %v6811_v54 = vld [vmem:[%s8525_s1 + $0x148] sm:$0xff]   ;;  %v5496_v36 = vld [vmem:[%s7133_s21 + $0x34] sm:$0xf] }
  0x5a   : > { %v2083_v22 = vor.u32 %v2082_v35, %v2079_v10  ;;  %v2098_v50 = vrot.slane %v2096_v41, 5  ;;  %v601_v61 = vshrl.u32 %v411_v44, 16  ;;  %v2101_v62 = vshrl.u32 %v5492_v48, 16  ;;  %v5497_v44 = vld [vmem:[%s7133_s21 + $0x38] sm:$0x1] }
  0x5b   : > { %v2060_v8 = vrot.slane %v2059_v59, 4  ;;  %v576_v45 = vsel %vm7167_vm5, %v571_v34, %v575_v23  ;;  %v2093_v56 = vor.u32 %v2092_v46, %v2088_v39  ;;  %v5494_v59 = vld [vmem:[%s7133_s21 + $0x2c] sm:$0x1]  ;;  %v594_v2 = vor.u32 %v593_v58, %v590_v51  ;;  %v414_v23 = vld [vmem:[%s7133_s21 + $0x58] sm:$0xf]  ;;  %v6810_v51 = vld [vmem:[%s7133_s21 + $0x24] sm:$0xff]  }
  0x5c   : > { %v2084_v4 = vrot.slane %v2083_v22, 4  ;;  %v2104_v3 = vshll.u32 %v5492_v48, 16  ;;  %v603_v5 = vrot.slane %v601_v61, 4  ;;  %v2114_v15 = vshrl.u32 %v5493_v53, 16  ;;  %v6816_v61 = vld [vmem:[%s8525_s1 + $0x150] sm:$0xff]  }
  0x5d   : > { %v2065_v21 = vsel %vm7167_vm5, %v2060_v8, %v2064_v55  ;;  %v5371_v55 = vcombine.low %v576_v45, %v586_v49  ;;  %v2094_v0 = vrot.slane %v2093_v56, 4  ;;  %v2103_v8 = vrot.slane %v2101_v62, 4 }
  0x5e   : > { %v5534_v30 = vcombine.low %v2065_v21, %v2075_v26  ;;  %1535 = vmatmul.mubr.bf16.gmra.mrb[16].mxu0 %v6804_v9  ;;  %v2089_v63 = vsel %vm7167_vm5, %v2084_v4, %v2088_v39  ;;  %v2110_v9 = vshll.u32 %v5493_v53, 16  ;;  %v595_v12 = vrot.slane %v594_v2, 4  ;;  %v415_v26 = vld [vmem:[%s7133_s21 + $0x5c] sm:$0x1]  ;;  %v418_v2 = vld [vmem:[%s7133_s21 + $0x68] sm:$0x1] }
  0x5f   : > { %1542 = vmatprep.mubr.bf16.mxu0 %v5371_v55  ;;  %v2099_v16 = vsel %vm7167_vm5, %v2094_v0, %v2098_v50  ;;  %v2106_v14 = vrot.slane %v2104_v3, 5  ;;  %v604_v18 = vor.u32 %v603_v5, %v599_v60  ;;  %v2120_v21 = vshll.u32 %v5494_v59, 16  ;;  %v416_v55 = vld [vmem:[%s7133_s21 + $0x60] sm:$0xf] }
  0x60   : > { %3109 = vmatprep.mubr.bf16.mxu1 %v5534_v30  ;;  %v5535_v17 = vcombine.low %v2089_v63, %v2099_v16  ;;  %v2112_v20 = vrot.slane %v2110_v9, 5  ;;  %v600_v24 = vsel %vm7167_vm5, %v595_v12, %v599_v60  ;;  %v2116_v19 = vrot.slane %v2114_v15, 4  ;;  %v417_v60 = vld [vmem:[%s7133_s21 + $0x64] sm:$0xf]  ;;  %v5498_v9 = vld [vmem:[%s7133_s21 + $0x3c] sm:$0xf] }
  0x61   : > { %3110 = vmatmul.mubr.bf16.vlgmr.msra.gmra.mrb[16].mxu1 %v6805_v7  ;;  %v413_v7 = vld [vmem:[%s7133_s21 + $0x54] sm:$0xf]  ;;  %v2107_v25 = vor.u32 %v2106_v14, %v2103_v8  ;;  %v605_v28 = vrot.slane %v604_v18, 4  ;;  %v2122_v29 = vrot.slane %v2120_v21, 5  ;;  %v621_v31 = vshll.u32 %v414_v23, 16 }
  0x62   : > { %6431 = vmatpush3.bf16.msra.mxu1 %v6806_v57  ;;  %v607_v57 = vshll.u32 %v412_v47, 16  ;;  %v612_v27 = vshrl.u32 %v413_v7, 16  ;;  %3117 = vmatprep.mubr.bf16.mxu1 %v5535_v17  ;;  %v615_v30 = vshll.u32 %v413_v7, 16  ;;  %v2117_v34 = vor.u32 %v2116_v19, %v2112_v20  ;;  %v5499_v16 = vld [vmem:[%s7133_s21 + $0x40] sm:$0xf] }
  0x63   : > { %6432 = vmatprep.subr.bf16.mxu1 %v6811_v54  ;;  %v2108_v33 = vrot.slane %v2107_v25, 4  ;;  %v625_v35 = vshrl.u32 %v414_v23, 16  ;;  %v623_v41 = vrot.slane %v621_v31, 5  ;;  %v2125_v48 = vshrl.u32 %v5495_v32, 16  ;;  %v5500_v23 = vld [vmem:[%s7133_s21 + $0x44] sm:$0x1] }
  0x64   : > { %v609_v6 = vrot.slane %v607_v57, 5  ;;  %v614_v10 = vrot.slane %v612_v27, 4  ;;  %v617_v39 = vrot.slane %v615_v30, 5  ;;  %v2118_v22 = vrot.slane %v2117_v34, 4 }
  0x65   : > { %v2113_v45 = vsel %vm7167_vm5, %v2108_v33, %v2112_v20  ;;  %v627_v46 = vrot.slane %v625_v35, 4  ;;  %v2128_v49 = vshll.u32 %v5495_v32, 16  ;;  %v2134_v53 = vshll.u32 %v5496_v36, 16  ;;  %v6812_v20 = vld [vmem:[%s7133_s21 + $0x54] sm:$0xff]   ;;  %v419_v35 = vld [vmem:[%s7133_s21 + $0x6c] sm:$0xf] }
  0x66   : > { %1543 = vmatmul.mubr.bf16.gmra.mrb[20].mxu0 %v6807_v43  ;;  %6433 = vmatpush3.bf16.msra.mxu1 %v6811_v54  ;;  %v610_v37 = vsel %vm7167_vm5, %v605_v28, %v609_v6  ;;  %v631_v43 = vshll.u32 %v415_v26, 16  ;;  %v618_v47 = vor.u32 %v617_v39, %v614_v10  ;;  %v2123_v50 = vsel %vm7167_vm5, %v2118_v22, %v2122_v29  ;;  %v6813_v32 = vld [vmem:[%s7133_s21 + $0x30] sm:$0xff]  }
  0x67   : > { %v5372_v1 = vcombine.low %v600_v24, %v610_v37  ;;  %v628_v52 = vor.u32 %v627_v46, %v623_v41  ;;  %v2138_v54 = vshrl.u32 %v5496_v36, 16  ;;  %v5536_v4 = vcombine.low %v2113_v45, %v2123_v50  ;;  %6434 = vmatprep.subr.bf16.mxu1 %v6816_v61 }
  0x68   : > { %v633_v13 = vrot.slane %v631_v43, 5  ;;  %v619_v56 = vrot.slane %v618_v47, 4  ;;  %v2127_v58 = vrot.slane %v2125_v48, 4  ;;  %v2130_v59 = vrot.slane %v2128_v49, 5  ;;  %v421_v47 = vld [vmem:[%s7133_s21 + $0x74] sm:$0x1] }
  0x69   : > { %3118 = vmatmul.mubr.bf16.gmra.mrb[20].mxu1 %v6808_v11  ;;  %1550 = vmatprep.mubr.bf16.mxu0 %v5372_v1  ;;  %v629_v57 = vrot.slane %v628_v52, 4  ;;  %v2136_v62 = vrot.slane %v2134_v53, 5  ;;  %v2140_v63 = vrot.slane %v2138_v54, 4  ;;  %v2144_v0 = vshll.u32 %v5497_v44, 16  ;;  %v5501_v49 = vld [vmem:[%s7133_s21 + $0x48] sm:$0xf] }
  0x6a   : > { %3125 = vmatprep.mubr.bf16.mxu1 %v5536_v4  ;;  %v624_v3 = vsel %vm7167_vm5, %v619_v56, %v623_v41  ;;  %v2131_v5 = vor.u32 %v2130_v59, %v2127_v58  ;;  %v636_v6 = vshrl.u32 %v416_v55, 16  ;;  %v639_v8 = vshll.u32 %v416_v55, 16  ;;  %6435 = vmatpush3.bf16.msra.mxu1 %v6816_v61  ;;  %v420_v41 = vld [vmem:[%s7133_s21 + $0x70] sm:$0xf]  ;;  %v6814_v53 = vld [vmem:[%s7133_s21 + $0x60] sm:$0xff]  }
  0x6b   : > { %v634_v11 = vsel %vm7167_vm5, %v629_v57, %v633_v13  ;;  %v2141_v12 = vor.u32 %v2140_v63, %v2136_v62  ;;  %v2146_v14 = vrot.slane %v2144_v0, 5  ;;  %v645_v15 = vshll.u32 %v417_v60, 16  ;;  %v5502_v55 = vld [vmem:[%s7133_s21 + $0x4c] sm:$0xf] }
  0x6c   : > { %v5373_v17 = vcombine.low %v624_v3, %v634_v11  ;;  %v2132_v18 = vrot.slane %v2131_v5, 4  ;;  %v638_v21 = vrot.slane %v636_v6, 4  ;;  %v641_v7 = vrot.slane %v639_v8, 5  ;;  %v5503_v5 = vld [vmem:[%s7133_s21 + $0x50] sm:$0x1]  ;;  %v6821_v6 = vld [vmem:[%s8525_s1 + $0x158] sm:$0xff]  }
  0x6d   : > { %v2142_v24 = vrot.slane %v2141_v12, 4  ;;  %v647_v25 = vrot.slane %v645_v15, 5  ;;  %v649_v19 = vshrl.u32 %v417_v60, 16  ;;  %v655_v26 = vshll.u32 %v418_v2, 16  ;;  %6436 = vmatprep.subr.bf16.mxu1 %v6821_v6 }
  0x6e   : > { %1551 = vmatmul.mubr.bf16.gmra.mrb[24].mxu0 %v6809_v38  ;;  %v2137_v27 = vsel %vm7167_vm5, %v2132_v18, %v2136_v62  ;;  %v642_v28 = vor.u32 %v641_v7, %v638_v21  ;;  %v2149_v29 = vshrl.u32 %v5498_v9, 16  ;;  %v2152_v30 = vshll.u32 %v5498_v9, 16  ;;  %v422_v18 = vld [vmem:[%s7133_s21 + $0x78] sm:$0xf]  ;;  %v6815_v21 = vld [vmem:[%s7133_s21 + $0x3c] sm:$0xff]   ;;  %6437 = vmatpush3.bf16.msra.mxu1 %v6821_v6 }
  0x6f   : > { %1558 = vmatprep.mubr.bf16.mxu0 %v5373_v17  ;;  %v2147_v31 = vsel %vm7167_vm5, %v2142_v24, %v2146_v14  ;;  %v651_v33 = vrot.slane %v649_v19, 4  ;;  %v657_v34 = vrot.slane %v655_v26, 5  ;;  %v2158_v10 = vshll.u32 %v5499_v16, 16 }
  0x70   : > { %v5537_v36 = vcombine.low %v2137_v27, %v2147_v31  ;;  %v643_v37 = vrot.slane %v642_v28, 4  ;;  %v2151_v38 = vrot.slane %v2149_v29, 4  ;;  %v2154_v39 = vrot.slane %v2152_v30, 5  ;;  %v424_v29 = vld [vmem:[%s7133_s21 + $0x80] sm:$0x1] }
  0x71   : > { %3126 = vmatmul.mubr.bf16.gmra.mrb[24].mxu1 %v6810_v51  ;;  %v652_v43 = vor.u32 %v651_v33, %v647_v25  ;;  %v2160_v44 = vrot.slane %v2158_v10, 5  ;;  %v2162_v1 = vshrl.u32 %v5499_v16, 16  ;;  %v2168_v45 = vshll.u32 %v5500_v23, 16  ;;  %v5504_v30 = vld [vmem:[%s7133_s21 + $0x54] sm:$0xf] }
  0x72   : > { %3133 = vmatprep.mubr.bf16.mxu1 %v5537_v36  ;;  %v648_v22 = vsel %vm7167_vm5, %v643_v37, %v647_v25  ;;  %v2155_v46 = vor.u32 %v2154_v39, %v2151_v38  ;;  %v660_v13 = vshrl.u32 %v419_v35, 16  ;;  %v663_v48 = vshll.u32 %v419_v35, 16  ;;  %v423_v25 = vld [vmem:[%s7133_s21 + $0x7c] sm:$0xf]  ;;  %v5505_v10 = vld [vmem:[%s7133_s21 + $0x58] sm:$0xf] }
  0x73   : > { %v653_v50 = vrot.slane %v652_v43, 4  ;;  %v2164_v51 = vrot.slane %v2162_v1, 4  ;;  %v2170_v52 = vrot.slane %v2168_v45, 5  ;;  %v669_v54 = vshll.u32 %v420_v41, 16  ;;  %v6817_v36 = vld [vmem:[%s7133_s21 + $0x6c] sm:$0xff]  }
  0x74   : > { %v2156_v4 = vrot.slane %v2155_v46, 4  ;;  %v662_v56 = vrot.slane %v660_v13, 4  ;;  %v665_v58 = vrot.slane %v663_v48, 5  ;;  %v673_v59 = vshrl.u32 %v420_v41, 16 }
  0x75   : > { %v658_v60 = vsel %vm7167_vm5, %v653_v50, %v657_v34  ;;  %v2165_v61 = vor.u32 %v2164_v51, %v2160_v44  ;;  %v671_v57 = vrot.slane %v669_v54, 5  ;;  %v679_v62 = vshll.u32 %v421_v47, 16  ;;  %v6826_v51 = vld [vmem:[%s8525_s1 + $0x160] sm:$0xff]  }
  0x76   : > { %1559 = vmatmul.mubr.bf16.gmra.mrb[28].mxu0 %v6812_v20  ;;  %v5374_v63 = vcombine.low %v648_v22, %v658_v60  ;;  %v2161_v0 = vsel %vm7167_vm5, %v2156_v4, %v2160_v44  ;;  %v666_v2 = vor.u32 %v665_v58, %v662_v56  ;;  %v675_v3 = vrot.slane %v673_v59, 4  ;;  %v425_v56 = vld [vmem:[%s7133_s21 + $0x84] sm:$0xf]  ;;  %v6818_v59 = vld [vmem:[%s7133_s21 + $0x48] sm:$0xff]   ;;  %6438 = vmatprep.subr.bf16.mxu1 %v6826_v51 }
  0x77   : > { %v2166_v8 = vrot.slane %v2165_v61, 4  ;;  %v681_v9 = vrot.slane %v679_v62, 5  ;;  %v2173_v16 = vshrl.u32 %v5501_v49, 16  ;;  %v2176_v11 = vshll.u32 %v5501_v49, 16  ;;  %v426_v62 = vld [vmem:[%s7133_s21 + $0x88] sm:$0xf]  ;;  %6439 = vmatpush3.bf16.msra.mxu1 %v6826_v51 }
  0x78   : > { %1566 = vmatprep.mubr.bf16.mxu0 %v5374_v63  ;;  %v667_v12 = vrot.slane %v666_v2, 4  ;;  %v676_v14 = vor.u32 %v675_v3, %v671_v57  ;;  %v2182_v15 = vshll.u32 %v5502_v55, 16  ;;  %v2186_v17 = vshrl.u32 %v5502_v55, 16  ;;  %v5506_v55 = vld [vmem:[%s7133_s21 + $0x5c] sm:$0x1] }
  0x79   : > { %3134 = vmatmul.mubr.bf16.gmra.mrb[28].mxu1 %v6813_v32  ;;  %v2171_v20 = vsel %vm7167_vm5, %v2166_v8, %v2170_v52  ;;  %v2175_v7 = vrot.slane %v2173_v16, 4  ;;  %v2178_v23 = vrot.slane %v2176_v11, 5  ;;  %v2192_v24 = vshll.u32 %v5503_v5, 16  ;;  %v427_v5 = vld [vmem:[%s7133_s21 + $0x8c] sm:$0x1]  ;;  %v6819_v16 = vld [vmem:[%s7133_s21 + $0x78] sm:$0xff]  }
  0x7a   : > { %v5538_v19 = vcombine.low %v2161_v0, %v2171_v20  ;;  %v672_v26 = vsel %vm7167_vm5, %v667_v12, %v671_v57  ;;  %v677_v27 = vrot.slane %v676_v14, 4  ;;  %v2184_v28 = vrot.slane %v2182_v15, 5  ;;  %v5507_v12 = vld [vmem:[%s7133_s21 + $0x60] sm:$0xf]  ;;  %v5508_v20 = vld [vmem:[%s7133_s21 + $0x64] sm:$0xf] }
  0x7b   : > { %v2179_v31 = vor.u32 %v2178_v23, %v2175_v7  ;;  %v2188_v32 = vrot.slane %v2186_v17, 4  ;;  %v2194_v33 = vrot.slane %v2192_v24, 5  ;;  %v684_v34 = vshrl.u32 %v422_v18, 16 }
  0x7c   : > { %3141 = vmatprep.mubr.bf16.mxu1 %v5538_v19  ;;  %v682_v35 = vsel %vm7167_vm5, %v677_v27, %v681_v9  ;;  %v687_v37 = vshll.u32 %v422_v18, 16  ;;  %v693_v38 = vshll.u32 %v423_v25, 16  ;;  %v697_v39 = vshrl.u32 %v423_v25, 16 }
  0x7d   : > { %v5375_v41 = vcombine.low %v672_v26, %v682_v35  ;;  %v2180_v43 = vrot.slane %v2179_v31, 4  ;;  %v2189_v44 = vor.u32 %v2188_v32, %v2184_v28  ;;  %v686_v1 = vrot.slane %v684_v34, 4  ;;  %v5509_v31 = vld [vmem:[%s7133_s21 + $0x68] sm:$0x1] }
  0x7e   : > { %1567 = vmatmul.mubr.bf16.gmra.mrb[32].mxu0 %v6814_v53  ;;  %v689_v45 = vrot.slane %v687_v37, 5  ;;  %v695_v22 = vrot.slane %v693_v38, 5  ;;  %v699_v46 = vrot.slane %v697_v39, 4  ;;  %v703_v47 = vshll.u32 %v424_v29, 16  ;;  %v6831_v37 = vld [vmem:[%s8525_s1 + $0x168] sm:$0xff]   ;;  %v6820_v39 = vld [vmem:[%s7133_s21 + $0x54] sm:$0xff]  }
  0x7f   : > { %1574 = vmatprep.mubr.bf16.mxu0 %v5375_v41  ;;  %v2185_v13 = vsel %vm7167_vm5, %v2180_v43, %v2184_v28  ;;  %v2190_v48 = vrot.slane %v2189_v44, 4  ;;  %v2197_v49 = vshrl.u32 %v5504_v30, 16  ;;  %v2200_v50 = vshll.u32 %v5504_v30, 16  ;;  %6440 = vmatprep.subr.bf16.mxu1 %v6831_v37 }
  0x80   : > { %v690_v52 = vor.u32 %v689_v45, %v686_v1  ;;  %v700_v53 = vor.u32 %v699_v46, %v695_v22  ;;  %v705_v54 = vrot.slane %v703_v47, 5  ;;  %v2206_v4 = vshll.u32 %v5505_v10, 16  ;;  %v429_v47 = vld [vmem:[%s7133_s21 + $0x94] sm:$0xf]  ;;  %6441 = vmatpush3.bf16.msra.mxu1 %v6831_v37  ;;  %v5514_v37 = vld [vmem:[%s7133_s21 + $0x7c] sm:$0xf] }
  0x81   : > { %3142 = vmatmul.mubr.bf16.gmra.mrb[32].mxu1 %v6815_v21  ;;  %v2195_v58 = vsel %vm7167_vm5, %v2190_v48, %v2194_v33  ;;  %v2199_v60 = vrot.slane %v2197_v49, 4  ;;  %v2202_v61 = vrot.slane %v2200_v50, 5  ;;  %v2210_v57 = vshrl.u32 %v5505_v10, 16 }
  0x82   : > { %v5539_v63 = vcombine.low %v2185_v13, %v2195_v58  ;;  %v691_v0 = vrot.slane %v690_v52, 4  ;;  %v701_v2 = vrot.slane %v700_v53, 4  ;;  %v2208_v3 = vrot.slane %v2206_v4, 5  ;;  %v430_v13 = vld [vmem:[%s7133_s21 + $0x98] sm:$0x1] }
  0x83   : > { %v2203_v6 = vor.u32 %v2202_v61, %v2199_v60  ;;  %v2212_v8 = vrot.slane %v2210_v57, 4  ;;  %v2216_v9 = vshll.u32 %v5506_v55, 16  ;;  %v708_v11 = vshrl.u32 %v425_v56, 16  ;;  %v5510_v52 = vld [vmem:[%s7133_s21 + $0x6c] sm:$0xf] }
  0x84   : > { %3149 = vmatprep.mubr.bf16.mxu1 %v5539_v63  ;;  %v696_v14 = vsel %vm7167_vm5, %v691_v0, %v695_v22  ;;  %v706_v15 = vsel %vm7167_vm5, %v701_v2, %v705_v54  ;;  %v711_v17 = vshll.u32 %v425_v56, 16  ;;  %v717_v18 = vshll.u32 %v426_v62, 16  ;;  %v5511_v56 = vld [vmem:[%s7133_s21 + $0x70] sm:$0xf]  ;;  %v6822_v63 = vld [vmem:[%s7133_s21 + $0x84] sm:$0xff]  }
  0x85   : > { %v5376_v21 = vcombine.low %v696_v14, %v706_v15  ;;  %v2204_v7 = vrot.slane %v2203_v6, 4  ;;  %v2213_v23 = vor.u32 %v2212_v8, %v2208_v3  ;;  %v2218_v24 = vrot.slane %v2216_v9, 5  ;;  %v6835_v9 = vld [vmem:[%s8525_s1 + $0x1c0] sm:$0xff]   ;;  %v5512_v14 = vld [vmem:[%s7133_s21 + $0x74] sm:$0x1] }
  0x86   : > { %1575 = vmatmul.mubr.bf16.gmra.mrb[36].mxu0 %v6817_v36  ;;  %v710_v25 = vrot.slane %v708_v11, 4  ;;  %v713_v19 = vrot.slane %v711_v17, 5  ;;  %v719_v26 = vrot.slane %v717_v18, 5  ;;  %v721_v27 = vshrl.u32 %v426_v62, 16  ;;  %v428_v36 = vld [vmem:[%s7133_s21 + $0x90] sm:$0xf]  ;;  %6246 = vmatprep.subr.bf16.mxu0 %v6835_v9 }
  0x87   : > { %1582 = vmatprep.mubr.bf16.mxu0 %v5376_v21  ;;  %v2209_v28 = vsel %vm7167_vm5, %v2204_v7, %v2208_v3  ;;  %v2214_v29 = vrot.slane %v2213_v23, 4  ;;  %v727_v30 = vshll.u32 %v427_v5, 16  ;;  %v2221_v32 = vshrl.u32 %v5507_v12, 16  ;;  %v6823_v18 = vld [vmem:[%s7133_s21 + $0x60] sm:$0xff]   ;;  %v431_v23 = vld [vmem:[%s7133_s21 + $0x9c] sm:$0xf] }
  0x88   : > { %v714_v33 = vor.u32 %v713_v19, %v710_v25  ;;  %v723_v34 = vrot.slane %v721_v27, 4  ;;  %v2224_v10 = vshll.u32 %v5507_v12, 16  ;;  %v2230_v35 = vshll.u32 %v5508_v20, 16  ;;  %v432_v27 = vld [vmem:[%s7133_s21 + $0xa0] sm:$0xf] }
  0x89   : > { %3150 = vmatmul.mubr.bf16.gmra.mrb[36].mxu1 %v6818_v59  ;;  %v2219_v38 = vsel %vm7167_vm5, %v2214_v29, %v2218_v24  ;;  %v729_v41 = vrot.slane %v727_v30, 5  ;;  %v2223_v43 = vrot.slane %v2221_v32, 4  ;;  %v2234_v44 = vshrl.u32 %v5508_v20, 16  ;;  %v433_v32 = vld [vmem:[%s7133_s21 + $0xa4] sm:$0x1] }
  0x8a   : > { %v5540_v1 = vcombine.low %v2209_v28, %v2219_v38  ;;  %v715_v45 = vrot.slane %v714_v33, 4  ;;  %v724_v22 = vor.u32 %v723_v34, %v719_v26  ;;  %v2226_v46 = vrot.slane %v2224_v10, 5  ;;  %v5513_v33 = vld [vmem:[%s7133_s21 + $0x78] sm:$0xf]  ;;  %v6837_v38 = vld [vmem:[%s8525_s1 + $0x170] sm:$0xff]  }
  0x8b   : > { %v2232_v48 = vrot.slane %v2230_v35, 5  ;;  %v2236_v49 = vrot.slane %v2234_v44, 4  ;;  %v2240_v50 = vshll.u32 %v5509_v31, 16  ;;  %v732_v51 = vshrl.u32 %v428_v36, 16  ;;  %6442 = vmatprep.subr.bf16.mxu1 %v6837_v38 }
  0x8c   : > { %3157 = vmatprep.mubr.bf16.mxu1 %v5540_v1  ;;  %v720_v53 = vsel %vm7167_vm5, %v715_v45, %v719_v26  ;;  %v725_v54 = vrot.slane %v724_v22, 4  ;;  %v2227_v55 = vor.u32 %v2226_v46, %v2223_v43  ;;  %v735_v4 = vshll.u32 %v428_v36, 16  ;;  %v6824_v45 = vld [vmem:[%s7133_s21 + $0x90] sm:$0xff]   ;;  %6443 = vmatpush3.bf16.msra.mxu1 %v6837_v38 }
  0x8d   : > { %v2237_v58 = vor.u32 %v2236_v49, %v2232_v48  ;;  %v2242_v59 = vrot.slane %v2240_v50, 5  ;;  %v734_v60 = vrot.slane %v732_v51, 4  ;;  %v741_v61 = vshll.u32 %v429_v47, 16 }
  0x8e   : > { %1583 = vmatmul.mubr.bf16.gmra.mrb[40].mxu0 %v6819_v16  ;;  %v730_v57 = vsel %vm7167_vm5, %v725_v54, %v729_v41  ;;  %v2228_v62 = vrot.slane %v2227_v55, 4  ;;  %v737_v0 = vrot.slane %v735_v4, 5  ;;  %v745_v2 = vshrl.u32 %v429_v47, 16 }
  0x8f   : > { %v5377_v3 = vcombine.low %v720_v53, %v730_v57  ;;  %v2238_v5 = vrot.slane %v2237_v58, 4  ;;  %v743_v6 = vrot.slane %v741_v61, 5  ;;  %v751_v8 = vshll.u32 %v430_v13, 16 }
  0x90   : > { %v2233_v16 = vsel %vm7167_vm5, %v2228_v62, %v2232_v48  ;;  %v738_v11 = vor.u32 %v737_v0, %v734_v60  ;;  %v747_v12 = vrot.slane %v745_v2, 4  ;;  %v2245_v15 = vshrl.u32 %v5510_v52, 16  ;;  %v6825_v2 = vld [vmem:[%s7133_s21 + $0x6c] sm:$0xff]  }
  0x91   : > { %3158 = vmatmul.mubr.bf16.gmra.mrb[40].mxu1 %v6820_v39  ;;  %1590 = vmatprep.mubr.bf16.mxu0 %v5377_v3  ;;  %v2243_v17 = vsel %vm7167_vm5, %v2238_v5, %v2242_v59  ;;  %v753_v20 = vrot.slane %v751_v8, 5  ;;  %v2248_v21 = vshll.u32 %v5510_v52, 16  ;;  %v2254_v7 = vshll.u32 %v5511_v56, 16  ;;  %v435_v8 = vld [vmem:[%s7133_s21 + $0xac] sm:$0xf] }
  0x92   : > { %v5541_v24 = vcombine.low %v2233_v16, %v2243_v17  ;;  %v739_v25 = vrot.slane %v738_v11, 4  ;;  %v748_v19 = vor.u32 %v747_v12, %v743_v6  ;;  %v2247_v26 = vrot.slane %v2245_v15, 4  ;;  %v5516_v15 = vld [vmem:[%s7133_s21 + $0x84] sm:$0xf] }
  0x93   : > { %v2250_v28 = vrot.slane %v2248_v21, 5  ;;  %v2256_v29 = vrot.slane %v2254_v7, 5  ;;  %v2258_v30 = vshrl.u32 %v5511_v56, 16  ;;  %v2264_v31 = vshll.u32 %v5512_v14, 16  ;;  %v5515_v56 = vld [vmem:[%s7133_s21 + $0x80] sm:$0x1] }
  0x94   : > { %3165 = vmatprep.mubr.bf16.mxu1 %v5541_v24  ;;  %v744_v34 = vsel %vm7167_vm5, %v739_v25, %v743_v6  ;;  %v749_v10 = vrot.slane %v748_v19, 4  ;;  %v756_v35 = vshrl.u32 %v431_v23, 16  ;;  %v759_v36 = vshll.u32 %v431_v23, 16  ;;  %v436_v14 = vld [vmem:[%s7133_s21 + $0xb0] sm:$0x1]  ;;  %v6827_v25 = vld [vmem:[%s7133_s21 + $0x9c] sm:$0xff]  }
  0x95   : > { %v2251_v39 = vor.u32 %v2250_v28, %v2247_v26  ;;  %v2260_v41 = vrot.slane %v2258_v30, 4  ;;  %v2266_v43 = vrot.slane %v2264_v31, 5  ;;  %v765_v44 = vshll.u32 %v432_v27, 16  ;;  %v5517_v7 = vld [vmem:[%s7133_s21 + $0x88] sm:$0xf] }
  0x96   : > { %1591 = vmatmul.mubr.bf16.gmra.mrb[44].mxu0 %v6822_v63  ;;  %v754_v1 = vsel %vm7167_vm5, %v749_v10, %v753_v20  ;;  %v758_v22 = vrot.slane %v756_v35, 4  ;;  %v761_v46 = vrot.slane %v759_v36, 5  ;;  %v769_v47 = vshrl.u32 %v432_v27, 16  ;;  %v434_v63 = vld [vmem:[%s7133_s21 + $0xa8] sm:$0xf] }
  0x97   : > { %v5378_v13 = vcombine.low %v744_v34, %v754_v1  ;;  %v2252_v48 = vrot.slane %v2251_v39, 4  ;;  %v2261_v49 = vor.u32 %v2260_v41, %v2256_v29  ;;  %v767_v50 = vrot.slane %v765_v44, 5  ;;  %v437_v1 = vld [vmem:[%s7133_s21 + $0xb4] sm:$0xf] }
  0x98   : > { %v762_v51 = vor.u32 %v761_v46, %v758_v22  ;;  %v771_v52 = vrot.slane %v769_v47, 4  ;;  %v775_v53 = vshll.u32 %v433_v32, 16  ;;  %v2269_v54 = vshrl.u32 %v5513_v33, 16  ;;  %v6828_v22 = vld [vmem:[%s7133_s21 + $0x78] sm:$0xff]  }
  0x99   : > { %3166 = vmatmul.mubr.bf16.gmra.mrb[44].mxu1 %v6823_v18  ;;  %1598 = vmatprep.mubr.bf16.mxu0 %v5378_v13  ;;  %v2257_v55 = vsel %vm7167_vm5, %v2252_v48, %v2256_v29  ;;  %v2262_v4 = vrot.slane %v2261_v49, 4  ;;  %v2272_v58 = vshll.u32 %v5513_v33, 16  ;;  %v2278_v59 = vshll.u32 %v5514_v37, 16  ;;  %v438_v48 = vld [vmem:[%s7133_s21 + $0xb8] sm:$0xf] }
  0x9a   : > { %v763_v60 = vrot.slane %v762_v51, 4  ;;  %v772_v61 = vor.u32 %v771_v52, %v767_v50  ;;  %v777_v57 = vrot.slane %v775_v53, 5  ;;  %v2271_v62 = vrot.slane %v2269_v54, 4  ;;  %v439_v53 = vld [vmem:[%s7133_s21 + $0xbc] sm:$0x1] }
  0x9b   : > { %v2267_v0 = vsel %vm7167_vm5, %v2262_v4, %v2266_v43  ;;  %v2274_v3 = vrot.slane %v2272_v58, 5  ;;  %v2280_v5 = vrot.slane %v2278_v59, 5  ;;  %v2282_v6 = vshrl.u32 %v5514_v37, 16  ;;  %v5518_v43 = vld [vmem:[%s7133_s21 + $0x8c] sm:$0x1]  ;;  %v6848_v54 = vld [vmem:[%s8525_s1 + $0x178] sm:$0xff]  }
  0x9c   : > { %v5542_v9 = vcombine.low %v2257_v55, %v2267_v0  ;;  %v768_v16 = vsel %vm7167_vm5, %v763_v60, %v767_v50  ;;  %v773_v11 = vrot.slane %v772_v61, 4  ;;  %v2288_v12 = vshll.u32 %v5515_v56, 16  ;;  %v6829_v58 = vld [vmem:[%s7133_s21 + $0xa8] sm:$0xff]   ;;  %v5519_v60 = vld [vmem:[%s7133_s21 + $0x90] sm:$0xf]  ;;  %6444 = vmatprep.subr.bf16.mxu1 %v6848_v54 }
  0x9d   : > { %v2275_v17 = vor.u32 %v2274_v3, %v2271_v62  ;;  %v2284_v18 = vrot.slane %v2282_v6, 4  ;;  %v780_v20 = vshrl.u32 %v434_v63, 16  ;;  %v783_v21 = vshll.u32 %v434_v63, 16  ;;  %v5520_v0 = vld [vmem:[%s7133_s21 + $0x94] sm:$0xf]  ;;  %6445 = vmatpush3.bf16.msra.mxu1 %v6848_v54 }
  0x9e   : > { %1599 = vmatmul.mubr.bf16.gmra.mrb[48].mxu0 %v6824_v45  ;;  %3173 = vmatprep.mubr.bf16.mxu1 %v5542_v9  ;;  %v778_v23 = vsel %vm7167_vm5, %v773_v11, %v777_v57  ;;  %v2290_v24 = vrot.slane %v2288_v12, 5  ;;  %v789_v19 = vshll.u32 %v435_v8, 16  ;;  %v793_v26 = vshrl.u32 %v435_v8, 16  ;;  %v911_v54 = vld [vmem:[%s7133_s21 + $0x10] sm:$0xf] }
  0x9f   : > { %v5379_v27 = vcombine.low %v768_v16, %v778_v23  ;;  %v2276_v28 = vrot.slane %v2275_v17, 4  ;;  %v2285_v29 = vor.u32 %v2284_v18, %v2280_v5  ;;  %v782_v30 = vrot.slane %v780_v20, 4  ;;  %v5521_v17 = vld [vmem:[%s7133_s21 + $0x98] sm:$0x1] }
  0xa0   : > { %v785_v31 = vrot.slane %v783_v21, 5  ;;  %v791_v32 = vrot.slane %v789_v19, 5  ;;  %v795_v33 = vrot.slane %v793_v26, 4  ;;  %v799_v34 = vshll.u32 %v436_v14, 16  ;;  %v6830_v19 = vld [vmem:[%s7133_s21 + $0x84] sm:$0xff]  }
  0xa1   : > { %3174 = vmatmul.mubr.bf16.gmra.mrb[48].mxu1 %v6825_v2  ;;  %1606 = vmatprep.mubr.bf16.mxu0 %v5379_v27  ;;  %v2281_v10 = vsel %vm7167_vm5, %v2276_v28, %v2280_v5  ;;  %v2286_v35 = vrot.slane %v2285_v29, 4  ;;  %v2293_v36 = vshrl.u32 %v5516_v15, 16  ;;  %v2296_v37 = vshll.u32 %v5516_v15, 16  ;;  %v908_v29 = vld [vmem:[%s7133_s21 + $0x4] sm:$0xf] }
  0xa2   : > { %v786_v38 = vor.u32 %v785_v31, %v782_v30  ;;  %v796_v39 = vor.u32 %v795_v33, %v791_v32  ;;  %v801_v41 = vrot.slane %v799_v34, 5  ;;  %v2302_v44 = vshll.u32 %v5517_v7, 16  ;;  %v909_v34 = vld [vmem:[%s7133_s21 + $0x8] sm:$0x1] }
  0xa3   : > { %v2291_v45 = vsel %vm7167_vm5, %v2286_v35, %v2290_v24  ;;  %v2295_v46 = vrot.slane %v2293_v36, 4  ;;  %v2298_v47 = vrot.slane %v2296_v37, 5  ;;  %v2306_v13 = vshrl.u32 %v5517_v7, 16  ;;  %v907_v24 = vld [vmem:[%s7133_s21] sm:$0xe] }
  0xa4   : > { %v5543_v49 = vcombine.low %v2281_v10, %v2291_v45  ;;  %v787_v50 = vrot.slane %v786_v38, 4  ;;  %v797_v51 = vrot.slane %v796_v39, 4  ;;  %v2304_v52 = vrot.slane %v2302_v44, 5  ;;  %v5522_v10 = vld [vmem:[%s7133_s21 + $0x9c] sm:$0xf] }
  0xa5   : > { %v2299_v55 = vor.u32 %v2298_v47, %v2295_v46  ;;  %v2308_v4 = vrot.slane %v2306_v13, 4  ;;  %v2312_v56 = vshll.u32 %v5518_v43, 16  ;;  %v804_v59 = vshrl.u32 %v437_v1, 16  ;;  %v5524_v45 = vld [vmem:[%s7133_s21 + $0xa4] sm:$0x1]  ;;  %v6832_v47 = vld [vmem:[%s7133_s21 + $0xb4] sm:$0xff]  }
  0xa6   : > { %1607 = vmatmul.mubr.bf16.gmra.mrb[52].mxu0 %v6827_v25  ;;  %3181 = vmatprep.mubr.bf16.mxu1 %v5543_v49  ;;  %v792_v61 = vsel %vm7167_vm5, %v787_v50, %v791_v32  ;;  %v802_v57 = vsel %vm7167_vm5, %v797_v51, %v801_v41  ;;  %v807_v62 = vshll.u32 %v437_v1, 16  ;;  %v813_v63 = vshll.u32 %v438_v48, 16  ;;  %v5523_v1 = vld [vmem:[%s7133_s21 + $0xa0] sm:$0xf]  ;;  %v910_v49 = vld [vmem:[%s7133_s21 + $0xc] sm:$0xe] }
  0xa7   : > { %v5380_v2 = vcombine.low %v792_v61, %v802_v57  ;;  %v2300_v3 = vrot.slane %v2299_v55, 4  ;;  %v2309_v5 = vor.u32 %v2308_v4, %v2304_v52  ;;  %v2314_v6 = vrot.slane %v2312_v56, 5  ;;  %v912_v55 = vld [vmem:[%s7133_s21 + $0x14] sm:$0x1] }
  0xa8   : > { %v806_v8 = vrot.slane %v804_v59, 4  ;;  %v809_v9 = vrot.slane %v807_v62, 5  ;;  %v815_v16 = vrot.slane %v813_v63, 5  ;;  %v817_v11 = vshrl.u32 %v438_v48, 16 }
  0xa9   : > { %3182 = vmatmul.mubr.bf16.gmra.mrb[52].mxu1 %v6828_v22  ;;  %1614 = vmatprep.mubr.bf16.mxu0 %v5380_v2  ;;  %v2305_v12 = vsel %vm7167_vm5, %v2300_v3, %v2304_v52  ;;  %v2310_v14 = vrot.slane %v2309_v5, 4  ;;  %v823_v15 = vshll.u32 %v439_v53, 16  ;;  %v2317_v18 = vshrl.u32 %v5519_v60, 16 }
  0xaa   : > { %v810_v20 = vor.u32 %v809_v9, %v806_v8  ;;  %v819_v21 = vrot.slane %v817_v11, 4  ;;  %v2320_v7 = vshll.u32 %v5519_v60, 16  ;;  %v2326_v23 = vshll.u32 %v5520_v0, 16 }
  0xab   : > { %v2315_v25 = vsel %vm7167_vm5, %v2310_v14, %v2314_v6  ;;  %v825_v26 = vrot.slane %v823_v15, 5  ;;  %v2319_v27 = vrot.slane %v2317_v18, 4  ;;  %v2330_v28 = vshrl.u32 %v5520_v0, 16 }
  0xac   : > { %v5544_v30 = vcombine.low %v2305_v12, %v2315_v25  ;;  %v811_v31 = vrot.slane %v810_v20, 4  ;;  %v820_v32 = vor.u32 %v819_v21, %v815_v16  ;;  %v2322_v33 = vrot.slane %v2320_v7, 5  ;;  %v913_v7 = vld [vmem:[%s7133_s21 + $0x18] sm:$0xe]  ;;  %v915_v25 = vld [vmem:[%s7133_s21 + $0x20] sm:$0x1] }
  0xad   : > { %v2328_v35 = vrot.slane %v2326_v23, 5  ;;  %v2332_v36 = vrot.slane %v2330_v28, 4  ;;  %v2336_v37 = vshll.u32 %v5521_v17, 16  ;;  %v5382_v38 = vrot.slane %v907_v24, 9  ;;  %v914_v23 = vld [vmem:[%s7133_s21 + $0x1c] sm:$0xf] }
  0xae   : > { %1615 = vmatmul.mubr.bf16.gmra.mrb[56].mxu0 %v6829_v58  ;;  %3189 = vmatprep.mubr.bf16.mxu1 %v5544_v30  ;;  %v816_v39 = vsel %vm7167_vm5, %v811_v31, %v815_v16  ;;  %v821_v41 = vrot.slane %v820_v32, 4  ;;  %v2323_v43 = vor.u32 %v2322_v33, %v2319_v27  ;;  %v1008_v44 = vrot.slane %v908_v29, 5  ;;  %v6833_v58 = vld [vmem:[%s7133_s21 + $0x90] sm:$0xff]   ;;  %v7558_v27 = vld [vmem:[%s8525_s1 + $0x200] sm:$0xff]   ;;  %v5525_v32 = vld [vmem:[%s7133_s21 + $0xa8] sm:$0xf] }
  0xaf   : > { %v2333_v22 = vor.u32 %v2332_v36, %v2328_v35  ;;  %v2338_v46 = vrot.slane %v2336_v37, 5  ;;  %v1011_v13 = vrot.slane %v909_v34, 5  ;;  %v2341_v48 = vshrl.u32 %v5522_v10, 16  ;;  %v6836_v30 = vld [vmem:[%s8525_s1 + $0x180] sm:$0xff]   ;;  %v5526_v33 = vld [vmem:[%s7133_s21 + $0xac] sm:$0xf]  ;;  %6478 = vmatprep.subr.bf16.mxu1 %v7558_v27 }
  0xb0   : > { %v826_v50 = vsel %vm7167_vm5, %v821_v41, %v825_v26  ;;  %v2324_v51 = vrot.slane %v2323_v43, 4  ;;  %v1009_v52 = vsel %vm7160_vm4, %v5382_v38, %v1008_v44  ;;  %v1010_v53 = vrot.slane %v1008_v44, 4  ;;  %v5527_v38 = vld [vmem:[%s7133_s21 + $0xb0] sm:$0x1]  ;;  %v6834_v43 = vld [vmem:[%s7133_s21 + $0x9c] sm:$0xff]  }
  0xb1   : > { %3190 = vmatmul.mubr.bf16.gmra.mrb[56].mxu1 %v6830_v19  ;;  %v5381_v4 = vcombine.low %v816_v39, %v826_v50  ;;  %v2334_v56 = vrot.slane %v2333_v22, 4  ;;  %v2343_v59 = vrot.slane %v2341_v48, 4  ;;  %v2344_v60 = vshll.u32 %v5522_v10, 16  ;;  %v916_v39 = vld [vmem:[%s7133_s21 + $0x24] sm:$0xe]  ;;  %v6839_v50 = vld [vmem:[%s8525_s1 + $0x188] sm:$0xff]  }
  0xb2   : > { %v2329_v61 = vsel %vm7167_vm5, %v2324_v51, %v2328_v35  ;;  %v1012_v57 = vsel %vm7160_vm4, %v1010_v53, %v1011_v13  ;;  %v2350_v62 = vshll.u32 %v5523_v1, 16  ;;  %v2354_v63 = vshrl.u32 %v5523_v1, 16  ;;  %v6838_v35 = vld [vmem:[%s8525_s1 + $0x1c8] sm:$0xff]  }
  0xb3   : > { %1622 = vmatprep.mubr.bf16.mxu0 %v5381_v4  ;;  %v2339_v0 = vsel %vm7167_vm5, %v2334_v56, %v2338_v46  ;;  %v5398_v2 = vcombine.low %v1009_v52, %v1012_v57  ;;  %v2346_v3 = vrot.slane %v2344_v60, 5  ;;  %v2360_v5 = vshll.u32 %v5524_v45, 16  ;;  %v917_v22 = vld [vmem:[%s7133_s21 + $0x28] sm:$0xf]  ;;  %v918_v48 = vld [vmem:[%s7133_s21 + $0x2c] sm:$0x1] }
  0xb4   : > { %v5545_v6 = vcombine.low %v2329_v61, %v2339_v0  ;;  %v2352_v8 = vrot.slane %v2350_v62, 5  ;;  %v2356_v9 = vrot.slane %v2354_v63, 4  ;;  %v5383_v16 = vrot.slane %v910_v49, 9 }
  0xb5   : > { %v2347_v11 = vor.u32 %v2346_v3, %v2343_v59  ;;  %v2362_v12 = vrot.slane %v2360_v5, 5  ;;  %v1015_v14 = vrot.slane %v911_v54, 5  ;;  %v1018_v15 = vrot.slane %v912_v55, 5  ;;  %v6840_v3 = vld [vmem:[%s7133_s21 + $0xa8] sm:$0xff]   ;;  %v6842_v5 = vld [vmem:[%s8525_s1 + $0x190] sm:$0xff]  }
  0xb6   : > { %1623 = vmatmul.mubr.bf16.gmra.mrb[60].mxu0 %v6832_v47  ;;  %3197 = vmatprep.mubr.bf16.mxu1 %v5545_v6  ;;  %v2357_v17 = vor.u32 %v2356_v9, %v2352_v8  ;;  %v5384_v19 = vrot.slane %v913_v7, 9  ;;  %v1022_v26 = vrot.slane %v914_v23, 5  ;;  %v1025_v31 = vrot.slane %v915_v25, 5  ;;  %v919_v6 = vld [vmem:[%s7133_s21 + $0x30] sm:$0xe]  ;;  %v6844_v23 = vld [vmem:[%s8525_s1 + $0x198] sm:$0xff]  }
  0xb7   : > { %6398 = vmatprep.mubr.bf16.mxu0 %v5398_v2  ;;  %v2348_v18 = vrot.slane %v2347_v11, 4  ;;  %v1016_v20 = vsel %vm7160_vm4, %v5383_v16, %v1015_v14  ;;  %v1017_v21 = vrot.slane %v1015_v14, 4  ;;  %v2365_v44 = vshrl.u32 %v5525_v32, 16  ;;  %v6843_v16 = vld [vmem:[%s8525_s1 + $0x1d8] sm:$0xff]   ;;  %v920_v11 = vld [vmem:[%s7133_s21 + $0x34] sm:$0xf] }
  0xb8   : > { %v2358_v24 = vrot.slane %v2357_v17, 4  ;;  %v1023_v36 = vsel %vm7160_vm4, %v5384_v19, %v1022_v26  ;;  %v1024_v37 = vrot.slane %v1022_v26, 4  ;;  %v2368_v1 = vshll.u32 %v5525_v32, 16  ;;  %v922_v32 = vld [vmem:[%s7133_s21 + $0x3c] sm:$0xe] }
  0xb9   : > { %3198 = vmatmul.mubr.bf16.gmra.mrb[60].mxu1 %v6833_v58  ;;  %v2353_v28 = vsel %vm7167_vm5, %v2348_v18, %v2352_v8  ;;  %v1019_v29 = vsel %vm7160_vm4, %v1017_v21, %v1018_v15  ;;  %v2374_v45 = vshll.u32 %v5526_v33, 16  ;;  %v2378_v47 = vshrl.u32 %v5526_v33, 16  ;;  %v6841_v58 = vld [vmem:[%s8525_s1 + $0x1d0] sm:$0xff]   ;;  %v5529_v21 = vld [vmem:[%s7133_s21 + $0xb8] sm:$0xf]  ;;  %v6846_v33 = vld [vmem:[%s8525_s1 + $0x1e0] sm:$0xff]  }
  0xba   : > { %v2363_v34 = vsel %vm7167_vm5, %v2358_v24, %v2362_v12  ;;  %v5399_v10 = vcombine.low %v1016_v20, %v1019_v29  ;;  %v1026_v46 = vsel %vm7160_vm4, %v1024_v37, %v1025_v31  ;;  %v2384_v13 = vshll.u32 %v5527_v38, 16  ;;  %v921_v12 = vld [vmem:[%s7133_s21 + $0x38] sm:$0x1]  ;;  %v5528_v20 = vld [vmem:[%s7133_s21 + $0xb4] sm:$0xf] }
  0xbb   : > { %v5546_v41 = vcombine.low %v2353_v28, %v2363_v34  ;;  %v5385_v49 = vrot.slane %v916_v39, 9  ;;  %v5400_v51 = vcombine.low %v1023_v36, %v1026_v46  ;;  %v2367_v52 = vrot.slane %v2365_v44, 4  ;;  %v5530_v24 = vld [vmem:[%s7133_s21 + $0xbc] sm:$0x1]  ;;  %v923_v36 = vld [vmem:[%s7133_s21 + $0x40] sm:$0xf] }
  0xbc   : > { %v2370_v53 = vrot.slane %v2368_v1, 5  ;;  %v2376_v54 = vrot.slane %v2374_v45, 5  ;;  %v2380_v55 = vrot.slane %v2378_v47, 4  ;;  %v1029_v4 = vrot.slane %v917_v22, 5  ;;  %v6847_v22 = vld [vmem:[%s8525_s1 + $0x1a0] sm:$0xff]  }
  0xbd   : > { %3205 = vmatprep.mubr.bf16.mxu1 %v5546_v41  ;;  %v1032_v56 = vrot.slane %v918_v48, 5  ;;  %v2386_v61 = vrot.slane %v2384_v13, 5  ;;  %v5386_v14 = vrot.slane %v919_v6, 9  ;;  %v1036_v17 = vrot.slane %v920_v11, 5  ;;  %v924_v41 = vld [vmem:[%s7133_s21 + $0x44] sm:$0x1] }
  0xbe   : > { %6399 = vmatmul.mubr.bf16.vlgmr.msra.gmra.mrb[64].mxu0 %v5399_v10  ;;  %v2371_v59 = vor.u32 %v2370_v53, %v2367_v52  ;;  %v2381_v60 = vor.u32 %v2380_v55, %v2376_v54  ;;  %v1030_v57 = vsel %vm7160_vm4, %v5385_v49, %v1029_v4  ;;  %v1031_v62 = vrot.slane %v1029_v4, 4  ;;  %v6845_v53 = vld [vmem:[%s7133_s21 + $0xb4] sm:$0xff]  }
  0xbf   : > { %6247 = vmatpush3.bf16.msra.mxu0 %v6836_v30  ;;  %6402 = vmatprep.mubr.bf16.mxu0 %v5400_v51  ;;  %v1039_v18 = vrot.slane %v921_v12, 5  ;;  %v2389_v25 = vshrl.u32 %v5528_v20, 16  ;;  %v2392_v19 = vshll.u32 %v5528_v20, 16  ;;  %v2398_v26 = vshll.u32 %v5529_v21, 16  ;;  %v928_v12 = vld [vmem:[%s7133_s21 + $0x54] sm:$0xe] }
  0xc0   : > { %6248 = vmatprep.subr.bf16.mxu0 %v6838_v35  ;;  %v2372_v63 = vrot.slane %v2371_v59, 4  ;;  %v2382_v0 = vrot.slane %v2381_v60, 4  ;;  %v1033_v2 = vsel %vm7160_vm4, %v1031_v62, %v1032_v56  ;;  %v1037_v28 = vsel %vm7160_vm4, %v5386_v14, %v1036_v17  ;;  %v6852_v56 = vld [vmem:[%s8525_s1 + $0x1f0] sm:$0xff]   ;;  %v925_v59 = vld [vmem:[%s7133_s21 + $0x48] sm:$0xe] }
  0xc1   : > { %3206 = vmatmul.mubr.bf16.gmra.mrb[64].mxu1 %v6834_v43  ;;  %v5401_v9 = vcombine.low %v1030_v57, %v1033_v2  ;;  %v1038_v29 = vrot.slane %v1036_v17, 4  ;;  %v2402_v30 = vshrl.u32 %v5529_v21, 16  ;;  %v2408_v31 = vshll.u32 %v5530_v24, 16  ;;  %v926_v60 = vld [vmem:[%s7133_s21 + $0x4c] sm:$0xf]  ;;  %v6853_v14 = vld [vmem:[%s8525_s1 + $0x1b0] sm:$0xff]  }
  0xc2   : > { %v2377_v8 = vsel %vm7167_vm5, %v2372_v63, %v2376_v54  ;;  %v2387_v15 = vsel %vm7167_vm5, %v2382_v0, %v2386_v61  ;;  %v2391_v34 = vrot.slane %v2389_v25, 4  ;;  %v2394_v10 = vrot.slane %v2392_v19, 5  ;;  %v6850_v54 = vld [vmem:[%s8525_s1 + $0x1a8] sm:$0xff]   ;;  %v927_v57 = vld [vmem:[%s7133_s21 + $0x50] sm:$0x1] }
  0xc3   : > { %6249 = vmatpush3.bf16.msra.mxu0 %v6839_v50  ;;  %v5547_v7 = vcombine.low %v2377_v8, %v2387_v15  ;;  %v2400_v35 = vrot.slane %v2398_v26, 5  ;;  %v5387_v37 = vrot.slane %v922_v32, 9  ;;  %v1040_v38 = vsel %vm7160_vm4, %v1038_v29, %v1039_v18  ;;  %v6849_v50 = vld [vmem:[%s8525_s1 + $0x1e8] sm:$0xff]   ;;  %v5531_v0 = vld [vmem:[%s7133_s21 + $0xc0] sm:$0xf]  ;;  %v6854_v26 = vld [vmem:[%s8525_s1 + $0x1f8] sm:$0xff]  }
  0xc4   : > { %6250 = vmatprep.subr.bf16.mxu0 %v6841_v58  ;;  %v2404_v39 = vrot.slane %v2402_v30, 4  ;;  %v1043_v43 = vrot.slane %v923_v36, 5  ;;  %v5402_v44 = vcombine.low %v1037_v28, %v1040_v38  ;;  %v2395_v1 = vor.u32 %v2394_v10, %v2391_v34  ;;  %v929_v20 = vld [vmem:[%s7133_s21 + $0x58] sm:$0xf]  ;;  %v930_v25 = vld [vmem:[%s7133_s21 + $0x5c] sm:$0x1] }
  0xc5   : > { %3213 = vmatprep.mubr.bf16.mxu1 %v5547_v7  ;;  %v1046_v45 = vrot.slane %v924_v41, 5  ;;  %v2410_v47 = vrot.slane %v2408_v31, 5  ;;  %v5388_v62 = vrot.slane %v925_v59, 9  ;;  %v1050_v63 = vrot.slane %v926_v60, 5 }
  0xc6   : > { %6403 = vmatmul.mubr.bf16.gmra.mrb[68].mxu0 %v5401_v9  ;;  %v2405_v46 = vor.u32 %v2404_v39, %v2400_v35  ;;  %v1044_v13 = vsel %vm7160_vm4, %v5387_v37, %v1043_v43  ;;  %v1045_v48 = vrot.slane %v1043_v43, 4  ;;  %v2396_v49 = vrot.slane %v2395_v1, 4  ;;  %v6855_v37 = vld [vmem:[%s8525_s1 + $0x1b8] sm:$0xff]   ;;  %v5550_v43 = vld [vmem:[%s7133_s21 + $0xc] sm:$0xe] }
  0xc7   : > { %6251 = vmatpush3.bf16.msra.mxu0 %v6842_v5  ;;  %6406 = vmatprep.mubr.bf16.mxu0 %v5402_v44  ;;  %v1053_v2 = vrot.slane %v927_v57, 5  ;;  %v5533_v5 = vld [vmem:[%s7133_s21 + $0xc8] sm:$0x1]  ;;  %v2413_v6 = vshrl.u32 %v5531_v0, 16  ;;  %v1051_v8 = vsel %vm7160_vm4, %v5388_v62, %v1050_v63  ;;  %v1052_v9 = vrot.slane %v1050_v63, 4 }
  0xc8   : > { %6252 = vmatprep.subr.bf16.mxu0 %v6843_v16  ;;  %v2406_v51 = vrot.slane %v2405_v46, 4  ;;  %v1047_v52 = vsel %vm7160_vm4, %v1045_v48, %v1046_v45  ;;  %v2401_v55 = vsel %vm7167_vm5, %v2396_v49, %v2400_v35  ;;  %v2416_v16 = vshll.u32 %v5531_v0, 16  ;;  %v5551_v44 = vld [vmem:[%s7133_s21 + $0x10] sm:$0xf]  ;;  %v5552_v1 = vld [vmem:[%s7133_s21 + $0x14] sm:$0x1] }
  0xc9   : > { %3214 = vmatmul.mubr.bf16.gmra.mrb[68].mxu1 %v6840_v3  ;;  %v5403_v4 = vcombine.low %v1044_v13, %v1047_v52  ;;  %v5532_v3 = vld [vmem:[%s7133_s21 + $0xc4] sm:$0xf]  ;;  %v2415_v15 = vrot.slane %v2413_v6, 4  ;;  %v2432_v18 = vshll.u32 %v5533_v5, 16  ;;  %v5389_v21 = vrot.slane %v928_v12, 9 }
  0xca   : > { %v2411_v58 = vsel %vm7167_vm5, %v2406_v51, %v2410_v47  ;;  %v2422_v11 = vshll.u32 %v5532_v3, 16  ;;  %v2426_v17 = vshrl.u32 %v5532_v3, 16  ;;  %v1054_v7 = vsel %vm7160_vm4, %v1052_v9, %v1053_v2  ;;  %v5750_v48 = vld [vmem:[%s7133_s21 + $0x18] sm:$0xf]  ;;  %v5752_v51 = vld [vmem:[%s7133_s21 + $0x20] sm:$0x1] }
  0xcb   : > { %6253 = vmatpush3.bf16.msra.mxu0 %v6844_v23  ;;  %v5548_v61 = vcombine.low %v2401_v55, %v2411_v58  ;;  %v2418_v23 = vrot.slane %v2416_v16, 5  ;;  %v1057_v19 = vrot.slane %v929_v20, 5  ;;  %v5404_v28 = vcombine.low %v1051_v8, %v1054_v7  ;;  %v5553_v58 = vld [vmem:[%s7133_s21 + $0x18] sm:$0xe]  ;;  %v5554_v57 = vld [vmem:[%s7133_s21 + $0x1c] sm:$0xf] }
  0xcc   : > { %6254 = vmatprep.subr.bf16.mxu0 %v6846_v33  ;;  %v2424_v24 = vrot.slane %v2422_v11, 5  ;;  %v2428_v29 = vrot.slane %v2426_v17, 4  ;;  %v1060_v30 = vrot.slane %v930_v25, 5  ;;  %v2434_v32 = vrot.slane %v2432_v18, 5  ;;  %v5555_v3 = vld [vmem:[%s7133_s21 + $0x20] sm:$0x1] }
  0xcd   : > { %3221 = vmatprep.mubr.bf16.mxu1 %v5548_v61  ;;  %v2419_v31 = vor.u32 %v2418_v23, %v2415_v15  ;;  %v1058_v33 = vsel %vm7160_vm4, %v5389_v21, %v1057_v19  ;;  %v1059_v34 = vrot.slane %v1057_v19, 4  ;;  %v5598_v46 = vrot.slane %v5550_v43, 9  ;;  %v5556_v17 = vld [vmem:[%s7133_s21 + $0x24] sm:$0xe]  ;;  %v5557_v18 = vld [vmem:[%s7133_s21 + $0x28] sm:$0xf] }
  0xce   : > { %6407 = vmatmul.mubr.bf16.gmra.mrb[72].mxu0 %v5403_v4  ;;  %v2429_v10 = vor.u32 %v2428_v29, %v2424_v24  ;;  %v2614_v47 = vrot.slane %v5551_v44, 5  ;;  %v2617_v13 = vrot.slane %v5552_v1, 5  ;;  %v3660_v52 = vshrl.u32 %v5750_v48, 16  ;;  %v6856_v7 = vld [vmem:[%s7133_s21 + $0x18] sm:$0xff]   ;;  %v5558_v23 = vld [vmem:[%s7133_s21 + $0x2c] sm:$0x1] }
  0xcf   : > { %6255 = vmatpush3.bf16.msra.mxu0 %v6847_v22  ;;  %6410 = vmatprep.mubr.bf16.mxu0 %v5404_v28  ;;  %v2420_v35 = vrot.slane %v2419_v31, 4  ;;  %v1061_v36 = vsel %vm7160_vm4, %v1059_v34, %v1060_v30  ;;  %v6851_v22 = vld [vmem:[%s7133_s21 + $0xc0] sm:$0xff]   ;;  %v3679_v61 = vshll.u32 %v5752_v51, 16  ;;  %v5599_v62 = vrot.slane %v5553_v58, 9  ;;  %v5754_v30 = vld [vmem:[%s7133_s21 + $0x28] sm:$0xf] }
  0xd0   : > { %6256 = vmatprep.subr.bf16.mxu0 %v6849_v50  ;;  %v2430_v38 = vrot.slane %v2429_v10, 4  ;;  %v5405_v39 = vcombine.low %v1058_v33, %v1061_v36  ;;  %v5751_v50 = vld [vmem:[%s7133_s21 + $0x1c] sm:$0xf]  ;;  %v2616_v55 = vrot.slane %v2614_v47, 4  ;;  %v3662_v59 = vrot.slane %v3660_v52, 4  ;;  %v6859_v31 = vld [vmem:[%s8525_s1 + $0x208] sm:$0xff]  }
  0xd1   : > { %3222 = vmatmul.mubr.bf16.gmra.mrb[72].mxu1 %v6845_v53  ;;  %v2425_v41 = vsel %vm7167_vm5, %v2420_v35, %v2424_v24  ;;  %v3663_v53 = vshll.u32 %v5750_v48, 16  ;;  %v3669_v4 = vshll.u32 %v5751_v50, 16  ;;  %v2621_v5 = vrot.slane %v5554_v57, 5  ;;  %v5753_v29 = vld [vmem:[%s7133_s21 + $0x24] sm:$0xf] }
  0xd2   : > { %v2435_v45 = vsel %vm7167_vm5, %v2430_v38, %v2434_v32  ;;  %v2618_v63 = vsel %vm7160_vm4, %v2616_v55, %v2617_v13  ;;  %v2624_v9 = vrot.slane %v5555_v3, 5  ;;  %v3681_v11 = vrot.slane %v3679_v61, 5  ;;  %v5755_v10 = vld [vmem:[%s7133_s21 + $0x2c] sm:$0x1]  ;;  %v5559_v36 = vld [vmem:[%s7133_s21 + $0x30] sm:$0xe] }
  0xd3   : > { %6257 = vmatpush3.bf16.msra.mxu0 %v6850_v54  ;;  %v5549_v49 = vcombine.low %v2425_v41, %v2435_v45  ;;  %v2615_v54 = vsel %vm7160_vm4, %v5598_v46, %v2614_v47  ;;  %v3665_v60 = vrot.slane %v3663_v53, 5  ;;  %v3671_v0 = vrot.slane %v3669_v4, 5  ;;  %v5560_v43 = vld [vmem:[%s7133_s21 + $0x34] sm:$0xf]  ;;  %v5562_v55 = vld [vmem:[%s7133_s21 + $0x3c] sm:$0xe] }
  0xd4   : > { %6258 = vmatprep.subr.bf16.mxu0 %v6852_v56  ;;  %v3673_v56 = vshrl.u32 %v5751_v50, 16  ;;  %v5614_v6 = vcombine.low %v2615_v54, %v2618_v63  ;;  %v2622_v12 = vsel %vm7160_vm4, %v5599_v62, %v2621_v5  ;;  %v5600_v24 = vrot.slane %v5556_v17, 9  ;;  %v6861_v53 = vld [vmem:[%s8525_s1 + $0x210] sm:$0xff]   ;;  %v5563_v58 = vld [vmem:[%s7133_s21 + $0x40] sm:$0xf]  ;;  %v6858_v62 = vld [vmem:[%s7133_s21 + $0x24] sm:$0xff]  }
  0xd5   : > { %3229 = vmatprep.mubr.bf16.mxu1 %v5549_v49  ;;  %v3666_v8 = vor.u32 %v3665_v60, %v3662_v59  ;;  %v2628_v25 = vrot.slane %v5557_v18, 5  ;;  %v2631_v28 = vrot.slane %v5558_v23, 5  ;;  %v3684_v35 = vshrl.u32 %v5753_v29, 16  ;;  %v5564_v59 = vld [vmem:[%s7133_s21 + $0x44] sm:$0x1]  ;;  %v6863_v3 = vld [vmem:[%s8525_s1 + $0x218] sm:$0xff]  }
  0xd6   : > { %6411 = vmatmul.mubr.bf16.gmra.mrb[76].mxu0 %v5405_v39  ;;  %v3675_v2 = vrot.slane %v3673_v56, 4  ;;  %v3687_v38 = vshll.u32 %v5753_v29, 16  ;;  %v3693_v39 = vshll.u32 %v5754_v30, 16  ;;  %v3697_v41 = vshrl.u32 %v5754_v30, 16  ;;  %v5565_v17 = vld [vmem:[%s7133_s21 + $0x48] sm:$0xe] }
  0xd7   : > { %6259 = vmatpush3.bf16.msra.mxu0 %v6853_v14  ;;  %v2623_v14 = vrot.slane %v2621_v5, 4  ;;  %v3667_v15 = vrot.slane %v3666_v8, 4  ;;  %v2629_v33 = vsel %vm7160_vm4, %v5600_v24, %v2628_v25  ;;  %v2630_v34 = vrot.slane %v2628_v25, 4  ;;  %v5758_v8 = vld [vmem:[%s7133_s21 + $0x38] sm:$0x1] }
  0xd8   : > { %6260 = vmatprep.subr.bf16.mxu0 %v6854_v26  ;;  %v3676_v16 = vor.u32 %v3675_v2, %v3671_v0  ;;  %v3686_v1 = vrot.slane %v3684_v35, 4  ;;  %v3703_v45 = vshll.u32 %v5755_v10, 16  ;;  %v5601_v46 = vrot.slane %v5559_v36, 9  ;;  %v5756_v2 = vld [vmem:[%s7133_s21 + $0x30] sm:$0xf] }
  0xd9   : > { %3230 = vmatmul.mubr.bf16.gmra.mrb[76].mxu1 %v6851_v22  ;;  %v2625_v21 = vsel %vm7160_vm4, %v2623_v14, %v2624_v9  ;;  %v3672_v19 = vsel %vm7167_vm5, %v3667_v15, %v3671_v0  ;;  %v2632_v44 = vsel %vm7160_vm4, %v2630_v34, %v2631_v28  ;;  %v5561_v22 = vld [vmem:[%s7133_s21 + $0x38] sm:$0x1]  ;;  %v3689_v13 = vrot.slane %v3687_v38, 5  ;;  %v5566_v18 = vld [vmem:[%s7133_s21 + $0x4c] sm:$0xf] }
  0xda   : > { %6446 = vmatprep.mubr.bf16.mxu1 %v5614_v6  ;;  %v3677_v20 = vrot.slane %v3676_v16, 4  ;;  %v5615_v26 = vcombine.low %v2622_v12, %v2625_v21  ;;  %v5616_v47 = vcombine.low %v2629_v33, %v2632_v44  ;;  %v3695_v48 = vrot.slane %v3693_v39, 5  ;;  %v5757_v6 = vld [vmem:[%s7133_s21 + $0x34] sm:$0xf]  ;;  %v5570_v44 = vld [vmem:[%s7133_s21 + $0x5c] sm:$0x1] }
  0xdb   : > { %6261 = vmatpush3.bf16.msra.mxu0 %v6855_v37  ;;  %v3699_v49 = vrot.slane %v3697_v41, 4  ;;  %v3705_v50 = vrot.slane %v3703_v45, 5  ;;  %v2635_v51 = vrot.slane %v5560_v43, 5  ;;  %v2638_v52 = vrot.slane %v5561_v22, 5  ;;  %v5568_v36 = vld [vmem:[%s7133_s21 + $0x54] sm:$0xe] }
  0xdc   : > { %v3682_v32 = vsel %vm7167_vm5, %v3677_v20, %v3681_v11  ;;  %v3690_v54 = vor.u32 %v3689_v13, %v3686_v1  ;;  %v5602_v60 = vrot.slane %v5562_v55, 9  ;;  %v2642_v63 = vrot.slane %v5563_v58, 5  ;;  %v5567_v20 = vld [vmem:[%s7133_s21 + $0x50] sm:$0x1]  ;;  %v5569_v43 = vld [vmem:[%s7133_s21 + $0x58] sm:$0xf] }
  0xdd   : > { %v5798_v37 = vcombine.low %v3672_v19, %v3682_v32  ;;  %v2636_v4 = vsel %vm7160_vm4, %v5601_v46, %v2635_v51  ;;  %v2637_v56 = vrot.slane %v2635_v51, 4  ;;  %v2645_v0 = vrot.slane %v5564_v59, 5  ;;  %v6867_v13 = vld [vmem:[%s8525_s1 + $0x228] sm:$0xff]   ;;  %v5761_v51 = vld [vmem:[%s7133_s21 + $0x44] sm:$0x1]  ;;  %v6860_v55 = vld [vmem:[%s7133_s21 + $0x30] sm:$0xff]  }
  0xde   : > { %v3691_v61 = vrot.slane %v3690_v54, 4  ;;  %v3708_v9 = vshrl.u32 %v5756_v2, 16  ;;  %v3711_v16 = vshll.u32 %v5756_v2, 16  ;;  %v2643_v15 = vsel %vm7160_vm4, %v5602_v60, %v2642_v63  ;;  %v5571_v58 = vld [vmem:[%s7133_s21 + $0x60] sm:$0xe] }
  0xdf   : > { %4716 = vmatprep.mubr.bf16.mxu0 %v5798_v37  ;;  %v2639_v5 = vsel %vm7160_vm4, %v2637_v56, %v2638_v52  ;;  %v3717_v25 = vshll.u32 %v5757_v6, 16  ;;  %v3721_v19 = vshrl.u32 %v5757_v6, 16  ;;  %v5603_v28 = vrot.slane %v5565_v17, 9  ;;  %v6865_v37 = vld [vmem:[%s8525_s1 + $0x220] sm:$0xff]  }
  0xe0   : > { %4717 = vmatmul.mubr.bf16.vlgmr.msra.gmra.mrb[80].mxu0 %v6856_v7  ;;  %v3696_v11 = vsel %vm7167_vm5, %v3691_v61, %v3695_v48  ;;  %v5617_v14 = vcombine.low %v2636_v4, %v2639_v5  ;;  %v2644_v7 = vrot.slane %v2642_v63, 4  ;;  %v3710_v23 = vrot.slane %v3708_v9, 4  ;;  %v5572_v59 = vld [vmem:[%s7133_s21 + $0x64] sm:$0xf]  ;;  %v5573_v63 = vld [vmem:[%s7133_s21 + $0x68] sm:$0x1] }
  0xe1   : > { %6447 = vmatmul.mubr.bf16.vlgmr.msra.gmra.mrb[80].mxu1 %v5615_v26  ;;  %v3713_v24 = vrot.slane %v3711_v16, 5  ;;  %v3727_v26 = vshll.u32 %v5758_v8, 16  ;;  %v2652_v32 = vrot.slane %v5567_v20, 5  ;;  %v3719_v34 = vrot.slane %v3717_v25, 5 }
  0xe2   : > { %6479 = vmatpush3.bf16.msra.mxu1 %v7558_v27  ;;  %6450 = vmatprep.mubr.bf16.mxu1 %v5616_v47  ;;  %v3700_v27 = vor.u32 %v3699_v49, %v3695_v48  ;;  %v2646_v29 = vsel %vm7160_vm4, %v2644_v7, %v2645_v0  ;;  %v3723_v10 = vrot.slane %v3721_v19, 4  ;;  %v5604_v45 = vrot.slane %v5568_v36, 9  ;;  %v5759_v47 = vld [vmem:[%s7133_s21 + $0x3c] sm:$0xf]  ;;  %v5576_v7 = vld [vmem:[%s7133_s21 + $0x74] sm:$0x1] }
  0xe3   : > { %6480 = vmatprep.subr.bf16.mxu1 %v6859_v31  ;;  %v3714_v30 = vor.u32 %v3713_v24, %v3710_v23  ;;  %v5618_v33 = vcombine.low %v2643_v15, %v2646_v29  ;;  %v3729_v35 = vrot.slane %v3727_v26, 5  ;;  %v2656_v22 = vrot.slane %v5569_v43, 5  ;;  %v5763_v29 = vld [vmem:[%s7133_s21 + $0x4c] sm:$0xf]  ;;  %v6862_v36 = vld [vmem:[%s7133_s21 + $0x3c] sm:$0xff]  }
  0xe4   : > { %v3701_v57 = vrot.slane %v3700_v27, 4  ;;  %v3724_v1 = vor.u32 %v3723_v10, %v3719_v34  ;;  %v2659_v46 = vrot.slane %v5570_v44, 5  ;;  %v3732_v52 = vshrl.u32 %v5759_v47, 16  ;;  %v6871_v43 = vld [vmem:[%s8525_s1 + $0x238] sm:$0xff]  }
  0xe5   : > { %v3715_v38 = vrot.slane %v3714_v30, 4  ;;  %v2657_v4 = vsel %vm7160_vm4, %v5604_v45, %v2656_v22  ;;  %v2658_v56 = vrot.slane %v2656_v22, 4  ;;  %v5605_v5 = vrot.slane %v5571_v58, 9 }
  0xe6   : > { %6481 = vmatpush3.bf16.msra.mxu1 %v6859_v31  ;;  %v3706_v12 = vsel %vm7167_vm5, %v3701_v57, %v3705_v50  ;;  %v2649_v31 = vrot.slane %v5566_v18, 5  ;;  %v5760_v50 = vld [vmem:[%s7133_s21 + $0x40] sm:$0xf]  ;;  %v3725_v54 = vrot.slane %v3724_v1, 4  ;;  %v3734_v60 = vrot.slane %v3732_v52, 4 }
  0xe7   : > { %6482 = vmatprep.subr.bf16.mxu1 %v6861_v53  ;;  %v5799_v21 = vcombine.low %v3696_v11, %v3706_v12  ;;  %v3720_v48 = vsel %vm7167_vm5, %v3715_v38, %v3719_v34  ;;  %v3741_v57 = vshll.u32 %v5760_v50, 16  ;;  %v2660_v2 = vsel %vm7160_vm4, %v2658_v56, %v2659_v46  ;;  %v6869_v11 = vld [vmem:[%s8525_s1 + $0x230] sm:$0xff]   ;;  %v5574_v18 = vld [vmem:[%s7133_s21 + $0x6c] sm:$0xe]  ;;  %v5579_v46 = vld [vmem:[%s7133_s21 + $0x80] sm:$0x1] }
  0xe8   : > { %v2650_v39 = vsel %vm7160_vm4, %v5603_v28, %v2649_v31  ;;  %v2651_v41 = vrot.slane %v2649_v31, 4  ;;  %v3730_v0 = vsel %vm7167_vm5, %v3725_v54, %v3729_v35  ;;  %v5620_v8 = vcombine.low %v2657_v4, %v2660_v2  ;;  %v5762_v28 = vld [vmem:[%s7133_s21 + $0x48] sm:$0xf] }
  0xe9   : > { %6451 = vmatmul.mubr.bf16.gmra.mrb[84].mxu1 %v5617_v14  ;;  %4724 = vmatprep.mubr.bf16.mxu0 %v5799_v21  ;;  %v5800_v6 = vcombine.low %v3720_v48, %v3730_v0  ;;  %v3743_v16 = vrot.slane %v3741_v57, 5  ;;  %v2663_v15 = vrot.slane %v5572_v59, 5  ;;  %v2666_v17 = vrot.slane %v5573_v63, 5  ;;  %v5575_v21 = vld [vmem:[%s7133_s21 + $0x70] sm:$0xf] }
  0xea   : > { %6483 = vmatpush3.bf16.msra.mxu1 %v6861_v53  ;;  %4725 = vmatmul.mubr.bf16.gmra.mrb[84].mxu0 %v6858_v62  ;;  %v2653_v49 = vsel %vm7160_vm4, %v2651_v41, %v2652_v32  ;;  %v3735_v53 = vshll.u32 %v5759_v47, 16  ;;  %v3745_v62 = vshrl.u32 %v5760_v50, 16  ;;  %v5606_v23 = vrot.slane %v5574_v18, 9  ;;  %v5764_v32 = vld [vmem:[%s7133_s21 + $0x50] sm:$0x1] }
  0xeb   : > { %6484 = vmatprep.subr.bf16.mxu1 %v6863_v3  ;;  %6454 = vmatprep.mubr.bf16.mxu1 %v5618_v33  ;;  %v5619_v27 = vcombine.low %v2650_v39, %v2653_v49  ;;  %v2664_v25 = vsel %vm7160_vm4, %v5605_v5, %v2663_v15  ;;  %v2665_v19 = vrot.slane %v2663_v15, 4  ;;  %v2670_v26 = vrot.slane %v5575_v21, 5  ;;  %v5577_v39 = vld [vmem:[%s7133_s21 + $0x78] sm:$0xe]  ;;  %v5578_v41 = vld [vmem:[%s7133_s21 + $0x7c] sm:$0xf] }
  0xec   : > { %v3737_v61 = vrot.slane %v3735_v53, 5  ;;  %v3747_v12 = vrot.slane %v3745_v62, 4  ;;  %4732 = vmatprep.mubr.bf16.mxu0 %v5800_v6  ;;  %v2673_v31 = vrot.slane %v5576_v7, 5  ;;  %v3756_v33 = vshrl.u32 %v5762_v28, 16  ;;  %v5580_v59 = vld [vmem:[%s7133_s21 + $0x84] sm:$0xe] }
  0xed   : > { %v3759_v34 = vshll.u32 %v5762_v28, 16  ;;  %v2667_v35 = vsel %vm7160_vm4, %v2665_v19, %v2666_v17  ;;  %v2672_v38 = vrot.slane %v2670_v26, 4  ;;  %v3765_v22 = vshll.u32 %v5763_v29, 16  ;;  %v5581_v57 = vld [vmem:[%s7133_s21 + $0x88] sm:$0xf] }
  0xee   : > { %6485 = vmatpush3.bf16.msra.mxu1 %v6863_v3  ;;  %v3751_v3 = vshll.u32 %v5761_v51, 16  ;;  %v3738_v9 = vor.u32 %v3737_v61, %v3734_v60  ;;  %v3748_v24 = vor.u32 %v3747_v12, %v3743_v16  ;;  %v5621_v44 = vcombine.low %v2664_v25, %v2667_v35  ;;  %v5582_v62 = vld [vmem:[%s7133_s21 + $0x8c] sm:$0x1]  ;;  %v5765_v6 = vld [vmem:[%s7133_s21 + $0x54] sm:$0xf] }
  0xef   : > { %6486 = vmatprep.subr.bf16.mxu1 %v6865_v37  ;;  %v3758_v1 = vrot.slane %v3756_v33, 4  ;;  %v3761_v45 = vrot.slane %v3759_v34, 5  ;;  %v2674_v48 = vsel %vm7160_vm4, %v2672_v38, %v2673_v31  ;;  %v3769_v49 = vshrl.u32 %v5763_v29, 16  ;;  %v5767_v12 = vld [vmem:[%s7133_s21 + $0x5c] sm:$0x1]  ;;  %v6864_v31 = vld [vmem:[%s7133_s21 + $0x48] sm:$0xff]  }
  0xf0   : > { %v3753_v14 = vrot.slane %v3751_v3, 5  ;;  %v3739_v20 = vrot.slane %v3738_v9, 4  ;;  %v3749_v10 = vrot.slane %v3748_v24, 4  ;;  %v3775_v50 = vshll.u32 %v5764_v32, 16  ;;  %v5583_v7 = vld [vmem:[%s7133_s21 + $0x90] sm:$0xe] }
  0xf1   : > { %6455 = vmatmul.mubr.bf16.gmra.mrb[88].mxu1 %v5619_v27  ;;  %v3762_v53 = vor.u32 %v3761_v45, %v3758_v1  ;;  %v3767_v54 = vrot.slane %v3765_v22, 5  ;;  %v5607_v56 = vrot.slane %v5577_v39, 9  ;;  %v2677_v58 = vrot.slane %v5578_v41, 5  ;;  %v5584_v28 = vld [vmem:[%s7133_s21 + $0x94] sm:$0xf] }
  0xf2   : > { %6487 = vmatpush3.bf16.msra.mxu1 %v6865_v37  ;;  %6458 = vmatprep.mubr.bf16.mxu1 %v5620_v8  ;;  %v3744_v30 = vsel %vm7167_vm5, %v3739_v20, %v3743_v16  ;;  %v2671_v37 = vsel %vm7160_vm4, %v5606_v23, %v2670_v26  ;;  %v3777_v4 = vrot.slane %v3775_v50, 5  ;;  %v2680_v61 = vrot.slane %v5579_v46, 5  ;;  %v5766_v8 = vld [vmem:[%s7133_s21 + $0x58] sm:$0xf]  ;;  %v5587_v22 = vld [vmem:[%s7133_s21 + $0xa0] sm:$0xf] }
  0xf3   : > { %6488 = vmatprep.subr.bf16.mxu1 %v6867_v13  ;;  %4733 = vmatmul.mubr.bf16.gmra.mrb[88].mxu0 %v6860_v55  ;;  %v5622_v52 = vcombine.low %v2671_v37, %v2674_v48  ;;  %v3771_v55 = vrot.slane %v3769_v49, 4  ;;  %v3763_v60 = vrot.slane %v3762_v53, 4  ;;  %v2678_v2 = vsel %vm7160_vm4, %v5607_v56, %v2677_v58  ;;  %v5585_v29 = vld [vmem:[%s7133_s21 + $0x98] sm:$0x1]  ;;  %v5588_v46 = vld [vmem:[%s7133_s21 + $0xa4] sm:$0x1] }
  0xf4   : > { %v2679_v3 = vrot.slane %v2677_v58, 4  ;;  %v5608_v5 = vrot.slane %v5580_v59, 9  ;;  %v2684_v16 = vrot.slane %v5581_v57, 5  ;;  %v3783_v20 = vshll.u32 %v5765_v6, 16  ;;  %v5589_v57 = vld [vmem:[%s7133_s21 + $0xa8] sm:$0xe] }
  0xf5   : > { %v3772_v0 = vor.u32 %v3771_v55, %v3767_v54  ;;  %v3768_v9 = vsel %vm7167_vm5, %v3763_v60, %v3767_v54  ;;  %v3789_v21 = vshll.u32 %v5766_v8, 16  ;;  %v3793_v34 = vshrl.u32 %v5766_v8, 16  ;;  %v5770_v55 = vld [vmem:[%s7133_s21 + $0x68] sm:$0x1]  ;;  %v6866_v60 = vld [vmem:[%s7133_s21 + $0x54] sm:$0xff]  }
  0xf6   : > { %6489 = vmatpush3.bf16.msra.mxu1 %v6867_v13  ;;  %v3754_v13 = vsel %vm7167_vm5, %v3749_v10, %v3753_v14  ;;  %v3780_v14 = vshrl.u32 %v5765_v6, 16  ;;  %v2681_v18 = vsel %vm7160_vm4, %v2679_v3, %v2680_v61  ;;  %v2685_v25 = vsel %vm7160_vm4, %v5608_v5, %v2684_v16  ;;  %v5591_v6 = vld [vmem:[%s7133_s21 + $0xb0] sm:$0x1] }
  0xf7   : > { %6490 = vmatprep.subr.bf16.mxu1 %v6869_v11  ;;  %v5801_v51 = vcombine.low %v3744_v30, %v3754_v13  ;;  %v3773_v17 = vrot.slane %v3772_v0, 4  ;;  %v5623_v24 = vcombine.low %v2678_v2, %v2681_v18  ;;  %v2686_v19 = vrot.slane %v2684_v16, 4 }
  0xf8   : > { %v3782_v26 = vrot.slane %v3780_v14, 4  ;;  %v3785_v32 = vrot.slane %v3783_v20, 5  ;;  %v3791_v33 = vrot.slane %v3789_v21, 5  ;;  %v5609_v37 = vrot.slane %v5583_v7, 9 }
  0xf9   : > { %6459 = vmatmul.mubr.bf16.gmra.mrb[92].mxu1 %v5621_v44  ;;  %4740 = vmatprep.mubr.bf16.mxu0 %v5801_v51  ;;  %v3778_v30 = vsel %vm7167_vm5, %v3773_v17, %v3777_v4  ;;  %v3795_v41 = vrot.slane %v3793_v34, 4  ;;  %v5586_v44 = vld [vmem:[%s7133_s21 + $0x9c] sm:$0xe]  ;;  %v2694_v45 = vrot.slane %v5585_v29, 5  ;;  %v5768_v51 = vld [vmem:[%s7133_s21 + $0x60] sm:$0xf] }
  0xfa   : > { %6491 = vmatpush3.bf16.msra.mxu1 %v6869_v11  ;;  %6462 = vmatprep.mubr.bf16.mxu1 %v5622_v52  ;;  %v2687_v11 = vrot.slane %v5582_v62, 5  ;;  %v5802_v10 = vcombine.low %v3768_v9, %v3778_v30  ;;  %v3786_v39 = vor.u32 %v3785_v32, %v3782_v26  ;;  %v5769_v52 = vld [vmem:[%s7133_s21 + $0x64] sm:$0xf]  ;;  %v5610_v53 = vrot.slane %v5586_v44, 9  ;;  %v5590_v62 = vld [vmem:[%s7133_s21 + $0xac] sm:$0xf] }
  0xfb   : > { %4741 = vmatmul.mubr.bf16.gmra.mrb[92].mxu0 %v6862_v36  ;;  %6492 = vmatprep.subr.bf16.mxu1 %v6871_v43  ;;  %v3799_v36 = vshll.u32 %v5767_v12, 16  ;;  %v3796_v48 = vor.u32 %v3795_v41, %v3791_v33  ;;  %v2698_v54 = vrot.slane %v5587_v22, 5  ;;  %v3804_v4 = vshrl.u32 %v5768_v51, 16  ;;  %v5594_v29 = vld [vmem:[%s7133_s21 + $0xbc] sm:$0x1] }
  0xfc   : > { %v2688_v35 = vsel %vm7160_vm4, %v2686_v19, %v2687_v11  ;;  %4748 = vmatprep.mubr.bf16.mxu0 %v5802_v10  ;;  %v3787_v13 = vrot.slane %v3786_v39, 4  ;;  %v3807_v61 = vshll.u32 %v5768_v51, 16  ;;  %v3813_v16 = vshll.u32 %v5769_v52, 16  ;;  %v5771_v10 = vld [vmem:[%s7133_s21 + $0x6c] sm:$0xf] }
  0xfd   : > { %v5624_v38 = vcombine.low %v2685_v25, %v2688_v35  ;;  %v3801_v1 = vrot.slane %v3799_v36, 5  ;;  %v3797_v58 = vrot.slane %v3796_v48, 4  ;;  %v2699_v2 = vsel %vm7160_vm4, %v5610_v53, %v2698_v54  ;;  %v5593_v25 = vld [vmem:[%s7133_s21 + $0xb8] sm:$0xf]  ;;  %v5773_v39 = vld [vmem:[%s7133_s21 + $0x74] sm:$0x1] }
  0xfe   : > { %6493 = vmatpush3.bf16.msra.mxu1 %v6871_v43  ;;  %v2691_v43 = vrot.slane %v5584_v28, 5  ;;  %v3792_v56 = vsel %vm7167_vm5, %v3787_v13, %v3791_v33  ;;  %v2700_v3 = vrot.slane %v2698_v54, 4  ;;  %v3806_v5 = vrot.slane %v3804_v4, 4  ;;  %v5595_v13 = vld [vmem:[%s7133_s21 + $0xc0] sm:$0xe] }
  0xff   : > { %v3802_v8 = vsel %vm7167_vm5, %v3797_v58, %v3801_v1  ;;  %v3809_v9 = vrot.slane %v3807_v61, 5  ;;  %v3817_v11 = vshrl.u32 %v5769_v52, 16  ;;  %v3823_v17 = vshll.u32 %v5770_v55, 16  ;;  %v5596_v48 = vld [vmem:[%s7133_s21 + $0xc4] sm:$0xf] }
 0x100   : > { %v2692_v49 = vsel %vm7160_vm4, %v5609_v37, %v2691_v43  ;;  %v2693_v50 = vrot.slane %v2691_v43, 4  ;;  %v5803_v14 = vcombine.low %v3792_v56, %v3802_v8  ;;  %v5611_v18 = vrot.slane %v5589_v57, 9  ;;  %v5597_v53 = vld [vmem:[%s7133_s21 + $0xc8] sm:$0x1] }
 0x101   : > { %6463 = vmatmul.mubr.bf16.gmra.mrb[0].mxu1 %v5623_v24  ;;  %v3810_v21 = vor.u32 %v3809_v9, %v3806_v5  ;;  %v3815_v7 = vrot.slane %v3813_v16, 5  ;;  %v5592_v24 = vld [vmem:[%s7133_s21 + $0xb4] sm:$0xe]  ;;  %v3825_v19 = vrot.slane %v3823_v17, 5  ;;  %v2705_v26 = vrot.slane %v5590_v62, 5 }
 0x102   : > { %6466 = vmatprep.mubr.bf16.mxu1 %v5624_v38  ;;  %v2695_v59 = vsel %vm7160_vm4, %v2693_v50, %v2694_v45  ;;  %v2708_v28 = vrot.slane %v5591_v6, 5  ;;  %v5612_v30 = vrot.slane %v5592_v24, 9  ;;  %v2712_v33 = vrot.slane %v5593_v25, 5  ;;  %v5772_v38 = vld [vmem:[%s7133_s21 + $0x70] sm:$0xf]  ;;  %v6868_v45 = vld [vmem:[%s7133_s21 + $0x60] sm:$0xff]  }
 0x103   : > { %4749 = vmatmul.mubr.bf16.gmra.mrb[96].mxu0 %v6864_v31  ;;  %v5625_v0 = vcombine.low %v2692_v49, %v2695_v59  ;;  %v3811_v31 = vrot.slane %v3810_v21, 4  ;;  %v2715_v34 = vrot.slane %v5594_v29, 5  ;;  %v2706_v36 = vsel %vm7160_vm4, %v5611_v18, %v2705_v26  ;;  %v5774_v5 = vld [vmem:[%s7133_s21 + $0x78] sm:$0xf]  ;;  %v5775_v16 = vld [vmem:[%s7133_s21 + $0x7c] sm:$0xf] }
 0x104   : > { %4756 = vmatprep.mubr.bf16.mxu0 %v5803_v14  ;;  %v2707_v37 = vrot.slane %v2705_v26, 4  ;;  %v3828_v41 = vshrl.u32 %v5771_v10, 16  ;;  %v2713_v22 = vsel %vm7160_vm4, %v5612_v30, %v2712_v33  ;;  %v3831_v51 = vshll.u32 %v5771_v10, 16  ;;  %v5815_v21 = vld [vmem:[%s7133_s21 + $0x1c] sm:$0xf]  ;;  %v6870_v29 = vld [vmem:[%s7133_s21 + $0x6c] sm:$0xff]  }
 0x105   : > { %v3816_v44 = vsel %vm7167_vm5, %v3811_v31, %v3815_v7  ;;  %v3837_v52 = vshll.u32 %v5772_v38, 16  ;;  %v3841_v56 = vshrl.u32 %v5772_v38, 16  ;;  %v2722_v8 = vrot.slane %v5597_v53, 5 }
 0x106   : > { %v2709_v49 = vsel %vm7160_vm4, %v2707_v37, %v2708_v28  ;;  %v3830_v50 = vrot.slane %v3828_v41, 4  ;;  %v3833_v61 = vrot.slane %v3831_v51, 5  ;;  %v3855_v24 = vshll.u32 %v5774_v5, 16 }
 0x107   : > { %v5627_v55 = vcombine.low %v2706_v36, %v2709_v49  ;;  %v3839_v57 = vrot.slane %v3837_v52, 5  ;;  %v3843_v62 = vrot.slane %v3841_v56, 4  ;;  %v3861_v25 = vshll.u32 %v5775_v16, 16  ;;  %v5817_v36 = vld [vmem:[%s7133_s21 + $0x24] sm:$0xe] }
 0x108   : > { %v3834_v6 = vor.u32 %v3833_v61, %v3830_v50  ;;  %v3865_v30 = vshrl.u32 %v5775_v16, 16  ;;  %v3857_v10 = vrot.slane %v3855_v24, 5  ;;  %v5863_v51 = vrot.slane %v5817_v36, 9 }
 0x109   : > { %6467 = vmatmul.mubr.bf16.gmra.mrb[4].mxu1 %v5625_v0  ;;  %v3847_v0 = vshll.u32 %v5773_v39, 16  ;;  %v3844_v14 = vor.u32 %v3843_v62, %v3839_v57 }
 0x10a   : > { %v3867_v38 = vrot.slane %v3865_v30, 4 }
 0x10b   : > { %v5990_v47 = vpop.f32.mrb[0].mxu0  ;;  %4757 = vmatmul.mubr.bf16.gmra.mrb[100].mxu0 %v6866_v60  ;;  %v3845_v26 = vrot.slane %v3844_v14, 4 }
 0x10c   : > { %v5991_v27 = vpop.f32.mrb[1].mxu0 }
 0x10d   : > { %v7802_v63 = vadd.f32 %v5991_v27, %v5990_v47  ;;  %v5993_v15 = vpop.f32.mrb[2].mxu0  ;;  %v2701_v27 = vrot.slane %v5588_v46, 5  ;;  %v2714_v46 = vrot.slane %v2712_v33, 4 }
 0x10e   : > { %v5994_v23 = vpop.f32.mrb[3].mxu0 }
 0x10f   : > { %v7826_v47 = vadd.f32 %v5994_v23, %v5993_v15  ;;  %v2702_v15 = vsel %vm7160_vm4, %v2700_v3, %v2701_v27  ;;  %v3819_v23 = vrot.slane %v3817_v11, 4  ;;  %v2716_v4 = vsel %vm7160_vm4, %v2714_v46, %v2715_v34  ;;  %v5776_v11 = vld [vmem:[%s7133_s21 + $0x80] sm:$0x1] }
 0x110   : > { %v5626_v20 = vcombine.low %v2699_v2, %v2702_v15  ;;  %v5628_v60 = vcombine.low %v2713_v22, %v2716_v4  ;;  %v5613_v2 = vrot.slane %v5595_v13, 9  ;;  %v2719_v3 = vrot.slane %v5596_v48, 5  ;;  %v5819_v48 = vld [vmem:[%s7133_s21 + $0x2c] sm:$0x1] }
 0x111   : > { %v3820_v32 = vor.u32 %v3819_v23, %v3815_v7  ;;  %v3849_v15 = vrot.slane %v3847_v0, 5  ;;  %v3835_v7 = vrot.slane %v3834_v6, 4  ;;  %v3871_v31 = vshll.u32 %v5776_v11, 16  ;;  %v5822_v11 = vld [vmem:[%s7133_s21 + $0x38] sm:$0x1] }
 0x112   : > { %6470 = vmatprep.mubr.bf16.mxu1 %v5626_v20  ;;  %v2720_v17 = vsel %vm7160_vm4, %v5613_v2, %v2719_v3  ;;  %v2721_v18 = vrot.slane %v2719_v3, 4  ;;  %v5814_v20 = vld [vmem:[%s7133_s21 + $0x18] sm:$0xe]  ;;  %v4221_v46 = vrot.slane %v5815_v21, 5  ;;  %v4231_v53 = vrot.slane %v5819_v48, 5 }
 0x113   : > { %v5996_v12 = vpop.f32.mrb[4].mxu0  ;;  %v3821_v1 = vrot.slane %v3820_v32, 4  ;;  %6471 = vmatmul.mubr.bf16.gmra.mrb[8].mxu1 %v5627_v55  ;;  %v3840_v33 = vsel %vm7167_vm5, %v3835_v7, %v3839_v57  ;;  %v3850_v37 = vsel %vm7167_vm5, %v3845_v26, %v3849_v15  ;;  %v3873_v39 = vrot.slane %v3871_v31, 5  ;;  %v5820_v2 = vld [vmem:[%s7133_s21 + $0x30] sm:$0xe]  ;;  %v6872_v26 = vld [vmem:[%s7133_s21 + $0x78] sm:$0xff]  }
 0x114   : > { %v5997_v35 = vpop.f32.mrb[5].mxu0  ;;  %6474 = vmatprep.mubr.bf16.mxu1 %v5628_v60  ;;  %v2723_v28 = vsel %vm7160_vm4, %v2721_v18, %v2722_v8  ;;  %v5862_v41 = vrot.slane %v5814_v20, 9  ;;  %v4223_v56 = vrot.slane %v4221_v46, 4  ;;  %v5779_v60 = vld [vmem:[%s7133_s21 + $0x8c] sm:$0x1]  ;;  %v5864_v31 = vrot.slane %v5820_v2, 9 }
 0x115   : > { %v7855_v43 = vadd.f32 %v5997_v35, %v5996_v12  ;;  %v5999_v54 = vpop.f32.mrb[6].mxu0  ;;  %v3826_v27 = vsel %vm7167_vm5, %v3821_v1, %v3825_v19  ;;  %v3852_v12 = vshrl.u32 %v5774_v5, 16  ;;  %v5816_v19 = vld [vmem:[%s7133_s21 + $0x20] sm:$0x1]  ;;  %v5629_v34 = vcombine.low %v2720_v17, %v2723_v28  ;;  %v5821_v3 = vld [vmem:[%s7133_s21 + $0x34] sm:$0xf] }
 0x116   : > { %v6000_v58 = vpop.f32.mrb[7].mxu0  ;;  %v5804_v59 = vcombine.low %v3816_v44, %v3826_v27  ;;  %v3863_v35 = vrot.slane %v3861_v25, 5  ;;  %v5818_v44 = vld [vmem:[%s7133_s21 + $0x28] sm:$0xf]  ;;  %v4224_v13 = vrot.slane %v5816_v19, 5  ;;  %v4222_v4 = vsel %vm7160_vm4, %v5862_v41, %v4221_v46 }
 0x117   : > { %v7872_v9 = vadd.f32 %v6000_v58, %v5999_v54  ;;  %v3854_v23 = vrot.slane %v3852_v12, 4  ;;  %v4228_v52 = vrot.slane %v5818_v44, 5  ;;  %v5777_v27 = vld [vmem:[%s7133_s21 + $0x84] sm:$0xf]  ;;  %v5823_v18 = vld [vmem:[%s7133_s21 + $0x3c] sm:$0xe] }
 0x118   : > { %4764 = vmatprep.mubr.bf16.mxu0 %v5804_v59  ;;  %v3868_v50 = vor.u32 %v3867_v38, %v3863_v35  ;;  %v5778_v59 = vld [vmem:[%s7133_s21 + $0x88] sm:$0xf]  ;;  %v4225_v6 = vsel %vm7160_vm4, %v4223_v56, %v4224_v13  ;;  %v3876_v8 = vshrl.u32 %v5777_v27, 16  ;;  %v3879_v16 = vshll.u32 %v5777_v27, 16  ;;  %v5824_v25 = vld [vmem:[%s7133_s21 + $0x40] sm:$0xf] }
 0x119   : > { %4765 = vmatmul.mubr.bf16.gmra.mrb[104].mxu0 %v6868_v45  ;;  %v5805_v45 = vcombine.low %v3840_v33, %v3850_v37  ;;  %v3858_v22 = vor.u32 %v3857_v10, %v3854_v23  ;;  %v4229_v57 = vsel %vm7160_vm4, %v5863_v51, %v4228_v52  ;;  %v4230_v62 = vrot.slane %v4228_v52, 4  ;;  %v5825_v19 = vld [vmem:[%s7133_s21 + $0x44] sm:$0x1]  ;;  %v5780_v37 = vld [vmem:[%s7133_s21 + $0x90] sm:$0xf] }
 0x11a   : > { %v3869_v61 = vrot.slane %v3868_v50, 4  ;;  %v5878_v14 = vcombine.low %v4222_v4, %v4225_v6  ;;  %v3885_v17 = vshll.u32 %v5778_v59, 16  ;;  %v3878_v23 = vrot.slane %v3876_v8, 4  ;;  %v5781_v48 = vld [vmem:[%s7133_s21 + $0x94] sm:$0xf]  ;;  %v6873_v2 = vld [vmem:[%s7133_s21 + $0x84] sm:$0xff]  }
 0x11b   : > { %6475 = vmatmul.mubr.bf16.gmra.mrb[12].mxu1 %v5629_v34  ;;  %4772 = vmatprep.mubr.bf16.mxu0 %v5805_v45  ;;  %v3859_v55 = vrot.slane %v3858_v22, 4  ;;  %v4232_v15 = vsel %vm7160_vm4, %v4230_v62, %v4231_v53  ;;  %v3881_v24 = vrot.slane %v3879_v16, 5  ;;  %v3895_v30 = vshll.u32 %v5779_v60, 16  ;;  %v5827_v27 = vld [vmem:[%s7133_s21 + $0x4c] sm:$0xf] }
 0x11c   : > { %v3874_v12 = vsel %vm7167_vm5, %v3869_v61, %v3873_v39  ;;  %v5879_v7 = vcombine.low %v4229_v57, %v4232_v15  ;;  %6494 = vmatprep.mubr.bf16.mxu1 %v5878_v14  ;;  %v3887_v28 = vrot.slane %v3885_v17, 5  ;;  %v4235_v34 = vrot.slane %v5821_v3, 5  ;;  %v5828_v61 = vld [vmem:[%s7133_s21 + $0x50] sm:$0x1]  ;;  %v5829_v6 = vld [vmem:[%s7133_s21 + $0x54] sm:$0xe] }
 0x11d   : > { %v3864_v5 = vsel %vm7167_vm5, %v3859_v55, %v3863_v35  ;;  %v3882_v33 = vor.u32 %v3881_v24, %v3878_v23  ;;  %v4238_v10 = vrot.slane %v5822_v11, 5  ;;  %v5865_v35 = vrot.slane %v5823_v18, 9  ;;  %v5830_v14 = vld [vmem:[%s7133_s21 + $0x58] sm:$0xf] }
 0x11e   : > { %v6002_v32 = vpop.f32.mrb[8].mxu0  ;;  %v5806_v21 = vcombine.low %v3864_v5, %v3874_v12  ;;  %v3897_v39 = vrot.slane %v3895_v30, 5  ;;  %v4242_v41 = vrot.slane %v5824_v25, 5  ;;  %v4245_v44 = vrot.slane %v5825_v19, 5  ;;  %v5783_v30 = vld [vmem:[%s7133_s21 + $0x9c] sm:$0xf] }
 0x11f   : > { %v6003_v1 = vpop.f32.mrb[9].mxu0  ;;  %v3883_v45 = vrot.slane %v3882_v33, 4  ;;  %v4236_v22 = vsel %vm7160_vm4, %v5864_v31, %v4235_v34  ;;  %v4237_v46 = vrot.slane %v4235_v34, 4  ;;  %v3903_v60 = vshll.u32 %v5780_v37, 16 }
 0x120   : > { %v6005_v49 = vpop.f32.mrb[10].mxu0  ;;  %v7894_v58 = vadd.f32 %v6003_v1, %v6002_v32  ;;  %v4243_v51 = vsel %vm7160_vm4, %v5865_v35, %v4242_v41  ;;  %v4244_v52 = vrot.slane %v4242_v41, 4  ;;  %v3909_v5 = vshll.u32 %v5781_v48, 16 }
 0x121   : > { %v6006_v54 = vpop.f32.mrb[11].mxu0  ;;  %4773 = vmatmul.mubr.bf16.gmra.mrb[108].mxu0 %v6870_v29  ;;  %v3889_v29 = vshrl.u32 %v5778_v59, 16  ;;  %v3888_v4 = vsel %vm7167_vm5, %v3883_v45, %v3887_v28  ;;  %v4239_v56 = vsel %vm7160_vm4, %v4237_v46, %v4238_v10  ;;  %v3900_v59 = vshrl.u32 %v5780_v37, 16 }
 0x122   : > { %v7900_v0 = vadd.f32 %v6006_v54, %v6005_v49  ;;  %4780 = vmatprep.mubr.bf16.mxu0 %v5806_v21  ;;  %v5782_v49 = vld [vmem:[%s7133_s21 + $0x98] sm:$0x1]  ;;  %v5826_v54 = vld [vmem:[%s7133_s21 + $0x48] sm:$0xe]  ;;  %v5880_v62 = vcombine.low %v4236_v22, %v4239_v56  ;;  %v4246_v3 = vsel %vm7160_vm4, %v4244_v52, %v4245_v44  ;;  %v3905_v11 = vrot.slane %v3903_v60, 5 }
 0x123   : > { %6495 = vmatmul.mubr.bf16.vlgmr.msra.gmra.mrb[80].mxu1 %v5879_v7  ;;  %v3891_v38 = vrot.slane %v3889_v29, 4  ;;  %v5881_v8 = vcombine.low %v4243_v51, %v4246_v3  ;;  %v3902_v16 = vrot.slane %v3900_v59, 4  ;;  %v3913_v12 = vshrl.u32 %v5781_v48, 16  ;;  %v5831_v7 = vld [vmem:[%s7133_s21 + $0x5c] sm:$0x1] }
 0x124   : > { %6498 = vmatprep.mubr.bf16.mxu1 %v5880_v62  ;;  %v3911_v18 = vrot.slane %v3909_v5, 5  ;;  %v5866_v21 = vrot.slane %v5826_v54, 9  ;;  %v5867_v33 = vrot.slane %v5829_v6, 9  ;;  %v4256_v34 = vrot.slane %v5830_v14, 5  ;;  %v5784_v44 = vld [vmem:[%s7133_s21 + $0xa0] sm:$0xf] }
 0x125   : > { %v3892_v50 = vor.u32 %v3891_v38, %v3887_v28  ;;  %v3906_v25 = vor.u32 %v3905_v11, %v3902_v16  ;;  %v3915_v19 = vrot.slane %v3913_v12, 4  ;;  %v4259_v46 = vrot.slane %v5831_v7, 5  ;;  %v5834_v56 = vld [vmem:[%s7133_s21 + $0x68] sm:$0x1]  ;;  %v5835_v16 = vld [vmem:[%s7133_s21 + $0x6c] sm:$0xe] }
 0x126   : > { %v4257_v45 = vsel %vm7160_vm4, %v5867_v33, %v4256_v34  ;;  %v4258_v22 = vrot.slane %v4256_v34, 4  ;;  %v3924_v62 = vshrl.u32 %v5783_v30, 16  ;;  %v3927_v6 = vshll.u32 %v5783_v30, 16  ;;  %v5836_v11 = vld [vmem:[%s7133_s21 + $0x70] sm:$0xf] }
 0x127   : > { %v3893_v57 = vrot.slane %v3892_v50, 4  ;;  %v3916_v37 = vor.u32 %v3915_v19, %v3911_v18  ;;  %v5832_v50 = vld [vmem:[%s7133_s21 + $0x60] sm:$0xe] }
 0x128   : > { %v3926_v14 = vrot.slane %v3924_v62, 4 }
 0x129   : > { %v6008_v20 = vpop.f32.mrb[12].mxu0  ;;  %4781 = vmatmul.mubr.bf16.gmra.mrb[112].mxu0 %v6872_v26  ;;  %v3898_v17 = vsel %vm7167_vm5, %v3893_v57, %v3897_v39  ;;  %v4249_v26 = vrot.slane %v5827_v27, 5  ;;  %v3917_v52 = vrot.slane %v3916_v37, 4 }
 0x12a   : > { %v6009_v32 = vpop.f32.mrb[13].mxu0  ;;  %v5807_v24 = vcombine.low %v3888_v4, %v3898_v17  ;;  %v5833_v4 = vld [vmem:[%s7133_s21 + $0x64] sm:$0xf] }
 0x12b   : > { %v6011_v36 = vpop.f32.mrb[14].mxu0  ;;  %v7920_v13 = vadd.f32 %v6009_v32, %v6008_v20  ;;  %v3919_v20 = vshll.u32 %v5782_v49, 16  ;;  %6499 = vmatmul.mubr.bf16.gmra.mrb[84].mxu1 %v5881_v8  ;;  %v4252_v32 = vrot.slane %v5828_v61, 5  ;;  %v4250_v38 = vsel %vm7160_vm4, %v5866_v21, %v4249_v26  ;;  %v5785_v49 = vld [vmem:[%s7133_s21 + $0xa4] sm:$0x1]  ;;  %v6874_v61 = vld [vmem:[%s7133_s21 + $0x90] sm:$0xff]  }
 0x12c   : > { %v6012_v1 = vpop.f32.mrb[15].mxu0  ;;  %4788 = vmatprep.mubr.bf16.mxu0 %v5807_v24  ;;  %v4251_v39 = vrot.slane %v4249_v26, 4  ;;  %v3933_v8 = vshll.u32 %v5784_v44, 16  ;;  %v3943_v17 = vshll.u32 %v5785_v49, 16  ;;  %v3929_v21 = vrot.slane %v3927_v6, 5 }
 0x12d   : > { %v7926_v53 = vadd.f32 %v6012_v1, %v6011_v36  ;;  %v3921_v31 = vrot.slane %v3919_v20, 5  ;;  %v3907_v36 = vrot.slane %v3906_v25, 4  ;;  %v4263_v24 = vrot.slane %v5833_v4, 5 }
 0x12e   : > { %v4253_v54 = vsel %vm7160_vm4, %v4251_v39, %v4252_v32  ;;  %v3935_v7 = vrot.slane %v3933_v8, 5  ;;  %v3930_v32 = vor.u32 %v3929_v21, %v3926_v14 }
 0x12f   : > { %v3912_v51 = vsel %vm7167_vm5, %v3907_v36, %v3911_v18  ;;  %v5882_v60 = vcombine.low %v4250_v38, %v4253_v54  ;;  %v3922_v3 = vsel %vm7167_vm5, %v3917_v52, %v3921_v31  ;;  %v5837_v18 = vld [vmem:[%s7133_s21 + $0x74] sm:$0x1]  ;;  %v4265_v34 = vrot.slane %v4263_v24, 4  ;;  %v5786_v36 = vld [vmem:[%s7133_s21 + $0xa8] sm:$0xf] }
 0x130   : > { %v5808_v12 = vcombine.low %v3912_v51, %v3922_v3  ;;  %v4270_v38 = vrot.slane %v5836_v11, 5  ;;  %v4273_v39 = vrot.slane %v5837_v18, 5  ;;  %v5838_v51 = vld [vmem:[%s7133_s21 + $0x78] sm:$0xe]  ;;  %v3951_v62 = vshll.u32 %v5786_v36, 16 }
 0x131   : > { %v6014_v55 = vpop.f32.mrb[16].mxu0  ;;  %4789 = vmatmul.mubr.bf16.gmra.mrb[116].mxu0 %v6873_v2  ;;  %6502 = vmatprep.mubr.bf16.mxu1 %v5882_v60  ;;  %v5840_v60 = vld [vmem:[%s7133_s21 + $0x80] sm:$0x1]  ;;  %v5841_v3 = vld [vmem:[%s7133_s21 + $0x84] sm:$0xe] }
 0x132   : > { %v6015_v15 = vpop.f32.mrb[17].mxu0  ;;  %4796 = vmatprep.mubr.bf16.mxu0 %v5808_v12  ;;  %v5842_v12 = vld [vmem:[%s7133_s21 + $0x88] sm:$0xf]  ;;  %v3953_v21 = vrot.slane %v3951_v62, 5 }
 0x133   : > { %v6017_v23 = vpop.f32.mrb[18].mxu0  ;;  %v7951_v48 = vadd.f32 %v6015_v15, %v6014_v55  ;;  %v4260_v55 = vsel %vm7160_vm4, %v4258_v22, %v4259_v46  ;;  %v3937_v15 = vshrl.u32 %v5784_v44, 16  ;;  %v3931_v22 = vrot.slane %v3930_v32, 4 }
 0x134   : > { %v6126_v28 = vpop.f32.mrb[16].mxu1  ;;  %v6018_v29 = vpop.f32.mrb[19].mxu0  ;;  %v5883_v5 = vcombine.low %v4257_v45, %v4260_v55  ;;  %v5788_v45 = vld [vmem:[%s7133_s21 + $0xb0] sm:$0x1]  ;;  %v3948_v55 = vshrl.u32 %v5786_v36, 16 }
 0x135   : > { %v6127_v10 = vpop.f32.mrb[17].mxu1  ;;  %v7959_v27 = vadd.f32 %v6018_v29, %v6017_v23  ;;  %v5868_v23 = vrot.slane %v5832_v50, 9  ;;  %v3939_v26 = vrot.slane %v3937_v15, 4  ;;  %v4266_v29 = vrot.slane %v5834_v56, 5  ;;  %v6875_v56 = vld [vmem:[%s7133_s21 + $0x9c] sm:$0xff]  }
 0x136   : > { %v6129_v41 = vpop.f32.mrb[18].mxu1  ;;  %v7966_v57 = vadd.f32 %v6127_v10, %v6126_v28  ;;  %6503 = vmatmul.mubr.bf16.gmra.mrb[88].mxu1 %v5883_v5  ;;  %v3945_v28 = vrot.slane %v3943_v17, 5  ;;  %v5869_v10 = vrot.slane %v5835_v16, 9  ;;  %v3967_v11 = vshll.u32 %v5788_v45, 16 }
 0x137   : > { %v6130_v59 = vpop.f32.mrb[19].mxu1  ;;  %v4264_v33 = vsel %vm7160_vm4, %v5868_v23, %v4263_v24  ;;  %v3940_v37 = vor.u32 %v3939_v26, %v3935_v7  ;;  %v4267_v46 = vsel %vm7160_vm4, %v4265_v34, %v4266_v29 }
 0x138   : > { %v7973_v30 = vadd.f32 %v6130_v59, %v6129_v41  ;;  %v5787_v41 = vld [vmem:[%s7133_s21 + $0xac] sm:$0xf]  ;;  %v5884_v4 = vcombine.low %v4264_v33, %v4267_v46  ;;  %v5839_v59 = vld [vmem:[%s7133_s21 + $0x7c] sm:$0xf]  ;;  %v3969_v26 = vrot.slane %v3967_v11, 5 }
 0x139   : > { %v7944_v35 = vpop.f32.mrb[20].mxu0  ;;  %4797 = vmatmul.mubr.bf16.gmra.mrb[120].mxu0 %v6874_v61  ;;  %v3941_v54 = vrot.slane %v3940_v37, 4  ;;  %v3936_v61 = vsel %vm7167_vm5, %v3931_v22, %v3935_v7  ;;  %v3961_v16 = vshrl.u32 %v5787_v41, 16  ;;  %v5843_v7 = vld [vmem:[%s7133_s21 + $0x8c] sm:$0x1]  ;;  %v4277_v34 = vrot.slane %v5839_v59, 5 }
 0x13a   : > { %v6021_v1 = vpop.f32.mrb[21].mxu0  ;;  %6506 = vmatprep.mubr.bf16.mxu1 %v5884_v4  ;;  %v5789_v37 = vld [vmem:[%s7133_s21 + $0xb4] sm:$0xf]  ;;  %v4287_v45 = vrot.slane %v5843_v7, 5  ;;  %v5790_v22 = vld [vmem:[%s7133_s21 + $0xb8] sm:$0xf] }
 0x13b   : > { %v6023_v2 = vpop.f32.mrb[22].mxu0  ;;  %v7979_v44 = vadd.f32 %v6021_v1, %v7944_v35  ;;  %v4271_v35 = vsel %vm7160_vm4, %v5869_v10, %v4270_v38  ;;  %v4272_v1 = vrot.slane %v4270_v38, 4  ;;  %v3946_v6 = vsel %vm7167_vm5, %v3941_v54, %v3945_v28 }
 0x13c   : > { %v6132_v20 = vpop.f32.mrb[20].mxu1  ;;  %v6024_v25 = vpop.f32.mrb[23].mxu0  ;;  %v5809_v17 = vcombine.low %v3936_v61, %v3946_v6  ;;  %v5870_v28 = vrot.slane %v5838_v51, 9  ;;  %v4280_v10 = vrot.slane %v5840_v60, 5  ;;  %v4279_v4 = vrot.slane %v4277_v34, 4 }
 0x13d   : > { %v6133_v19 = vpop.f32.mrb[21].mxu1  ;;  %v7985_v49 = vadd.f32 %v6024_v25, %v6023_v2  ;;  %v3957_v2 = vshll.u32 %v5787_v41, 16  ;;  %v4274_v8 = vsel %vm7160_vm4, %v4272_v1, %v4273_v39  ;;  %v5871_v39 = vrot.slane %v5841_v3, 9  ;;  %v5845_v61 = vld [vmem:[%s7133_s21 + $0x94] sm:$0xf] }
 0x13e   : > { %v6135_v31 = vpop.f32.mrb[22].mxu1  ;;  %v7987_v50 = vadd.f32 %v6133_v19, %v6132_v20  ;;  %v5885_v18 = vcombine.low %v4271_v35, %v4274_v8  ;;  %v3950_v20 = vrot.slane %v3948_v55, 4  ;;  %v3963_v19 = vrot.slane %v3961_v16, 4  ;;  %4804 = vmatprep.mubr.bf16.mxu0 %v5809_v17  ;;  %v5847_v6 = vld [vmem:[%s7133_s21 + $0x9c] sm:$0xe] }
 0x13f   : > { %v6136_v52 = vpop.f32.mrb[23].mxu1  ;;  %v3959_v25 = vrot.slane %v3957_v2, 5  ;;  %v4284_v41 = vrot.slane %v5842_v12, 5  ;;  %v4278_v54 = vsel %vm7160_vm4, %v5870_v28, %v4277_v34  ;;  %v4281_v62 = vsel %vm7160_vm4, %v4279_v4, %v4280_v10  ;;  %v6876_v12 = vld [vmem:[%s7133_s21 + $0xa8] sm:$0xff]  }
 0x140   : > { %6507 = vmatmul.mubr.bf16.gmra.mrb[92].mxu1 %v5885_v18  ;;  %v3954_v33 = vor.u32 %v3953_v21, %v3950_v20  ;;  %v8004_v36 = vadd.f32 %v6136_v52, %v6135_v31  ;;  %v5791_v31 = vld [vmem:[%s7133_s21 + $0xbc] sm:$0x1]  ;;  %v5844_v52 = vld [vmem:[%s7133_s21 + $0x90] sm:$0xe]  ;;  %v3972_v3 = vshrl.u32 %v5789_v37, 16  ;;  %v5886_v11 = vcombine.low %v4278_v54, %v4281_v62 }
 0x141   : > { %v6026_v5 = vpop.f32.mrb[24].mxu0  ;;  %4805 = vmatmul.mubr.bf16.gmra.mrb[124].mxu0 %v6875_v56  ;;  %v3964_v38 = vor.u32 %v3963_v19, %v3959_v25  ;;  %v4285_v1 = vsel %vm7160_vm4, %v5871_v39, %v4284_v41  ;;  %v4286_v59 = vrot.slane %v4284_v41, 4  ;;  %v3975_v17 = vshll.u32 %v5789_v37, 16  ;;  %v5848_v18 = vld [vmem:[%s7133_s21 + $0xa0] sm:$0xf] }
 0x142   : > { %v6027_v14 = vpop.f32.mrb[25].mxu0  ;;  %v3955_v51 = vrot.slane %v3954_v33, 4  ;;  %6510 = vmatprep.mubr.bf16.mxu1 %v5886_v11  ;;  %v3985_v33 = vshrl.u32 %v5790_v22, 16  ;;  %v5872_v34 = vrot.slane %v5844_v52, 9  ;;  %v4291_v39 = vrot.slane %v5845_v61, 5 }
 0x143   : > { %v6029_v23 = vpop.f32.mrb[26].mxu0  ;;  %v8010_v35 = vadd.f32 %v6027_v14, %v6026_v5  ;;  %v3965_v56 = vrot.slane %v3964_v38, 4  ;;  %v5846_v5 = vld [vmem:[%s7133_s21 + $0x98] sm:$0x1]  ;;  %v4288_v14 = vsel %vm7160_vm4, %v4286_v59, %v4287_v45 }
 0x144   : > { %v6138_v15 = vpop.f32.mrb[24].mxu1  ;;  %v6030_v29 = vpop.f32.mrb[27].mxu0  ;;  %v3960_v55 = vsel %vm7167_vm5, %v3955_v51, %v3959_v25  ;;  %v5849_v25 = vld [vmem:[%s7133_s21 + $0xa4] sm:$0x1]  ;;  %v4294_v41 = vrot.slane %v5846_v5, 5  ;;  %v3987_v4 = vrot.slane %v3985_v33, 4  ;;  %v4292_v52 = vsel %vm7160_vm4, %v5872_v34, %v4291_v39 }
 0x145   : > { %v6139_v24 = vpop.f32.mrb[25].mxu1  ;;  %8535 = vst [vmem:[#allocation7_spill] sm:$0xff] %v8010_v35  ;;  %v8016_v60 = vadd.f32 %v6030_v29, %v6029_v23  ;;  %v3970_v16 = vsel %vm7167_vm5, %v3965_v56, %v3969_v26  ;;  %v3974_v23 = vrot.slane %v3972_v3, 4  ;;  %v3977_v29 = vrot.slane %v3975_v17, 5  ;;  %v5793_v5 = vld [vmem:[%s7133_s21 + $0xc4] sm:$0xf] }
 0x146   : > { %v6141_v32 = vpop.f32.mrb[26].mxu1  ;;  %v8023_v2 = vadd.f32 %v6139_v24, %v6138_v15  ;;  %v5810_v7 = vcombine.low %v3960_v55, %v3970_v16  ;;  %v5887_v15 = vcombine.low %v4285_v1, %v4288_v14  ;;  %v3981_v24 = vshll.u32 %v5790_v22, 16  ;;  %v5792_v55 = vld [vmem:[%s7133_s21 + $0xc0] sm:$0xf] }
 0x147   : > { %v6142_v46 = vpop.f32.mrb[27].mxu1  ;;  %8536 = vst [vmem:[#allocation8_spill] sm:$0xff] %v8016_v60  ;;  %v3991_v26 = vshll.u32 %v5791_v31, 16  ;;  %v3978_v54 = vor.u32 %v3977_v29, %v3974_v23  ;;  %v5873_v31 = vrot.slane %v5847_v6, 9  ;;  %v4293_v56 = vrot.slane %v4291_v39, 4  ;;  %v6877_v23 = vld [vmem:[%s7133_s21 + $0xb4] sm:$0xff]  }
 0x148   : > { %4812 = vmatprep.mubr.bf16.mxu0 %v5810_v7  ;;  %6511 = vmatmul.mubr.bf16.gmra.mrb[0].mxu1 %v5887_v15  ;;  %v3983_v37 = vrot.slane %v3981_v24, 5  ;;  %v8036_v45 = vadd.f32 %v6142_v46, %v6141_v32  ;;  %v4298_v1 = vrot.slane %v5848_v18, 5  ;;  %v4301_v59 = vrot.slane %v5849_v25, 5  ;;  %v5794_v6 = vld [vmem:[%s7133_s21 + $0xc8] sm:$0x1] }
 0x149   : > { %v6032_v8 = vpop.f32.mrb[28].mxu0  ;;  %4813 = vmatmul.mubr.bf16.gmra.mrb[128].mxu0 %v6876_v12  ;;  %v3993_v22 = vrot.slane %v3991_v26, 5  ;;  %v3979_v32 = vrot.slane %v3978_v54, 4  ;;  %v4295_v11 = vsel %vm7160_vm4, %v4293_v56, %v4294_v41  ;;  %v5850_v18 = vld [vmem:[%s7133_s21 + $0xa8] sm:$0xe]  ;;  %v3996_v24 = vshrl.u32 %v5792_v55, 16 }
 0x14a   : > { %v6033_v20 = vpop.f32.mrb[29].mxu0  ;;  %v3988_v46 = vor.u32 %v3987_v4, %v3983_v37  ;;  %v4299_v12 = vsel %vm7160_vm4, %v5873_v31, %v4298_v1  ;;  %v4300_v14 = vrot.slane %v4298_v1, 4  ;;  %v5888_v15 = vcombine.low %v4292_v52, %v4295_v11  ;;  %v5851_v25 = vld [vmem:[%s7133_s21 + $0xac] sm:$0xf]  ;;  %v5854_v54 = vld [vmem:[%s7133_s21 + $0xb8] sm:$0xf] }
 0x14b   : > { %v6035_v19 = vpop.f32.mrb[30].mxu0  ;;  %v8043_v62 = vadd.f32 %v6033_v20, %v6032_v8  ;;  %v3984_v20 = vsel %vm7167_vm5, %v3979_v32, %v3983_v37  ;;  %v3999_v33 = vshll.u32 %v5792_v55, 16  ;;  %v4005_v26 = vshll.u32 %v5793_v5, 16  ;;  %v5855_v55 = vld [vmem:[%s7133_s21 + $0xbc] sm:$0x1] }
 0x14c   : > { %v6144_v21 = vpop.f32.mrb[28].mxu1  ;;  %v6036_v10 = vpop.f32.mrb[31].mxu0  ;;  %v3989_v7 = vrot.slane %v3988_v46, 4  ;;  %v4302_v29 = vsel %vm7160_vm4, %v4300_v14, %v4301_v59  ;;  %6514 = vmatprep.mubr.bf16.mxu1 %v5888_v15  ;;  %v3998_v39 = vrot.slane %v3996_v24, 4  ;;  %v4015_v41 = vshll.u32 %v5794_v6, 16 }
 0x14d   : > { %v6145_v28 = vpop.f32.mrb[29].mxu1  ;;  %v8045_v3 = vadd.f32 %v6036_v10, %v6035_v19  ;;  %v5852_v19 = vld [vmem:[%s7133_s21 + $0xb0] sm:$0x1]  ;;  %v5889_v37 = vcombine.low %v4299_v12, %v4302_v29  ;;  %v4001_v56 = vrot.slane %v3999_v33, 5  ;;  %v4007_v1 = vrot.slane %v4005_v26, 5 }
 0x14e   : > { %v8034_v38 = vpop.f32.mrb[30].mxu1  ;;  %v8053_v17 = vadd.f32 %v6145_v28, %v6144_v21  ;;  %v4009_v21 = vshrl.u32 %v5793_v5, 16  ;;  %v5853_v28 = vld [vmem:[%s7133_s21 + $0xb4] sm:$0xe]  ;;  %v3994_v10 = vsel %vm7167_vm5, %v3989_v7, %v3993_v22  ;;  %v4017_v46 = vrot.slane %v4015_v41, 5 }
 0x14f   : > { %v6148_v51 = vpop.f32.mrb[31].mxu1  ;;  %8537 = vst [vmem:[#allocation9_spill] sm:$0xff] %v8045_v3  ;;  %v5811_v52 = vcombine.low %v3984_v20, %v3994_v10  ;;  %v5874_v5 = vrot.slane %v5850_v18, 9  ;;  %v4305_v22 = vrot.slane %v5851_v25, 5  ;;  %v4308_v11 = vrot.slane %v5852_v19, 5 }
 0x150   : > { %v4011_v59 = vrot.slane %v4009_v21, 4  ;;  %6515 = vmatmul.mubr.bf16.gmra.mrb[4].mxu1 %v5889_v37  ;;  %v4002_v6 = vor.u32 %v4001_v56, %v3998_v39  ;;  %v8071_v14 = vadd.f32 %v6148_v51, %v8034_v38  ;;  %v5875_v20 = vrot.slane %v5853_v28, 9  ;;  %v5795_v7 = vld [vmem:[%s7133_s21 + $0xcc] sm:$0xf]  ;;  %v5796_v15 = vld [vmem:[%s7133_s21 + $0xd0] sm:$0xf] }
 0x151   : > { %v8041_v61 = vpop.f32.mrb[32].mxu0  ;;  %4820 = vmatprep.mubr.bf16.mxu0 %v5811_v52  ;;  %v4306_v29 = vsel %vm7160_vm4, %v5874_v5, %v4305_v22  ;;  %v4307_v18 = vrot.slane %v4305_v22, 4  ;;  %v4312_v25 = vrot.slane %v5854_v54, 5  ;;  %v4315_v19 = vrot.slane %v5855_v55, 5  ;;  %v5797_v33 = vld [vmem:[%s7133_s21 + $0xd4] sm:$0x1] }
 0x152   : > { %v6039_v16 = vpop.f32.mrb[33].mxu0  ;;  %v4012_v12 = vor.u32 %v4011_v59, %v4007_v1  ;;  %4821 = vmatmul.mubr.bf16.gmra.mrb[132].mxu0 %v6877_v23  ;;  %v4003_v21 = vrot.slane %v4002_v6, 4  ;;  %v5856_v23 = vld [vmem:[%s7133_s21 + $0xc0] sm:$0xe]  ;;  %v5857_v54 = vld [vmem:[%s7133_s21 + $0xc4] sm:$0xf] }
 0x153   : > { %v6041_v8 = vpop.f32.mrb[34].mxu0  ;;  %v8079_v51 = vadd.f32 %v6039_v16, %v8041_v61  ;;  %v4309_v10 = vsel %vm7160_vm4, %v4307_v18, %v4308_v11  ;;  %v4313_v37 = vsel %vm7160_vm4, %v5875_v20, %v4312_v25  ;;  %v4314_v39 = vrot.slane %v4312_v25, 4  ;;  %v5858_v52 = vld [vmem:[%s7133_s21 + $0xc8] sm:$0x1]  ;;  %v5859_v55 = vld [vmem:[%s7133_s21 + $0xcc] sm:$0xe] }
 0x154   : > { %v6150_v34 = vpop.f32.mrb[32].mxu1  ;;  %v6042_v4 = vpop.f32.mrb[35].mxu0  ;;  %v4013_v38 = vrot.slane %v4012_v12, 4  ;;  %v4008_v61 = vsel %vm7167_vm5, %v4003_v21, %v4007_v1  ;;  %v4020_v59 = vshrl.u32 %v5795_v7, 16  ;;  %v4029_v6 = vshll.u32 %v5796_v15, 16 }
 0x155   : > { %v6151_v31 = vpop.f32.mrb[33].mxu1  ;;  %v8081_v28 = vadd.f32 %v6042_v4, %v6041_v8  ;;  %v5890_v8 = vcombine.low %v4306_v29, %v4309_v10  ;;  %v6878_v4 = vld [vmem:[%s7133_s21 + $0xc0] sm:$0xff]   ;;  %v5860_v12 = vld [vmem:[%s7133_s21 + $0xd0] sm:$0xf]  ;;  %v4039_v29 = vshll.u32 %v5797_v33, 16  ;;  %v5876_v3 = vrot.slane %v5856_v23, 9 }
 0x156   : > { %v8068_v32 = vpop.f32.mrb[34].mxu1  ;;  %v8088_v41 = vadd.f32 %v6151_v31, %v6150_v34  ;;  %v4018_v16 = vsel %vm7167_vm5, %v4013_v38, %v4017_v46  ;;  %v4316_v34 = vsel %vm7160_vm4, %v4314_v39, %v4315_v19  ;;  %v4023_v31 = vshll.u32 %v5795_v7, 16  ;;  %v5861_v21 = vld [vmem:[%s7133_s21 + $0xd4] sm:$0x1] }
 0x157   : > { %v6154_v24 = vpop.f32.mrb[35].mxu1  ;;  %v5812_v11 = vcombine.low %v4008_v61, %v4018_v16  ;;  %6518 = vmatprep.mubr.bf16.mxu1 %v5890_v8  ;;  %v5891_v1 = vcombine.low %v4313_v37, %v4316_v34  ;;  %v4022_v25 = vrot.slane %v4020_v59, 4  ;;  %v4033_v46 = vshrl.u32 %v5796_v15, 16 }
 0x158   : > { %v4025_v10 = vrot.slane %v4023_v31, 5  ;;  %v4031_v60 = vrot.slane %v4029_v6, 5  ;;  %v4319_v61 = vrot.slane %v5857_v54, 5  ;;  %v4041_v7 = vrot.slane %v4039_v29, 5 }
 0x159   : > { %v6044_v26 = vpop.f32.mrb[36].mxu0  ;;  %4828 = vmatprep.mubr.bf16.mxu0 %v5812_v11  ;;  %6519 = vmatmul.mubr.bf16.gmra.mrb[8].mxu1 %v5891_v1  ;;  %v4035_v19 = vrot.slane %v4033_v46, 4  ;;  %v4322_v39 = vrot.slane %v5858_v52, 5  ;;  %v8103_v35 = vadd.f32 %v6154_v24, %v8068_v32  ;;  %v5877_v59 = vrot.slane %v5859_v55, 9 }
 0x15a   : > { %v6045_v56 = vpop.f32.mrb[37].mxu0  ;;  %4829 = vmatmul.mubr.bf16.gmra.mrb[136].mxu0 %v6878_v4  ;;  %v4026_v37 = vor.u32 %v4025_v10, %v4022_v25  ;;  %v4320_v15 = vsel %vm7160_vm4, %v5876_v3, %v4319_v61  ;;  %v4321_v33 = vrot.slane %v4319_v61, 4  ;;  %v4326_v23 = vrot.slane %v5860_v12, 5 }
 0x15b   : > { %v6047_v5 = vpop.f32.mrb[38].mxu0  ;;  %v4036_v34 = vor.u32 %v4035_v19, %v4031_v60  ;;  %v4329_v54 = vrot.slane %v5861_v21, 5  ;;  %v8107_v31 = vadd.f32 %v6045_v56, %v6044_v26 }
 0x15c   : > { %v6156_v22 = vpop.f32.mrb[36].mxu1  ;;  %v6048_v20 = vpop.f32.mrb[39].mxu0  ;;  %v4027_v1 = vrot.slane %v4026_v37, 4  ;;  %v4323_v32 = vsel %vm7160_vm4, %v4321_v33, %v4322_v39  ;;  %v4327_v55 = vsel %vm7160_vm4, %v5877_v59, %v4326_v23  ;;  %v4328_v12 = vrot.slane %v4326_v23, 4 }
 0x15d   : > { %v6157_v18 = vpop.f32.mrb[37].mxu1  ;;  %v8111_v24 = vadd.f32 %v6048_v20, %v6047_v5  ;;  %v4037_v3 = vrot.slane %v4036_v34, 4  ;;  %v5892_v25 = vcombine.low %v4320_v15, %v4323_v32  ;;  %v6879_v20 = vld [vmem:[%s7133_s21 + $0xcc] sm:$0xff]   ;;  %s202_s21 = sand.u32 1, %s6942_s16  }
 0x15e   : > { %v6159_v38 = vpop.f32.mrb[38].mxu1  ;;  %v8113_v52 = vadd.f32 %v6157_v18, %v6156_v22  ;;  %v4032_v26 = vsel %vm7167_vm5, %v4027_v1, %v4031_v60  ;;  %v4330_v18 = vsel %vm7160_vm4, %v4328_v12, %v4329_v54  ;;  %s5348_s29 = sshll.u32 %s202_s21, 8  ;;  %s8478_s18 = scalar_lea.sflag [#allocation5], %s202_s21 }
 0x15f   : > { %v6160_v16 = vpop.f32.mrb[39].mxu1  ;;  %v4042_v22 = vsel %vm7167_vm5, %v4037_v3, %v4041_v7  ;;  %6522 = vmatprep.mubr.bf16.mxu1 %v5892_v25  ;;  %v5893_v60 = vcombine.low %v4327_v55, %v4330_v18  ;;  %s8337_s30 = scalar_lea.vmem [#allocation4], %s5348_s29 }
 0x160   : > { %v8119_v56 = vadd.f32 %v6160_v16, %v6159_v38  ;;  %v5813_v19 = vcombine.low %v4032_v26, %v4042_v22  ;;  %s5260_s6 = sshll.u32 %s8337_s30, 4  ;;  %s8472_s6 = int_to_ptr.vmem [resolvable:$true] %s5260_s6 }
 0x161   : > { %v6050_v8 = vpop.f32.mrb[40].mxu0  ;;  %6523 = vmatmul.mubr.bf16.gmra.mrb[12].mxu1 %v5893_v60  ;;  %s6880_s10 = scalar_lea.vmem %s8472_s6, 4096  ;;  %p6887_p1 = scmp.lt.s32.totalorder %s8472_s6, %s6885_s12 }
 0x162   : > { %v6051_v11 = vpop.f32.mrb[41].mxu0  ;;  %4836 = vmatprep.mubr.bf16.mxu0 %v5813_v19  ;;  %p6881_p12 = scmp.ne.s32.totalorder %s8472_s6, %s6880_s10  ;;  %p6888_p2 = scmp.lt.s32.totalorder %s6886_s13, %s6880_s10 }
 0x163   : > { %v6053_v6 = vpop.f32.mrb[42].mxu0  ;;  %v8121_v29 = vadd.f32 %v6051_v11, %v6050_v8  ;;  %4837 = vmatmul.mubr.bf16.gmra.mrb[140].mxu0 %v6879_v20 }
 0x164   : > { %v6054_v4 = vpop.f32.mrb[43].mxu0  ;;  %v6162_v46 = vpop.f32.mrb[40].mxu1  ;;  %p6882_p13 = pnand %p6881_p12, %p7028_p4  ;;  %p6889_p3 = por %p6888_p2, %p6887_p1 }
 0x165   : > { %v8123_v21 = vadd.f32 %v6054_v4, %v6053_v6  ;;  %v6163_v5 = vpop.f32.mrb[41].mxu1 }
 0x166   : > { %v8130_v10 = vadd.f32 %v6163_v5, %v6162_v46  ;;  %v6165_v61 = vpop.f32.mrb[42].mxu1  ;;  %p6883_p0 = pneg %p6882_p13 }
 0x167   : > { %v6166_v38 = vpop.f32.mrb[43].mxu1 }
 0x168   : > { %v8132_v16 = vadd.f32 %v6166_v38, %v6165_v61  ;;  %p6890_p5 = pnand %p6889_p3, %p6883_p0 }
 0x169   : > { %v6056_v39 = vpop.f32.mrb[44].mxu0 }
 0x16a   : > { %v6057_v8 = vpop.f32.mrb[45].mxu0 }
 0x16b   : > { %v8134_v42 = vadd.f32 %v6057_v8, %v6056_v39  ;;  %v6059_v7 = vpop.f32.mrb[46].mxu0 }
 0x16c   : > { %v6168_v37 = vpop.f32.mrb[44].mxu1  ;;  %v6060_v15 = vpop.f32.mrb[47].mxu0 }
 0x16d   : > { %v6061_v40 = vadd.f32 %v6060_v15, %v6059_v7  ;;  %v6169_v33 = vpop.f32.mrb[45].mxu1 }
 0x16e   : > { %v8136_v59 = vadd.f32 %v6169_v33, %v6168_v37  ;;  %v6171_v11 = vpop.f32.mrb[46].mxu1 }
 0x16f   : > { %v6172_v34 = vpop.f32.mrb[47].mxu1 }
 0x170   : > { %v8138_v23 = vadd.f32 %v6172_v34, %v6171_v11 }
 0x171   : > { %v6062_v54 = vpop.f32.mrb[48].mxu0 }
 0x172   : > { %v6063_v6 = vpop.f32.mrb[49].mxu0 }
 0x173   : > { %v8140_v1 = vadd.f32 %v6063_v6, %v6062_v54  ;;  %v6065_v32 = vpop.f32.mrb[50].mxu0 }
 0x174   : > { %v6066_v4 = vpop.f32.mrb[51].mxu0  ;;  %v6174_v25 = vpop.f32.mrb[48].mxu1 }
 0x175   : > { %v8142_v3 = vadd.f32 %v6066_v4, %v6065_v32  ;;  %v6175_v55 = vpop.f32.mrb[49].mxu1 }
 0x176   : > { %v6176_v12 = vadd.f32 %v6175_v55, %v6174_v25  ;;  %v6177_v46 = vpop.f32.mrb[50].mxu1 }
 0x177   : > { %v6178_v26 = vpop.f32.mrb[51].mxu1 }
 0x178   : > { %v8145_v22 = vadd.f32 %v6176_v12, %v8079_v51  ;;  %v6179_v20 = vadd.f32 %v6178_v26, %v6177_v46 }
 0x179   : > { %v6068_v5 = vpop.f32.mrb[52].mxu0 }
 0x17a   : > { %v6069_v18 = vpop.f32.mrb[53].mxu0  ;;  %v8150_v60 = vadd.f32 %v6179_v20, %v8081_v28 }
 0x17b   : > { %v8147_v61 = vadd.f32 %v6069_v18, %v6068_v5  ;;  %v6071_v19 = vpop.f32.mrb[54].mxu0 }
 0x17c   : > { %v6072_v38 = vpop.f32.mrb[55].mxu0  ;;  %v6180_v8 = vpop.f32.mrb[52].mxu1 }
 0x17d   : > { %v8152_v39 = vadd.f32 %v6072_v38, %v6071_v19  ;;  %v6181_v7 = vpop.f32.mrb[53].mxu1 }
 0x17e   : > { %v6182_v37 = vadd.f32 %v6181_v7, %v6180_v8  ;;  %v6183_v15 = vpop.f32.mrb[54].mxu1 }
 0x17f   : > { %v6184_v33 = vpop.f32.mrb[55].mxu1 }
 0x180   : > { %v8155_v51 = vadd.f32 %v6182_v37, %v8107_v31  ;;  %v6185_v34 = vadd.f32 %v6184_v33, %v6183_v15 }
 0x181   : > { %v6074_v11 = vpop.f32.mrb[56].mxu0 }
 0x182   : > { %v6075_v54 = vpop.f32.mrb[57].mxu0  ;;  %v8160_v28 = vadd.f32 %v6185_v34, %v8111_v24 }
 0x183   : > { %v8157_v6 = vadd.f32 %v6075_v54, %v6074_v11  ;;  %v6077_v32 = vpop.f32.mrb[58].mxu0 }
 0x184   : > { %v6078_v4 = vpop.f32.mrb[59].mxu0  ;;  %v6186_v55 = vpop.f32.mrb[56].mxu1 }
 0x185   : > { %v8162_v25 = vadd.f32 %v6078_v4, %v6077_v32  ;;  %v6187_v12 = vpop.f32.mrb[57].mxu1 }
 0x186   : > { %v6188_v46 = vadd.f32 %v6187_v12, %v6186_v55  ;;  %v6189_v26 = vpop.f32.mrb[58].mxu1 }
 0x187   : > { %v6190_v5 = vpop.f32.mrb[59].mxu1 }
 0x188   : > { %v8165_v20 = vadd.f32 %v6188_v46, %v8121_v29  ;;  %v6191_v31 = vadd.f32 %v6190_v5, %v6189_v26 }
 0x189   : > { %v6080_v18 = vpop.f32.mrb[60].mxu0 }
 0x18a   : > { %v8168_v19 = vadd.f32 %v6191_v31, %v8123_v21  ;;  %v6081_v38 = vpop.f32.mrb[61].mxu0 }
 0x18b   : > { %v8170_v8 = vadd.f32 %v6081_v38, %v6080_v18  ;;  %v6083_v24 = vpop.f32.mrb[62].mxu0 }
 0x18c   : > { %v6192_v7 = vpop.f32.mrb[60].mxu1  ;;  %v6084_v37 = vpop.f32.mrb[63].mxu0 }
 0x18d   : > { %v6193_v15 = vpop.f32.mrb[61].mxu1  ;;  %v8172_v33 = vadd.f32 %v6084_v37, %v6083_v24 }
 0x18e   : > { %v6194_v11 = vadd.f32 %v6193_v15, %v6192_v7  ;;  %v6195_v34 = vpop.f32.mrb[62].mxu1 }
 0x18f   : > { %v6196_v54 = vpop.f32.mrb[63].mxu1 }
 0x190   : > { %v8175_v29 = vadd.f32 %v6194_v11, %v8134_v42  ;;  %v6197_v32 = vadd.f32 %v6196_v54, %v6195_v34 }
 0x191   : > { %v6400_v4 = vpop.f32.mrb[64].mxu0 }
 0x192   : > { %v8177_v55 = vadd.f32 %v6197_v32, %v6061_v40  ;;  %v1674_v21 = vadd.f32 %v6400_v4, %v7855_v43  ;;  %v1665_v12 = vpop.f32.mrb[65].mxu0 }
 0x193   : > { %v1666_v46 = vadd.f32 %v7802_v63, %v1665_v12  ;;  %v6401_v26 = vpop.f32.mrb[66].mxu0 }
 0x194   : > { %v8182_v5 = vadd.f32 %v7987_v50, %v1674_v21  ;;  %v6198_v31 = vpop.f32.mrb[64].mxu1  ;;  %v1677_v18 = vadd.f32 %v6401_v26, %v7872_v9  ;;  %v1668_v38 = vpop.f32.mrb[67].mxu0 }
 0x195   : > { %v8186_v42 = vadd.f32 %v7966_v57, %v1666_v46  ;;  %v6199_v24 = vpop.f32.mrb[65].mxu1  ;;  %v1669_v40 = vadd.f32 %v7826_v47, %v1668_v38 }
 0x196   : > { %v6200_v7 = vadd.f32 %v6199_v24, %v6198_v31  ;;  %v8190_v43 = vadd.f32 %v8004_v36, %v1677_v18  ;;  %v6201_v37 = vpop.f32.mrb[66].mxu1 }
 0x197   : > { %v8193_v63 = vadd.f32 %v7973_v30, %v1669_v40  ;;  %v6202_v50 = vpop.f32.mrb[67].mxu1 }
 0x198   : > { %v8196_v15 = vadd.f32 %v6200_v7, %v8140_v1  ;;  %v6203_v9 = vadd.f32 %v6202_v50, %v6201_v37 }
 0x199   : > { %v6404_v57 = vpop.f32.mrb[68].mxu0 }
 0x19a   : > { %v8199_v11 = vadd.f32 %v6203_v9, %v8142_v3  ;;  %v1690_v34 = vadd.f32 %v6404_v57, %v7920_v13  ;;  %v1681_v47 = vpop.f32.mrb[69].mxu0 }
 0x19b   : > { %v1682_v54 = vadd.f32 %v7894_v58, %v1681_v47  ;;  %v6405_v36 = vpop.f32.mrb[70].mxu0 }
 0x19c   : > { %v8204_v32 = vadd.f32 %v8053_v17, %v1690_v34  ;;  %v6204_v30 = vpop.f32.mrb[68].mxu1  ;;  %v1693_v4 = vadd.f32 %v6405_v36, %v7926_v53  ;;  %v1684_v21 = vpop.f32.mrb[71].mxu0  ;;  %v8538_v36 = vld [vmem:[#allocation7_spill] sm:$0xff] }
 0x19d   : > { %v8208_v1 = vadd.f32 %v8023_v2, %v1682_v54  ;;  %v6205_v12 = vpop.f32.mrb[69].mxu1  ;;  %v1685_v3 = vadd.f32 %v7900_v0, %v1684_v21 }
 0x19e   : > { %v6206_v46 = vadd.f32 %v6205_v12, %v6204_v30  ;;  %v8212_v13 = vadd.f32 %v8071_v14, %v1693_v4  ;;  %v6207_v26 = vpop.f32.mrb[70].mxu1 }
 0x19f   : > { %v8215_v58 = vadd.f32 %v8036_v45, %v1685_v3  ;;  %v6208_v17 = vpop.f32.mrb[71].mxu1 }
 0x1a0   : > { %v8218_v31 = vadd.f32 %v6206_v46, %v8147_v61  ;;  %v6209_v53 = vadd.f32 %v6208_v17, %v6207_v26  ;;  %v8540_v46 = vld [vmem:[#allocation8_spill] sm:$0xff] }
 0x1a1   : > { %v6408_v2 = vpop.f32.mrb[72].mxu0 }
 0x1a2   : > { %v8221_v18 = vadd.f32 %v6209_v53, %v8152_v39  ;;  %v1706_v38 = vadd.f32 %v6408_v2, %v7979_v44  ;;  %v1697_v0 = vpop.f32.mrb[73].mxu0 }
 0x1a3   : > { %v1698_v24 = vadd.f32 %v7951_v48, %v1697_v0  ;;  %v6409_v14 = vpop.f32.mrb[74].mxu0 }
 0x1a4   : > { %v8226_v40 = vadd.f32 %v8113_v52, %v1706_v38  ;;  %v6210_v45 = vpop.f32.mrb[72].mxu1  ;;  %v1709_v7 = vadd.f32 %v6409_v14, %v7985_v49  ;;  %v1700_v37 = vpop.f32.mrb[75].mxu0 }
 0x1a5   : > { %v8230_v61 = vadd.f32 %v8088_v41, %v1698_v24  ;;  %v6211_v50 = vpop.f32.mrb[73].mxu1  ;;  %v1701_v39 = vadd.f32 %v7959_v27, %v1700_v37 }
 0x1a6   : > { %v6212_v9 = vadd.f32 %v6211_v50, %v6210_v45  ;;  %v8234_v44 = vadd.f32 %v8119_v56, %v1709_v7  ;;  %v6213_v57 = vpop.f32.mrb[74].mxu1 }
 0x1a7   : > { %v8237_v48 = vadd.f32 %v8103_v35, %v1701_v39  ;;  %v6214_v52 = vpop.f32.mrb[75].mxu1  ;;  %v8539_v35 = vld [vmem:[#allocation9_spill] sm:$0xff] }
 0x1a8   : > { %v8240_v34 = vadd.f32 %v6212_v9, %v8157_v6  ;;  %v6215_v49 = vadd.f32 %v6214_v52, %v6213_v57 }
 0x1a9   : > { %v6412_v41 = vpop.f32.mrb[76].mxu0 }
 0x1aa   : > { %v8243_v47 = vadd.f32 %v6215_v49, %v8162_v25  ;;  %v1722_v54 = vadd.f32 %v6412_v41, %v8043_v62  ;;  %v1713_v27 = vpop.f32.mrb[77].mxu0 }
 0x1ab   : > { %v1714_v30 = vadd.f32 %v8538_v36, %v1713_v27  ;;  %v6413_v56 = vpop.f32.mrb[78].mxu0 }
 0x1ac   : > { %v8248_v4 = vadd.f32 %v8136_v59, %v1722_v54  ;;  %v1725_v21 = vadd.f32 %v6413_v56, %v8539_v35  ;;  %v1716_v12 = vpop.f32.mrb[79].mxu0  ;;  %v6216_v3 = vpop.f32.mrb[76].mxu1 }
 0x1ad   : > { %v8252_v6 = vadd.f32 %v8130_v10, %v1714_v30  ;;  %v1717_v25 = vadd.f32 %v8540_v46, %v1716_v12  ;;  %v6217_v26 = vpop.f32.mrb[77].mxu1 }
 0x1ae   : > { %v8256_v17 = vadd.f32 %v8138_v23, %v1725_v21  ;;  %v6218_v62 = vadd.f32 %v6217_v26, %v6216_v3  ;;  %v6219_v53 = vpop.f32.mrb[78].mxu1 }
 0x1af   : > { %v6603_v2 = vadd.f32 %v8132_v16, %v1717_v25  ;;  %v6220_v38 = vpop.f32.mrb[79].mxu1 }
 0x1b0   : > { %v8260_v59 = vadd.f32 %v6218_v62, %v8170_v8  ;;  %v6221_v0 = vadd.f32 %v6220_v38, %v6219_v53 }
 0x1b2   : > { %v8263_v24 = vadd.f32 %v6221_v0, %v8172_v33 }
 0x1b3   : > { %v6262_v10 = vpop.f32.mrb[80].mxu0 }
 0x1b4   : > { %v6263_v14 = vpop.f32.mrb[81].mxu0 }
 0x1b5   : > { %v6264_v45 = vadd.f32 %v6263_v14, %v6262_v10  ;;  %v6265_v7 = vpop.f32.mrb[82].mxu0 }
 0x1b6   : > { %v6266_v37 = vpop.f32.mrb[83].mxu0 }
 0x1b7   : > { %v6267_v50 = vadd.f32 %v6266_v37, %v6265_v7  ;;  %v8266_v23 = vadd.f32 %v8186_v42, %v6264_v45 }
 0x1b9   : > { %v8269_v39 = vadd.f32 %v8193_v63, %v6267_v50 }
 0x1bd   : > { %v6268_v16 = vpop.f32.mrb[84].mxu0 }
 0x1be   : > { %v6269_v9 = vpop.f32.mrb[85].mxu0 }
 0x1bf   : > { %v6270_v8 = vadd.f32 %v6269_v9, %v6268_v16  ;;  %v6271_v57 = vpop.f32.mrb[86].mxu0 }
 0x1c0   : > { %v6272_v52 = vpop.f32.mrb[87].mxu0 }
 0x1c1   : > { %v6273_v49 = vadd.f32 %v6272_v52, %v6271_v57  ;;  %v6544_v33 = vadd.f32 %v8182_v5, %v6270_v8 }
 0x1c3   : > { %v6552_v41 = vadd.f32 %v8190_v43, %v6273_v49 }
 0x1c6   : > { %v6274_v54 = vpop.f32.mrb[88].mxu0 }
 0x1c7   : > { %v6275_v27 = vpop.f32.mrb[89].mxu0 }
 0x1c8   : > { %v6276_v36 = vadd.f32 %v6275_v27, %v6274_v54  ;;  %v6277_v30 = vpop.f32.mrb[90].mxu0 }
 0x1c9   : > { %v6278_v56 = vpop.f32.mrb[91].mxu0 }
 0x1ca   : > { %v6279_v42 = vadd.f32 %v6278_v56, %v6277_v30  ;;  %v8274_v35 = vadd.f32 %v8208_v1, %v6276_v36 }
 0x1cc   : > { %v8277_v63 = vadd.f32 %v8215_v58, %v6279_v42 }
 0x1ce   : > { %v6280_v21 = vpop.f32.mrb[92].mxu0 }
 0x1cf   : > { %v6281_v12 = vpop.f32.mrb[93].mxu0 }
 0x1d0   : > { %v6282_v3 = vadd.f32 %v6281_v12, %v6280_v21  ;;  %v6283_v46 = vpop.f32.mrb[94].mxu0 }
 0x1d1   : > { %v6284_v25 = vpop.f32.mrb[95].mxu0 }
 0x1d2   : > { %v6285_v5 = vadd.f32 %v6284_v25, %v6283_v46  ;;  %v8280_v43 = vadd.f32 %v8204_v32, %v6282_v3  ;;  %v8309_v3 = vld [vmem:[%s8526_s2] ss:$0 sm:$0xff] }
 0x1d4   : > { %v8283_v26 = vadd.f32 %v8212_v13, %v6285_v5  ;;  %v8317_v5 = vld [vmem:[%s8527_s3] ss:$0 sm:$0xff] }
 0x1d6   : > { %v6286_v62 = vpop.f32.mrb[96].mxu0 }
 0x1d7   : > { %v6287_v53 = vpop.f32.mrb[97].mxu0 }
 0x1d8   : > { %v6288_v38 = vadd.f32 %v6287_v53, %v6286_v62  ;;  %v6289_v1 = vpop.f32.mrb[98].mxu0 }
 0x1d9   : > { %v6290_v0 = vpop.f32.mrb[99].mxu0 }
 0x1da   : > { %v6291_v10 = vadd.f32 %v6290_v0, %v6289_v1  ;;  %v8286_v58 = vadd.f32 %v8230_v61, %v6288_v38 }
 0x1dc   : > { %v8289_v14 = vadd.f32 %v8237_v48, %v6291_v10 }
 0x1de   : > { %v6292_v45 = vpop.f32.mrb[100].mxu0 }
 0x1df   : > { %v6293_v7 = vpop.f32.mrb[101].mxu0 }
 0x1e0   : > { %v6294_v37 = vadd.f32 %v6293_v7, %v6292_v45  ;;  %v6295_v32 = vpop.f32.mrb[102].mxu0 }
 0x1e1   : > { %v6296_v50 = vpop.f32.mrb[103].mxu0 }
 0x1e2   : > { %v6297_v16 = vadd.f32 %v6296_v50, %v6295_v32  ;;  %v8292_v13 = vadd.f32 %v8226_v40, %v6294_v37 }
 0x1e4   : > { %v8295_v9 = vadd.f32 %v8234_v44, %v6297_v16 }
 0x1ec   : > { %v6298_v8 = vpop.f32.mrb[104].mxu0 }
 0x1ed   : > { %v6299_v57 = vpop.f32.mrb[105].mxu0 }
 0x1ee   : > { %v6300_v61 = vadd.f32 %v6299_v57, %v6298_v8  ;;  %v6301_v52 = vpop.f32.mrb[106].mxu0 }
 0x1ef   : > { %v6302_v49 = vpop.f32.mrb[107].mxu0 }
 0x1f0   : > { %v6303_v48 = vadd.f32 %v6302_v49, %v6301_v52  ;;  %v8298_v54 = vadd.f32 %v8252_v6, %v6300_v61 }
 0x1f2   : > { %v8300_v27 = vadd.f32 %v6603_v2, %v6303_v48 }
 0x1f4   : > { %v6304_v36 = vpop.f32.mrb[108].mxu0 }
 0x1f5   : > { %v6305_v30 = vpop.f32.mrb[109].mxu0 }
 0x1f6   : > { %v6306_v40 = vadd.f32 %v6305_v30, %v6304_v36  ;;  %v6307_v56 = vpop.f32.mrb[110].mxu0  ;;  %v6496_v12 = vpop.f32.mrb[80].mxu1 }
 0x1f7   : > { %v6308_v42 = vpop.f32.mrb[111].mxu0  ;;  %v6545_v2 = vadd.f32 %v6544_v33, %v6496_v12  ;;  %v4879_v46 = vpop.f32.mrb[81].mxu1 }
 0x1f8   : > { %v6309_v44 = vadd.f32 %v6308_v42, %v6307_v56  ;;  %v8303_v21 = vadd.f32 %v8248_v4, %v6306_v40  ;;  %v6549_v4 = vadd.f32 %v8266_v23, %v4879_v46  ;;  %v6497_v62 = vpop.f32.mrb[82].mxu1 }
 0x1f9   : > { %v5111_v53 = vmul.f32 %v6545_v2, %v8309_v3  ;;  %v6553_v1 = vadd.f32 %v6552_v41, %v6497_v62  ;;  %v4882_v0 = vpop.f32.mrb[83].mxu1 }
 0x1fa   : > { %v8312_v6 = vadd.f32 %v8256_v17, %v6309_v44  ;;  %v5109_v33 = vmul.f32 %v6549_v4, %v8309_v3  ;;  %v6557_v45 = vadd.f32 %v8269_v39, %v4882_v0 }
 0x1fb   : > { %v5150_v7 = vadd.f32 %v8317_v5, %v5111_v53  ;;  %v5112_v37 = vmul.f32 %v6553_v1, %v8309_v3 }
 0x1fc   : > { %v6310_v25 = vpop.f32.mrb[112].mxu0  ;;  %v5148_v23 = vadd.f32 %v8317_v5, %v5109_v33  ;;  %v5110_v16 = vmul.f32 %v6557_v45, %v8309_v3 }
 0x1fd   : > { %v6311_v38 = vpop.f32.mrb[113].mxu0  ;;  %v5182_v41 = vmax.f32 %v5150_v7, 0.0  ;;  %v5151_v57 = vadd.f32 %v8317_v5, %v5112_v37 }
 0x1fe   : > { %v6312_v17 = vadd.f32 %v6311_v38, %v6310_v25  ;;  %v6313_v10 = vpop.f32.mrb[114].mxu0  ;;  %v5180_v61 = vmax.f32 %v5148_v23, 0.0  ;;  %v5149_v52 = vadd.f32 %v8317_v5, %v5110_v16  ;;  %v6500_v39 = vpop.f32.mrb[84].mxu1 }
 0x1ff   : > { %v6314_v32 = vpop.f32.mrb[115].mxu0  ;;  %5214 = vst [vmem:[%s8337_s30 + $0x10] sm:$0xff] %v5182_v41  ;;  %v5183_v48 = vmax.f32 %v5151_v57, 0.0  ;;  %v4895_v36 = vpop.f32.mrb[85].mxu1 }
 0x200   : > { %v6315_v50 = vadd.f32 %v6314_v32, %v6313_v10  ;;  %v8330_v8 = vadd.f32 %v8145_v22, %v6312_v17  ;;  %v6561_v22 = vadd.f32 %v8280_v43, %v6500_v39  ;;  %5212 = vst [vmem:[%s8337_s30] sm:$0xff] %v5180_v61  ;;  %v5181_v30 = vmax.f32 %v5149_v52, 0.0  ;;  %v6501_v42 = vpop.f32.mrb[86].mxu1 }
 0x201   : > { %v6565_v56 = vadd.f32 %v8274_v35, %v4895_v36  ;;  %5215 = vst [vmem:[%s8337_s30 + $0x18] sm:$0xff] %v5183_v48  ;;  %v6569_v12 = vadd.f32 %v8283_v26, %v6501_v42  ;;  %v4898_v2 = vpop.f32.mrb[87].mxu1 }
 0x202   : > { %v8335_v49 = vadd.f32 %v8150_v60, %v6315_v50  ;;  %v5115_v60 = vmul.f32 %v6561_v22, %v8309_v3  ;;  %5213 = vst [vmem:[%s8337_s30 + $0x8] sm:$0xff] %v5181_v30  ;;  %v6573_v4 = vadd.f32 %v8277_v63, %v4898_v2 }
 0x203   : > { %v5113_v25 = vmul.f32 %v6565_v56, %v8309_v3  ;;  %v5116_v35 = vmul.f32 %v6569_v12, %v8309_v3 }
 0x204   : > { %v6316_v40 = vpop.f32.mrb[116].mxu0  ;;  %v5154_v62 = vadd.f32 %v8317_v5, %v5115_v60  ;;  %v5114_v26 = vmul.f32 %v6573_v4, %v8309_v3 }
 0x205   : > { %v6317_v44 = vpop.f32.mrb[117].mxu0  ;;  %v5152_v38 = vadd.f32 %v8317_v5, %v5113_v25  ;;  %v5155_v33 = vadd.f32 %v8317_v5, %v5116_v35 }
 0x206   : > { %v6318_v46 = vadd.f32 %v6317_v44, %v6316_v40  ;;  %v6319_v43 = vpop.f32.mrb[118].mxu0  ;;  %v5186_v17 = vmax.f32 %v5154_v62, 0.0  ;;  %v5153_v63 = vadd.f32 %v8317_v5, %v5114_v26 }
 0x207   : > { %v6320_v53 = vpop.f32.mrb[119].mxu0  ;;  %v5184_v10 = vmax.f32 %v5152_v38, 0.0  ;;  %v5187_v37 = vmax.f32 %v5155_v33, 0.0 }
 0x208   : > { %v6321_v1 = vadd.f32 %v6320_v53, %v6319_v43  ;;  %v8354_v0 = vadd.f32 %v8155_v51, %v6318_v46  ;;  %5218 = vst [vmem:[%s8337_s30 + $0x30] sm:$0xff] %v5186_v17  ;;  %v5185_v51 = vmax.f32 %v5153_v63, 0.0 }
 0x209   : > { %v6504_v45 = vpop.f32.mrb[88].mxu1  ;;  %5216 = vst [vmem:[%s8337_s30 + $0x20] sm:$0xff] %v5184_v10  ;;  %5219 = vst [vmem:[%s8337_s30 + $0x38] sm:$0xff] %v5187_v37 }
 0x20a   : > { %v8359_v7 = vadd.f32 %v8160_v28, %v6321_v1  ;;  %v6577_v32 = vadd.f32 %v8292_v13, %v6504_v45  ;;  %v4911_v23 = vpop.f32.mrb[89].mxu1  ;;  %5217 = vst [vmem:[%s8337_s30 + $0x28] sm:$0xff] %v5185_v51 }
 0x20b   : > { %v6581_v16 = vadd.f32 %v8286_v58, %v4911_v23  ;;  %v6505_v41 = vpop.f32.mrb[90].mxu1 }
 0x20c   : > { %v6322_v50 = vpop.f32.mrb[120].mxu0  ;;  %v5119_v57 = vmul.f32 %v6577_v32, %v8309_v3  ;;  %v6585_v52 = vadd.f32 %v8295_v9, %v6505_v41  ;;  %v4914_v39 = vpop.f32.mrb[91].mxu1 }
 0x20d   : > { %v6323_v61 = vpop.f32.mrb[121].mxu0  ;;  %v5117_v48 = vmul.f32 %v6581_v16, %v8309_v3  ;;  %v6589_v22 = vadd.f32 %v8289_v14, %v4914_v39 }
 0x20e   : > { %v6324_v28 = vadd.f32 %v6323_v61, %v6322_v50  ;;  %v6325_v13 = vpop.f32.mrb[122].mxu0  ;;  %v5158_v36 = vadd.f32 %v8317_v5, %v5119_v57  ;;  %v5120_v58 = vmul.f32 %v6585_v52, %v8309_v3 }
 0x20f   : > { %v6326_v30 = vpop.f32.mrb[123].mxu0  ;;  %v5156_v40 = vadd.f32 %v8317_v5, %v5117_v48  ;;  %v5118_v9 = vmul.f32 %v6589_v22, %v8309_v3 }
 0x210   : > { %v6327_v56 = vadd.f32 %v6326_v30, %v6325_v13  ;;  %v8376_v42 = vadd.f32 %v8165_v20, %v6324_v28  ;;  %v5190_v60 = vmax.f32 %v5158_v36, 0.0  ;;  %v5159_v44 = vadd.f32 %v8317_v5, %v5120_v58 }
 0x211   : > { %v5188_v14 = vmax.f32 %v5156_v40, 0.0  ;;  %v5157_v12 = vadd.f32 %v8317_v5, %v5118_v9 }
 0x212   : > { %v8381_v2 = vadd.f32 %v8168_v19, %v6327_v56  ;;  %5222 = vst [vmem:[%s8337_s30 + $0x50] sm:$0xff] %v5190_v60  ;;  %v5191_v46 = vmax.f32 %v5159_v44, 0.0 }
 0x213   : > { %v6508_v25 = vpop.f32.mrb[92].mxu1  ;;  %5220 = vst [vmem:[%s8337_s30 + $0x40] sm:$0xff] %v5188_v14  ;;  %v5189_v43 = vmax.f32 %v5157_v12, 0.0 }
 0x214   : > { %v6328_v4 = vpop.f32.mrb[124].mxu0  ;;  %v6593_v62 = vadd.f32 %v8303_v21, %v6508_v25  ;;  %v4927_v20 = vpop.f32.mrb[93].mxu1  ;;  %5223 = vst [vmem:[%s8337_s30 + $0x58] sm:$0xff] %v5191_v46 }
 0x215   : > { %v6329_v35 = vpop.f32.mrb[125].mxu0  ;;  %v6597_v53 = vadd.f32 %v8298_v54, %v4927_v20  ;;  %v6509_v38 = vpop.f32.mrb[94].mxu1  ;;  %5221 = vst [vmem:[%s8337_s30 + $0x48] sm:$0xff] %v5189_v43 }
 0x216   : > { %v5123_v1 = vmul.f32 %v6593_v62, %v8309_v3  ;;  %v6330_v26 = vadd.f32 %v6329_v35, %v6328_v4  ;;  %v6331_v19 = vpop.f32.mrb[126].mxu0  ;;  %v6601_v17 = vadd.f32 %v8312_v6, %v6509_v38  ;;  %v4930_v33 = vpop.f32.mrb[95].mxu1 }
 0x217   : > { %v5121_v10 = vmul.f32 %v6597_v53, %v8309_v3  ;;  %v6332_v63 = vpop.f32.mrb[127].mxu0  ;;  %v6605_v21 = vadd.f32 %v8300_v27, %v4930_v33 }
 0x218   : > { %v5162_v45 = vadd.f32 %v8317_v5, %v5123_v1  ;;  %v5124_v37 = vmul.f32 %v6601_v17, %v8309_v3  ;;  %v6333_v54 = vadd.f32 %v6332_v63, %v6331_v19  ;;  %v6619_v32 = vadd.f32 %v8175_v29, %v6330_v26 }
 0x219   : > { %v5160_v23 = vadd.f32 %v8317_v5, %v5121_v10  ;;  %v5122_v51 = vmul.f32 %v6605_v21, %v8309_v3 }
 0x21a   : > { %v5194_v6 = vmax.f32 %v5162_v45, 0.0  ;;  %v5163_v50 = vadd.f32 %v8317_v5, %v5124_v37  ;;  %v6625_v16 = vadd.f32 %v8177_v55, %v6333_v54 }
 0x21b   : > { %v5192_v41 = vmax.f32 %v5160_v23, 0.0  ;;  %v5161_v27 = vadd.f32 %v8317_v5, %v5122_v51  ;;  %v6512_v57 = vpop.f32.mrb[0].mxu1 }
 0x21c   : > { %5226 = vst [vmem:[%s8337_s30 + $0x70] sm:$0xff] %v5194_v6  ;;  %v5195_v61 = vmax.f32 %v5163_v50, 0.0  ;;  %v6334_v52 = vpop.f32.mrb[128].mxu0  ;;  %v6608_v29 = vadd.f32 %v8354_v0, %v6512_v57  ;;  %v4943_v39 = vpop.f32.mrb[1].mxu1 }
 0x21d   : > { %5224 = vst [vmem:[%s8337_s30 + $0x60] sm:$0xff] %v5192_v41  ;;  %v5193_v28 = vmax.f32 %v5161_v27, 0.0  ;;  %v6335_v48 = vpop.f32.mrb[129].mxu0  ;;  %v6611_v13 = vadd.f32 %v8330_v8, %v4943_v39  ;;  %v6513_v22 = vpop.f32.mrb[2].mxu1 }
 0x21e   : > { %5227 = vst [vmem:[%s8337_s30 + $0x78] sm:$0xff] %v5195_v61  ;;  %v5127_v55 = vmul.f32 %v6608_v29, %v8309_v3  ;;  %v6336_v36 = vadd.f32 %v6335_v48, %v6334_v52  ;;  %v6337_v58 = vpop.f32.mrb[130].mxu0  ;;  %v6614_v30 = vadd.f32 %v8359_v7, %v6513_v22  ;;  %v4946_v40 = vpop.f32.mrb[3].mxu1 }
 0x21f   : > { %5225 = vst [vmem:[%s8337_s30 + $0x68] sm:$0xff] %v5193_v28  ;;  %v5125_v56 = vmul.f32 %v6611_v13, %v8309_v3  ;;  %v6338_v0 = vpop.f32.mrb[131].mxu0  ;;  %v6617_v9 = vadd.f32 %v8335_v49, %v4946_v40 }
 0x220   : > { %v5166_v60 = vadd.f32 %v8317_v5, %v5127_v55  ;;  %v5128_v8 = vmul.f32 %v6614_v30, %v8309_v3  ;;  %v6339_v44 = vadd.f32 %v6338_v0, %v6337_v58  ;;  %v6634_v14 = vadd.f32 %v8196_v15, %v6336_v36 }
 0x221   : > { %v5164_v12 = vadd.f32 %v8317_v5, %v5125_v56  ;;  %v5126_v7 = vmul.f32 %v6617_v9, %v8309_v3 }
 0x222   : > { %v5198_v46 = vmax.f32 %v5166_v60, 0.0  ;;  %v5167_v25 = vadd.f32 %v8317_v5, %v5128_v8  ;;  %v6640_v43 = vadd.f32 %v8199_v11, %v6339_v44 }
 0x223   : > { %v5196_v4 = vmax.f32 %v5164_v12, 0.0  ;;  %v5165_v49 = vadd.f32 %v8317_v5, %v5126_v7  ;;  %v6516_v20 = vpop.f32.mrb[4].mxu1 }
 0x224   : > { %5230 = vst [vmem:[%s8337_s30 + $0x90] sm:$0xff] %v5198_v46  ;;  %v5199_v62 = vmax.f32 %v5167_v25, 0.0  ;;  %v6620_v53 = vadd.f32 %v6619_v32, %v6516_v20  ;;  %v4959_v15 = vpop.f32.mrb[5].mxu1 }
 0x225   : > { %5228 = vst [vmem:[%s8337_s30 + $0x80] sm:$0xff] %v5196_v4  ;;  %v5197_v35 = vmax.f32 %v5165_v49, 0.0  ;;  %v6340_v38 = vpop.f32.mrb[132].mxu0  ;;  %v6623_v1 = vadd.f32 %v8376_v42, %v4959_v15  ;;  %v6517_v26 = vpop.f32.mrb[6].mxu1 }
 0x226   : > { %5231 = vst [vmem:[%s8337_s30 + $0x98] sm:$0xff] %v5199_v62  ;;  %v5131_v19 = vmul.f32 %v6620_v53, %v8309_v3  ;;  %v6341_v17 = vpop.f32.mrb[133].mxu0  ;;  %v6626_v11 = vadd.f32 %v6625_v16, %v6517_v26  ;;  %v4962_v33 = vpop.f32.mrb[7].mxu1 }
 0x227   : > { %5229 = vst [vmem:[%s8337_s30 + $0x88] sm:$0xff] %v5197_v35  ;;  %v6342_v10 = vadd.f32 %v6341_v17, %v6340_v38  ;;  %v5129_v63 = vmul.f32 %v6623_v1, %v8309_v3  ;;  %v6343_v21 = vpop.f32.mrb[134].mxu0  ;;  %v6629_v45 = vadd.f32 %v8381_v2, %v4962_v33 }
 0x228   : > { %v5170_v37 = vadd.f32 %v8317_v5, %v5131_v19  ;;  %v5132_v54 = vmul.f32 %v6626_v11, %v8309_v3  ;;  %v6344_v42 = vpop.f32.mrb[135].mxu0 }
 0x229   : > { %v5168_v32 = vadd.f32 %v8317_v5, %v5129_v63  ;;  %v6345_v23 = vadd.f32 %v6344_v42, %v6343_v21  ;;  %v5130_v51 = vmul.f32 %v6629_v45, %v8309_v3  ;;  %v6631_v6 = vadd.f32 %v8218_v31, %v6342_v10 }
 0x22a   : > { %v5202_v50 = vmax.f32 %v5170_v37, 0.0  ;;  %v5171_v16 = vadd.f32 %v8317_v5, %v5132_v54 }
 0x22b   : > { %v5200_v41 = vmax.f32 %v5168_v32, 0.0  ;;  %v5169_v2 = vadd.f32 %v8317_v5, %v5130_v51  ;;  %v6637_v27 = vadd.f32 %v8221_v18, %v6345_v23 }
 0x22c   : > { %5234 = vst [vmem:[%s8337_s30 + $0xb0] sm:$0xff] %v5202_v50  ;;  %v5203_v57 = vmax.f32 %v5171_v16, 0.0  ;;  %v6520_v61 = vpop.f32.mrb[8].mxu1 }
 0x22d   : > { %5232 = vst [vmem:[%s8337_s30 + $0xa0] sm:$0xff] %v5200_v41  ;;  %v5201_v52 = vmax.f32 %v5169_v2, 0.0  ;;  %v6346_v29 = vpop.f32.mrb[136].mxu0  ;;  %v6632_v39 = vadd.f32 %v6631_v6, %v6520_v61  ;;  %v4975_v28 = vpop.f32.mrb[9].mxu1 }
 0x22e   : > { %5235 = vst [vmem:[%s8337_s30 + $0xb8] sm:$0xff] %v5203_v57  ;;  %v6347_v48 = vpop.f32.mrb[137].mxu0  ;;  %v6635_v31 = vadd.f32 %v6634_v14, %v4975_v28  ;;  %v6521_v13 = vpop.f32.mrb[10].mxu1 }
 0x22f   : > { %5233 = vst [vmem:[%s8337_s30 + $0xa8] sm:$0xff] %v5201_v52  ;;  %v5135_v22 = vmul.f32 %v6632_v39, %v8309_v3  ;;  %v6348_v55 = vadd.f32 %v6347_v48, %v6346_v29  ;;  %v6349_v36 = vpop.f32.mrb[138].mxu0  ;;  %v6638_v58 = vadd.f32 %v6637_v27, %v6521_v13  ;;  %v4978_v18 = vpop.f32.mrb[11].mxu1 }
 0x230   : > { %v5133_v30 = vmul.f32 %v6635_v31, %v8309_v3  ;;  %v6350_v40 = vpop.f32.mrb[139].mxu0  ;;  %v6641_v56 = vadd.f32 %v6640_v43, %v4978_v18 }
 0x231   : > { %v5174_v0 = vadd.f32 %v8317_v5, %v5135_v22  ;;  %v5136_v9 = vmul.f32 %v6638_v58, %v8309_v3  ;;  %v6351_v60 = vadd.f32 %v6350_v40, %v6349_v36  ;;  %v6646_v8 = vadd.f32 %v8240_v34, %v6348_v55 }
 0x232   : > { %v5172_v44 = vadd.f32 %v8317_v5, %v5133_v30  ;;  %v5134_v14 = vmul.f32 %v6641_v56, %v8309_v3 }
 0x233   : > { %v5206_v12 = vmax.f32 %v5174_v0, 0.0  ;;  %v5175_v7 = vadd.f32 %v8317_v5, %v5136_v9  ;;  %v6652_v46 = vadd.f32 %v8243_v47, %v6351_v60 }
 0x234   : > { %v5204_v25 = vmax.f32 %v5172_v44, 0.0  ;;  %v5173_v43 = vadd.f32 %v8317_v5, %v5134_v14  ;;  %v6524_v49 = vpop.f32.mrb[12].mxu1 }
 0x235   : > { %5238 = vst [vmem:[%s8337_s30 + $0xd0] sm:$0xff] %v5206_v12  ;;  %v5207_v4 = vmax.f32 %v5175_v7, 0.0  ;;  %v4991_v34 = vpop.f32.mrb[13].mxu1 }
 0x236   : > { %5236 = vst [vmem:[%s8337_s30 + $0xc0] sm:$0xff] %v5204_v25  ;;  %v5205_v62 = vmax.f32 %v5173_v43, 0.0  ;;  %v6352_v20 = vpop.f32.mrb[140].mxu0  ;;  %v6647_v53 = vadd.f32 %v6646_v8, %v4991_v34  ;;  %v6525_v15 = vpop.f32.mrb[14].mxu1 }
 0x237   : > { %5239 = vst [vmem:[%s8337_s30 + $0xd8] sm:$0xff] %v5207_v4  ;;  %v6353_v35 = vpop.f32.mrb[141].mxu0  ;;  %v4994_v26 = vpop.f32.mrb[15].mxu1 }
 0x238   : > { %5237 = vst [vmem:[%s8337_s30 + $0xc8] sm:$0xff] %v5205_v62  ;;  %v6354_v38 = vadd.f32 %v6353_v35, %v6352_v20  ;;  %v6355_v1 = vpop.f32.mrb[142].mxu0  ;;  %v5137_v47 = vmul.f32 %v6647_v53, %v8309_v3  ;;  %v6653_v17 = vadd.f32 %v6652_v46, %v4994_v26 }
 0x239   : > { %v6356_v19 = vpop.f32.mrb[143].mxu0 }
 0x23a   : > { %v6643_v11 = vadd.f32 %v8260_v59, %v6354_v38  ;;  %v6357_v33 = vadd.f32 %v6356_v19, %v6355_v1  ;;  %v5176_v10 = vadd.f32 %v8317_v5, %v5137_v47  ;;  %v5138_v63 = vmul.f32 %v6653_v17, %v8309_v3 }
 0x23c   : > { %v6644_v21 = vadd.f32 %v6643_v11, %v6524_v49  ;;  %v6649_v45 = vadd.f32 %v8263_v24, %v6357_v33  ;;  %v5208_v37 = vmax.f32 %v5176_v10, 0.0  ;;  %v5177_v54 = vadd.f32 %v8317_v5, %v5138_v63 }
 0x23e   : > { %v5139_v42 = vmul.f32 %v6644_v21, %v8309_v3  ;;  %v6650_v32 = vadd.f32 %v6649_v45, %v6525_v15  ;;  %5240 = vst [vmem:[%s8337_s30 + $0xe0] sm:$0xff] %v5208_v37  ;;  %v5209_v59 = vmax.f32 %v5177_v54, 0.0 }
 0x240   : > { %v5178_v23 = vadd.f32 %v8317_v5, %v5139_v42  ;;  %v5140_v51 = vmul.f32 %v6650_v32, %v8309_v3  ;;  %5241 = vst [vmem:[%s8337_s30 + $0xe8] sm:$0xff] %v5209_v59 }
 0x242   : > { %v5210_v24 = vmax.f32 %v5178_v23, 0.0  ;;  %v5179_v6 = vadd.f32 %v8317_v5, %v5140_v51 }
 0x244   : > { %5242 = vst [vmem:[%s8337_s30 + $0xf0] sm:$0xff] %v5210_v24  ;;  %v5211_v50 = vmax.f32 %v5179_v6, 0.0 }
 0x246   : > { %5243 = vst [vmem:[%s8337_s30 + $0xf8] sm:$0xff] %v5211_v50 }
 0x247   : > { %6893 = shalt.err (!%p6890_p5)
}
 0x248   : > { %s6894_s21 = scalar_lea.hbm %s8470_s9, 4096  ;;  %s6898_s24 = scalar_lea.hbm %s8528_s4, 8192 }
 0x249   : > { %p6895_p6 = scmp.ne.s32.totalorder %s8470_s9, %s6894_s21  ;;  %p6899_p10 = scmp.lt.u32.totalorder %s8470_s9, %s8528_s4 }
 0x24a   : > { %p6900_p11 = scmp.lt.u32.totalorder %s6898_s24, %s6894_s21  ;;  %p6902_p13 = scmp.lt.u32.totalorder %s6894_s21, %s8470_s9 }
 0x24b   : > { %p6896_p7 = pnand %p6895_p6, %p7028_p4 }
 0x24c   : > { %p6901_p12 = por %p6900_p11, %p6899_p10 }
 0x24d   : > { %p6897_p9 = pneg %p6896_p7 }
 0x24e   : > { %p6903_p0 = por %p6902_p13, %p6901_p12 }
 0x250   : > { %p6904_p1 = pnand %p6903_p0, %p6897_p9 }
 0x252   : > { %6907 = shalt.err (!%p6904_p1)
}
 0x253   : > { %s6961_s30 = smov 128   ;;  %s6962_s5 = smov 8  }
 0x254   : > { %6703 = dma.vmem_to_hbm [thread:$0]  (%p7028_p4), %s8472_s6, 4096, %s8470_s9, %s8478_s18, %s6961_s30, %s6961_s30, %s6962_s5  }
 0x255 PF: > { %p6709_p2 = scmp.ge.s32.totalorder %s6958_s20, 2  ;;  %s5275_s7 = sand.u32 1, %s6938_s15  }
 0x256   : > { %s5276_s8 = scalar_lea.sflag [#allocation5], %s5275_s7 }
 0x257   : > { %p6706_p3 = pnand %p6709_p2, %p7035_p8 }
 0x259   : > { %6933 = dma.done.wait (!%p6706_p3), %s5276_s8, 4096  }
 0x25a   : > { %6935 = vsyncadd (!%p6706_p3), %s5276_s8, 4294963200  ;;  %s17_s20 = sadd.s32 1, %s6958_s20   ;;  %s8541_s15 = smov %s6942_s16 }
 0x25b   : > { %p14_p5 = scmp.ge.s32.totalorder %s17_s20, 4   ;;  %s8542_s16 = smov %s6946_s17 }
 0x25c   : > { %s8543_s17 = smov %s7041_s28  ;;  %s8544_s18 = smov %s6954_s19 }
 0x25d   : > { %s8545_s19 = smov %s8547_s23  ;;  %16 = sbr.rel (!%p14_p5) target bundleno = 4 (0x4), region = 76 }
 0x264   :  { %5281 = vsyncpa [#allocation5], 1 }
 0x265   :  { %5283 = vsyncpa [#allocation5 + $0x1], 1 }

</bundles_post_ra>
